<compile_context>
chip_gen: v6e
topology: v6e:2x2x1
jax: 0.10.0
libtpu: 0.0.40
codegen_flags: <defaults>
</compile_context>

<pallas_src>
import jax
import jax.numpy as jnp
from jax.experimental import pallas as pl
from jax.experimental.pallas import tpu as pltpu

D_IN = 4 * 16 * 84          # 5376 input/output features
HID = 200                   # logical hidden size (module's self.hidsize)
HID_PAD = 256               # lane-aligned hidden size (zero padded, exact no-op)
TN = 896                    # decoder output chunk (7*128 lanes); 5376 / 896 = 6
N_J = D_IN // TN            # number of decoder-output chunks per batch tile


def _round_up(x, m):
    return ((x + m - 1) // m) * m


def _single_buffer_supported():
    """Build-time capability check for pl.Buffered (instead of a broad
    try/except around the pallas_call invocation)."""
    if not hasattr(pl, "Buffered"):
        return False
    try:
        pl.BlockSpec((8, 128), lambda i, j: (0, 0), pipeline_mode=pl.Buffered(1))
        return True
    except Exception:
        return False


_SINGLE_BUFFER_WEIGHTS = _single_buffer_supported()


def _hw_defaults():
    """Generation-aware batch-tile cap and scoped-VMEM limit.

    128 MiB VMEM reported (v5e/v6e) -> tb up to 512, 96 MiB scoped limit.
    v7x-class (64 MiB/TC) or unknown -> tb capped at 256, 52 MiB (leaves
    headroom for Mosaic internal scratch).
    """
    tb_max, vmem_limit = 256, 52 * 1024 * 1024
    try:
        vmem_cap = pltpu.get_tpu_info().vmem_capacity_bytes
    except Exception:  # hardware query unavailable -> keep conservative defaults
        vmem_cap = None
    if vmem_cap is not None and vmem_cap >= 96 * 1024 * 1024:
        tb_max, vmem_limit = 512, 96 * 1024 * 1024
    return tb_max, vmem_limit


def _pick_tb(batch, tb_max):
    """Batch tile: as large as the cap allows, but chosen so the number of
    batch tiles is even when possible, keeping both v7x TensorCores busy and
    balanced (harmless on single-core v5e/v6e)."""
    if batch <= 16:
        return batch                                   # block == full dim (tiny case)
    pairs = max(1, -(-batch // (2 * tb_max)))          # ceil(batch / (2*tb_max))
    tb = _round_up(-(-batch // (2 * pairs)), 8)        # ceil(batch / (2*pairs)), x8
    return min(tb, tb_max)


def _autoencoder_kernel(x_ref, w1_ref, b1_ref, w2_ref, b2_ref, o_ref, h_ref):
    # x_ref : (TB, D_IN)          f32   (batch tile; re-DMA'd only when i changes)
    # w1_ref: (D_IN, HID_PAD)     bf16  (VMEM-resident)
    # b1_ref: (1, HID_PAD)        f32   (VMEM-resident)
    # w2_ref: (N_J, HID_PAD, TN)  bf16  (VMEM-resident, chunk-major)
    # b2_ref: (1, TN)             f32   (streamed per output chunk)
    # o_ref : (TB, TN)            f32   (output chunk j of batch tile i)
    # h_ref : (TB, HID_PAD)       bf16  VMEM scratch carried across the j axis
    j = pl.program_id(1)

    # Encoder: run once per batch tile (chunk 0); h stays resident for chunks 1..N_J-1.
    @pl.when(j == 0)
    def _encode():
        x = x_ref[...].astype(jnp.bfloat16)                       # bf16 MXU inputs
        h = jnp.dot(x, w1_ref[...], preferred_element_type=jnp.float32)
        h = jnp.maximum(h + b1_ref[...], 0.0)                     # f32 bias + ReLU
        h_ref[...] = h.astype(jnp.bfloat16)

    # Decoder chunk j: sigmoid(h @ W2[:, j*TN:(j+1)*TN] + b2[j*TN:(j+1)*TN]).
    y = jnp.dot(h_ref[...], w2_ref[j], preferred_element_type=jnp.float32)
    y = y + b2_ref[...]
    o_ref[...] = jax.nn.sigmoid(y).astype(o_ref.dtype)


def _resident_spec(block_shape):
    """Grid-invariant operand: constant index_map; single-buffered when the
    Pallas version supports it (fetched from HBM exactly once per core)."""
    ndim = len(block_shape)
    index_map = lambda i, j: (0,) * ndim
    if _SINGLE_BUFFER_WEIGHTS:
        return pl.BlockSpec(block_shape, index_map, pipeline_mode=pl.Buffered(1))
    return pl.BlockSpec(block_shape, index_map)


def _build_forward(batch, tb, vmem_limit_bytes):
    n_i = -(-batch // tb)                 # ragged last batch tile handled by Pallas
    grid_spec = pltpu.PrefetchScalarGridSpec(
        num_scalar_prefetch=0,
        grid=(n_i, N_J),
        in_specs=[
            pl.BlockSpec((tb, D_IN), lambda i, j: (i, 0)),         # x tile
            _resident_spec((D_IN, HID_PAD)),                       # W1 (resident)
            _resident_spec((1, HID_PAD)),                          # b1 (resident)
            _resident_spec((N_J, HID_PAD, TN)),                    # W2 (resident, chunk-major)
            pl.BlockSpec((1, TN), lambda i, j: (0, j)),            # b2 chunk (streamed)
        ],
        out_specs=pl.BlockSpec((tb, TN), lambda i, j: (i, j)),
        scratch_shapes=[pltpu.VMEM((tb, HID_PAD), jnp.bfloat16)],  # h carry
    )
    return pl.pallas_call(
        _autoencoder_kernel,
        out_shape=jax.ShapeDtypeStruct((batch, D_IN), jnp.float32),
        grid_spec=grid_spec,
        compiler_params=pltpu.CompilerParams(
            # batch tiles are independent (megacore); decoder chunks carry h scratch
            dimension_semantics=("parallel", "arbitrary"),
            vmem_limit_bytes=vmem_limit_bytes,
        ),
    )


def deep_autoencoder_forward(x, w1, b1, w2, b2, *, tb=None):
    """x: (B, D_IN) f32; w1: (D_IN, HID); b1: (HID,); w2: (HID, D_IN); b2: (D_IN,).

    Returns sigmoid(relu(x @ w1 + b1) @ w2 + b2), shape (B, D_IN) float32.
    Weights are stored (in, out), i.e. the transpose of PyTorch's (out, in).
    """
    B, d = x.shape
    assert d == D_IN

    # One-time weight prep (wrapper, not per grid step): zero-pad hidden
    # 200 -> 256 (padded W1 cols / b1 entries are 0 so relu(0)=0 in the padded
    # lanes, and the padded W2 rows are 0 => exact no-op), cast matmul operands
    # to bf16, and lay W2 out chunk-major (N_J, HID_PAD, TN) so the kernel
    # selects a decoder chunk with a cheap leading-axis index.
    w1p = jnp.zeros((D_IN, HID_PAD), jnp.bfloat16).at[:, :HID].set(
        w1.astype(jnp.bfloat16))
    b1p = jnp.zeros((1, HID_PAD), jnp.float32).at[:, :HID].set(
        b1.reshape(1, HID).astype(jnp.float32))
    w2p = jnp.zeros((HID_PAD, D_IN), jnp.bfloat16).at[:HID, :].set(
        w2.astype(jnp.bfloat16))
    w2p = w2p.reshape(HID_PAD, N_J, TN).transpose(1, 0, 2)   # (N_J, HID_PAD, TN)
    b2p = b2.reshape(1, D_IN).astype(jnp.float32)

    tb_max, vmem_limit = _hw_defaults()
    if tb is None:
        tb = _pick_tb(B, tb_max)
    else:
        tb = max(1, min(tb, B))

    return _build_forward(B, tb, vmem_limit)(x, w1p, b1p, w2p, b2p)


def init_params(key):
    """Deterministic init matching PyTorch Linear default (uniform +-1/sqrt(fan_in)).

    Stored as (in, out): transpose of PyTorch's (out, in).
    """
    k1, k2, k3, k4 = jax.random.split(key, 4)
    bound1 = 1.0 / jnp.sqrt(float(D_IN))
    bound2 = 1.0 / jnp.sqrt(float(HID))
    w1 = jax.random.uniform(k1, (D_IN, HID), jnp.float32, -bound1, bound1)
    b1 = jax.random.uniform(k2, (HID,), jnp.float32, -bound1, bound1)
    w2 = jax.random.uniform(k3, (HID, D_IN), jnp.float32, -bound2, bound2)
    b2 = jax.random.uniform(k4, (D_IN,), jnp.float32, -bound2, bound2)
    return w1, b1, w2, b2


if __name__ == "__main__":
    key = jax.random.PRNGKey(0)
    kx, kp, kx2 = jax.random.split(key, 3)

    w1, b1, w2, b2 = init_params(kp)

    def reference(xx):
        # Plain-JAX f32 reference. The kernel uses bf16 MXU inputs with f32
        # accumulation; tolerance loosened accordingly (outputs in (0,1)).
        return jax.nn.sigmoid(jnp.maximum(xx @ w1 + b1, 0.0) @ w2 + b2)

    # `epoch` argument of the PyTorch forward is unused in the computation.
    # Small batch: single batch tile, exercises the chunked-decoder grid axis.
    B = 2
    x = jax.random.normal(kx, (B, D_IN), jnp.float32)
    out = jax.block_until_ready(deep_autoencoder_forward(x, w1, b1, w2, b2))
    assert out.shape == (B, D_IN)
    err = float(jnp.max(jnp.abs(out - reference(x))))
    assert err < 2e-2, err

    # Multi-tile batch: ragged last tile, exercises both grid axes + h carry.
    B2 = 24
    x2 = jax.random.normal(kx2, (B2, D_IN), jnp.float32)
    out2 = jax.block_until_ready(deep_autoencoder_forward(x2, w1, b1, w2, b2))
    assert out2.shape == (B2, D_IN)
    err2 = float(jnp.max(jnp.abs(out2 - reference(x2))))
    assert err2 < 2e-2, err2

    print("KERNEL_OK")
</pallas_src>

<mosaic_0001>
module attributes {stable_mosaic.version = 11 : i64} {
  func.func @_autoencoder_kernel(%arg0: i32, %arg1: i32, %arg2: memref<2x5376xf32, #tpu.memory_space<vmem>>, %arg3: memref<5376x256xbf16, #tpu.memory_space<vmem>>, %arg4: memref<1x256xf32, #tpu.memory_space<vmem>>, %arg5: memref<6x256x896xbf16, #tpu.memory_space<vmem>>, %arg6: memref<1x896xf32, #tpu.memory_space<vmem>>, %arg7: memref<2x896xf32, #tpu.memory_space<vmem>>, %arg8: memref<2x256xbf16, #tpu.memory_space<vmem>>) attributes {dimension_semantics = [#tpu.dimension_semantics<parallel>, #tpu.dimension_semantics<arbitrary>], iteration_bounds = array<i64: 1, 6>, scalar_prefetch = 0 : i64, scratch_operands = 1 : i64, tpu.core_type = #tpu.core_type<tc>, window_params = [{transform_indices = @transform_0, window_bounds = array<i64: 2, 5376>}, {pipeline_mode = #tpu.pipeline_mode<synchronous>, transform_indices = @transform_1, window_bounds = array<i64: 5376, 256>}, {pipeline_mode = #tpu.pipeline_mode<synchronous>, transform_indices = @transform_2, window_bounds = array<i64: 1, 256>}, {pipeline_mode = #tpu.pipeline_mode<synchronous>, transform_indices = @transform_3, window_bounds = array<i64: 6, 256, 896>}, {transform_indices = @transform_4, window_bounds = array<i64: 1, 896>}, {transform_indices = @transform_5, window_bounds = array<i64: 2, 896>}]} {
    %c0_i32 = arith.constant 0 : i32
    %0 = arith.cmpi eq, %arg1, %c0_i32 : i32
    %1 = arith.extui %0 : i1 to i32
    %c0_i32_0 = arith.constant 0 : i32
    %2 = arith.cmpi ne, %1, %c0_i32_0 : i32
    scf.if %2 {
      %c0_9 = arith.constant 0 : index
      %c0_10 = arith.constant 0 : index
      %17 = vector.load %arg2[%c0_9, %c0_10] : memref<2x5376xf32, #tpu.memory_space<vmem>>, vector<2x5376xf32>
      %18 = arith.truncf %17 : vector<2x5376xf32> to vector<2x5376xbf16>
      %c0_11 = arith.constant 0 : index
      %c0_12 = arith.constant 0 : index
      %19 = vector.load %arg3[%c0_11, %c0_12] : memref<5376x256xbf16, #tpu.memory_space<vmem>>, vector<5376x256xbf16>
      %cst_13 = arith.constant dense<0.000000e+00> : vector<2x256xf32>
      %20 = tpu.matmul %18, %19, %cst_13 {dimension_numbers = #tpu.dot_dimension_numbers<[1], [0], [0], [1], [0, 0, 1, 1], [], []>} : vector<2x5376xbf16>, vector<5376x256xbf16>, vector<2x256xf32> -> vector<2x256xf32>
      %c0_14 = arith.constant 0 : index
      %c0_15 = arith.constant 0 : index
      %21 = vector.load %arg4[%c0_14, %c0_15] : memref<1x256xf32, #tpu.memory_space<vmem>>, vector<1x256xf32>
      %22 = vector.broadcast %21 : vector<1x256xf32> to vector<2x256xf32>
      %23 = arith.addf %20, %22 : vector<2x256xf32>
      %cst_16 = arith.constant 0.000000e+00 : f32
      %24 = vector.broadcast %cst_16 : f32 to vector<2x256xf32>
      %25 = arith.maximumf %23, %24 : vector<2x256xf32>
      %26 = arith.truncf %25 : vector<2x256xf32> to vector<2x256xbf16>
      %c0_17 = arith.constant 0 : index
      %c0_18 = arith.constant 0 : index
      %27 = vector.load %arg8[%c0_17, %c0_18] : memref<2x256xbf16, #tpu.memory_space<vmem>>, vector<2x256xbf16>
      tpu.vector_store %arg8[%c0_17, %c0_18], %26 {strides = array<i32>} : memref<2x256xbf16, #tpu.memory_space<vmem>>, vector<2x256xbf16>,
    } else {
    }
    %c0 = arith.constant 0 : index
    %c0_1 = arith.constant 0 : index
    %3 = vector.load %arg8[%c0, %c0_1] : memref<2x256xbf16, #tpu.memory_space<vmem>>, vector<2x256xbf16>
    %4 = arith.index_cast %arg1 : i32 to index
    %c0_2 = arith.constant 0 : index
    %c0_3 = arith.constant 0 : index
    %5 = vector.load %arg5[%4, %c0_2, %c0_3] : memref<6x256x896xbf16, #tpu.memory_space<vmem>>, vector<1x256x896xbf16>
    %6 = vector.shape_cast %5 : vector<1x256x896xbf16> to vector<256x896xbf16>
    %cst = arith.constant dense<0.000000e+00> : vector<2x896xf32>
    %7 = tpu.matmul %3, %6, %cst {dimension_numbers = #tpu.dot_dimension_numbers<[1], [0], [0], [1], [0, 0, 1, 1], [], []>} : vector<2x256xbf16>, vector<256x896xbf16>, vector<2x896xf32> -> vector<2x896xf32>
    %c0_4 = arith.constant 0 : index
    %c0_5 = arith.constant 0 : index
    %8 = vector.load %arg6[%c0_4, %c0_5] : memref<1x896xf32, #tpu.memory_space<vmem>>, vector<1x896xf32>
    %9 = vector.broadcast %8 : vector<1x896xf32> to vector<2x896xf32>
    %10 = arith.addf %7, %9 : vector<2x896xf32>
    %11 = arith.negf %10 : vector<2x896xf32>
    %12 = math.exp %11 : vector<2x896xf32>
    %cst_6 = arith.constant 1.000000e+00 : f32
    %13 = vector.broadcast %cst_6 : f32 to vector<2x896xf32>
    %14 = arith.addf %13, %12 : vector<2x896xf32>
    %15 = arith.divf %13, %14 : vector<2x896xf32>
    %c0_7 = arith.constant 0 : index
    %c0_8 = arith.constant 0 : index
    %16 = vector.load %arg7[%c0_7, %c0_8] : memref<2x896xf32, #tpu.memory_space<vmem>>, vector<2x896xf32>
    tpu.vector_store %arg7[%c0_7, %c0_8], %15 {strides = array<i32>} : memref<2x896xf32, #tpu.memory_space<vmem>>, vector<2x896xf32>,
    return
  }
  func.func @transform_0(%arg0: i32, %arg1: i32) -> (i32, i32) {
    %c0_i32 = arith.constant 0 : i32
    %c0_i32_0 = arith.constant 0 : i32
    return %arg0, %c0_i32 : i32, i32
  }
  func.func @transform_1(%arg0: i32, %arg1: i32) -> (i32, i32) {
    %c0_i32 = arith.constant 0 : i32
    %c0_i32_0 = arith.constant 0 : i32
    %c0_i32_1 = arith.constant 0 : i32
    return %c0_i32, %c0_i32_0 : i32, i32
  }
  func.func @transform_2(%arg0: i32, %arg1: i32) -> (i32, i32) {
    %c0_i32 = arith.constant 0 : i32
    %c0_i32_0 = arith.constant 0 : i32
    %c0_i32_1 = arith.constant 0 : i32
    return %c0_i32, %c0_i32_0 : i32, i32
  }
  func.func @transform_3(%arg0: i32, %arg1: i32) -> (i32, i32, i32) {
    %c0_i32 = arith.constant 0 : i32
    %c0_i32_0 = arith.constant 0 : i32
    %c0_i32_1 = arith.constant 0 : i32
    %c0_i32_2 = arith.constant 0 : i32
    return %c0_i32, %c0_i32_0, %c0_i32_1 : i32, i32, i32
  }
  func.func @transform_4(%arg0: i32, %arg1: i32) -> (i32, i32) {
    %c0_i32 = arith.constant 0 : i32
    %c0_i32_0 = arith.constant 0 : i32
    return %c0_i32, %arg1 : i32, i32
  }
  func.func @transform_5(%arg0: i32, %arg1: i32) -> (i32, i32) {
    %c0_i32 = arith.constant 0 : i32
    return %arg0, %arg1 : i32, i32
  }
}

</mosaic_0001>

<bundles_post_ra>
// kernel: tpu_custom_call.1
= control target key start
LH: loop header
LB: loop body
LE: loop exit
PB: predicated region body
PF: predicated region fallthrough
CT: control target
= control target key end

     0   :  { %s9661_s0 = inlined_call_operand.hbm [shape: f32[2,5376], index: 0, kind: input, shape index: {}]   ;;  %s9662_s1 = inlined_call_operand.hbm [shape: bf16[5376,256], index: 1, kind: input, shape index: {}]   ;;  %s9663_s2 = inlined_call_operand.hbm [shape: f32[1,256], index: 2, kind: input, shape index: {}]   ;;  %s9664_s3 = inlined_call_operand.hbm [shape: bf16[6,256,896], index: 3, kind: input, shape index: {}]   ;;  %s9665_s4 = inlined_call_operand.hbm [shape: f32[1,5376], index: 4, kind: input, shape index: {}]   ;;  %s9666_s5 = inlined_call_operand.hbm [shape: f32[2,5376], index: 5, kind: output, shape index: {}]  }
   0x1   :  { %9670 = sst [smem:[#allocation18_spill]] %s9661_s0 }
   0x2   :  { %9671 = sst [smem:[#allocation19_spill]] %s9662_s1 }
   0x3   :  { %10 = vsyncpa [#allocation4], 0 }
   0x4   :  { %11 = vsyncpa [#allocation7], 0 }
   0x5   :  { %12 = vsyncpa [#allocation10], 0 }
   0x6   :  { %13 = vsyncpa [#allocation5], 0 }
   0x7   :  { %15 = vsyncpa [#allocation5 + $0x1], 0  ;;  %s9122_s18 = smov 0   ;;  %s9124_s19 = smov 0  }
   0x8   :  { %s9126_s20 = smov 0   ;;  %s9128_s21 = smov 0  }
   0x9   :  { %s9130_s22 = smov 0   ;;  %s9132_s23 = smov 0  }
   0xa LB: > { %s9153_s24 = sadd.s32 4294967295, %s9076_s23   ;;  %s6694_s25 = sadd.s32 4294967294, %s9076_s23   ;;  %s9076_s23 = sphi %s9132_s23, %s21_s23   ;;  %s9072_s22 = sphi %s9130_s22, %s9693_s22   ;;  %s9068_s21 = sphi %s9128_s21, %s9692_s21   ;;  %s9064_s20 = sphi %s9126_s20, %s9691_s20   ;;  %s9060_s19 = sphi %s9124_s19, %s9690_s19   ;;  %s9056_s18 = sphi %s9122_s18, %s9689_s18  }
   0xb   : > { %p142_p0 = scmp.ne.s32.totalorder %s9060_s19, %s9056_s18  ;;  %p9667_p1 = scmp.eq.s32.totalorder %s9153_s24, 0 }
   0xc   : > { %p174_p2 = scmp.eq.s32.totalorder %s6694_s25, 5  ;;  %p6695_p4 = scmp.ge.s32.totalorder %s9076_s23, 1 }
   0xd   : > { %p9161_p3 = por %p9667_p1, %p142_p0  ;;  %p181_p6 = scmp.lt.s32.totalorder %s9076_s23, 7 }
   0xe   : > { %p9166_p5 = por %p174_p2, %p142_p0  ;;  %s9078_s29 = smov [#allocation3]  }
   0xf   : > { %s9672_s26 = scalar_select %p9161_p3, 1, 0 }
  0x10   : > { %s9673_s27 = scalar_select %p9166_p5, 1, 0 }
  0x11   : > { %p9171_p7 = pnand %p6695_p4, %p181_p6  ;;  %s197_s30 = sshll.u32 %s9078_s29, 4  ;;  %s198_s30 = int_to_ptr.vmem [resolvable:$true] %s197_s30 }
  0x12   : > { %s9079_s6 = smov [#allocation6]   ;;  %s9080_s9 = smov [#allocation8]  }
  0x13   : > { %s9674_s28 = scalar_select %p9171_p7, 1, 0 }
  0x14   : > { %p7555_p8 = pneg %p9171_p7  ;;  %s207_s7 = sshll.u32 %s9079_s6, 4  ;;  %s208_s7 = int_to_ptr.vmem [resolvable:$true] %s207_s7 }
  0x15   : > { %s221_s10 = sshll.u32 %s9080_s9, 4  ;;  %s8863_s11 = scalar_lea.vmem %s198_s30, 1344  ;;  %s222_s10 = int_to_ptr.vmem [resolvable:$true] %s221_s10 }
  0x16   : > { %p9179_p9 = pnand %p7555_p8, %p9667_p1  ;;  %p8864_p11 = scmp.ne.s32.totalorder %s198_s30, %s8863_s11 }
  0x17   : > { %p8871_p0 = scmp.lt.s32.totalorder %s198_s30, %s198_s30  ;;  %p8872_p2 = scmp.lt.s32.totalorder %s8863_s11, %s8863_s11 }
  0x18   : > { %p8854_p10 = pneg %p9179_p9 }
  0x19   : > { %p8873_p4 = por %p8872_p2, %p8871_p0 }
  0x1a   : > { %p8866_p12 = pnand %p8864_p11, %p8854_p10 }
  0x1c   : > { %p8867_p13 = pneg %p8866_p12 }
  0x1e   : > { %p8874_p6 = pnand %p8873_p4, %p8867_p13 }
  0x20   : > { %8877 = shalt.err (!%p8874_p6)
}
  0x21   : > { %s9676_s0 = sld [smem:[#allocation18_spill]]  ;;  %s8889_s14 = scalar_lea.vmem %s208_s7, 86016 }
  0x22   : > { %p8890_p8 = scmp.ne.s32.totalorder %s208_s7, %s8889_s14  ;;  %p8897_p11 = scmp.lt.s32.totalorder %s208_s7, %s208_s7 }
  0x23   : > { %p8898_p12 = scmp.lt.s32.totalorder %s8889_s14, %s8889_s14 }
  0x24   : > { %p8892_p1 = pnand %p8890_p8, %p8854_p10 }
  0x25   : > { %p8899_p3 = por %p8898_p12, %p8897_p11 }
  0x26   : > { %p8893_p5 = pneg %p8892_p1 }
  0x27   : > { %7558 = dma.hbm_to_vmem [thread:$0]  (!%p9179_p9), %s9676_s0, 1344, %s198_s30, [#allocation4]  }
  0x28   : > { %p8900_p7 = pnand %p8899_p3, %p8893_p5 }
  0x2a   : > { %8903 = shalt.err (!%p8900_p7)
}
  0x2b   : > { %s9081_s15 = smov 128   ;;  %s9082_s16 = smov 8  }
  0x2c   : > { %s9677_s1 = sld [smem:[#allocation19_spill]]  ;;  %s8915_s29 = scalar_lea.vmem %s222_s10, 32 }
  0x2d   : > { %p8916_p13 = scmp.ne.s32.totalorder %s222_s10, %s8915_s29  ;;  %p8923_p2 = scmp.lt.s32.totalorder %s222_s10, %s222_s10 }
  0x2e   : > { %p8924_p4 = scmp.lt.s32.totalorder %s8915_s29, %s8915_s29 }
  0x2f   : > { %p8918_p1 = pnand %p8916_p13, %p8854_p10 }
  0x30   : > { %p8925_p3 = por %p8924_p4, %p8923_p2 }
  0x31   : > { %p8919_p0 = pneg %p8918_p1 }
  0x32   : > { %7561 = dma.hbm_to_vmem [thread:$0]  (!%p9179_p9), %s9677_s1, 86016, %s208_s7, [#allocation7], %s9081_s15, %s9081_s15, %s9082_s16  }
  0x33   : > { %p8926_p5 = pnand %p8925_p3, %p8919_p0 }
  0x35   : > { %8929 = shalt.err (!%p8926_p5)
}
  0x36   : > { %7564 = dma.hbm_to_vmem [thread:$0]  (!%p9179_p9), %s9663_s2, 32, %s222_s10, [#allocation7]  }
  0x37   : > { %s9083_s7 = smov [#allocation9]  }
  0x38   : > { %s231_s9 = sshll.u32 %s9083_s7, 4  ;;  %s232_s9 = int_to_ptr.vmem [resolvable:$true] %s231_s9 }
  0x39   : > { %s8941_s11 = scalar_lea.vmem %s232_s9, 86016  ;;  %p8949_p11 = scmp.lt.s32.totalorder %s232_s9, %s232_s9 }
  0x3a   : > { %p8942_p7 = scmp.ne.s32.totalorder %s232_s9, %s8941_s11  ;;  %p8950_p12 = scmp.lt.s32.totalorder %s8941_s11, %s8941_s11 }
  0x3c   : > { %p8944_p6 = pnand %p8942_p7, %p8854_p10  ;;  %p8951_p13 = por %p8950_p12, %p8949_p11 }
  0x3e   : > { %p8945_p8 = pneg %p8944_p6 }
  0x40   : > { %p8952_p1 = pnand %p8951_p13, %p8945_p8 }
  0x42   : > { %8955 = shalt.err (!%p8952_p1)
}
  0x43   : > { %s9084_s12 = smov 448   ;;  %s9085_s10 = smov 28  }
  0x44   : > { %7567 = dma.hbm_to_vmem [thread:$0]  (!%p9179_p9), %s9664_s3, 86016, %s232_s9, [#allocation10], %s9084_s12, %s9084_s12, %s9085_s10  }
  0x45   : > { %p168_p10 = scmp.eq.s32.totalorder %s9153_s24, 5  ;;  %s30_s15 = sadd.s32 1, %s9072_s22 }
  0x46   : > { %p31_p0 = scmp.ge.s32.totalorder %s30_s15, 6  ;;  %p136_p2 = scmp.ne.s32.totalorder %s9064_s20, %s9060_s19 }
  0x47   : > { %s129_s16 = sadd.s32 1, %s9064_s20  ;;  %p137_p4 = scmp.eq.s32.totalorder %s9076_s23, 0 }
  0x48   : > { %s9695_s15 = smov (%p31_p0, %s30_s15), 0  ;;  %p9225_p3 = por %p168_p10, %p136_p2 }
  0x49   : > { %p7580_p5 = scmp.lt.s32.totalorder %s9076_s23, 6  ;;  %s126_s8 = ssub.s32 %s9072_s22, %s9695_s15 }
  0x4a   : > { %p138_p7 = por %p137_p4, %p136_p2  ;;  %p127_p6 = scmp.eq.s32.totalorder %s126_s8, 0 }
  0x4b   : > { %s245_s25 = sand.u32 1, %s9076_s23   ;;  %s247_s29 = sand.u32 1, %s9064_s20  }
  0x4c   : > { %s7507_s30 = smul.u32 112, %s9072_s22  ;;  %p9238_p9 = pnand %p7580_p5, %p138_p7 }
  0x4d   : > { %s9236_s6 = scalar_select %p127_p6, %s9064_s20, %s129_s16  }
  0x4e   : > { %s7532_s7 = smul.u32 7, %s247_s29  ;;  %s255_s10 = scalar_lea.hbm %s9665_s4, %s7507_s30 }
  0x4f   : > { %s246_s0 = scalar_lea.sflag [#allocation4], %s245_s25  ;;  %p8958_p8 = pneg %p9238_p9 }
  0x50   : > { %s249_s13 = scalar_lea.vmem [#allocation11], %s7532_s7  ;;  %s9086_s16 = smov [#allocation11]  }
  0x51   : > { %s257_s14 = sshll.u32 %s249_s13, 4  ;;  %s8974_s29 = sshll.u32 %s9086_s16, 4  ;;  %s258_s14 = int_to_ptr.vmem [resolvable:$true] %s257_s14  ;;  %s8975_s29 = int_to_ptr.vmem [resolvable:$false] %s8974_s29 }
  0x52   : > { %s8969_s8 = scalar_lea.vmem %s258_s14, 112  ;;  %s8976_s1 = scalar_lea.vmem %s8975_s29, 224 }
  0x53   : > { %p8970_p11 = scmp.ne.s32.totalorder %s258_s14, %s8969_s8  ;;  %p8977_p1 = scmp.lt.s32.totalorder %s258_s14, %s8975_s29 }
  0x54   : > { %p8978_p10 = scmp.lt.s32.totalorder %s8976_s1, %s8969_s8 }
  0x55   : > { %p8972_p12 = pnand %p8970_p11, %p8958_p8 }
  0x56   : > { %p8979_p0 = por %p8978_p10, %p8977_p1 }
  0x57   : > { %p8973_p13 = pneg %p8972_p12 }
  0x59   : > { %p8980_p2 = pnand %p8979_p0, %p8973_p13 }
  0x5b   : > { %8983 = shalt.err (!%p8980_p2)
}
  0x5c   : > { %7571 = dma.hbm_to_vmem [thread:$0]  (!%p9238_p9), %s255_s10, 112, %s258_s14, %s246_s0  }
  0x5d   : > { %p9680_p4 = scmp.ne.s32.totalorder %s9674_s28, 0 }
  0x5e   : > { %p9681_p5 = scmp.eq.s32.totalorder (!%p9680_p4), %s9153_s24, 0 }
  0x5f   : > { %266 = sbr.rel (%p9680_p4) target bundleno = 1408 (0x580), region = 40 }
  0x64   : > { %9035 = dma.done.wait (%p9681_p5), [#allocation4], 1344   ;;  %p9682_p7 = pmov %p9681_p5 }
  0x65   : > { %p9683_p6 = pmov %p9681_p5 }
  0x66   : > { %9037 = vsyncadd (%p9682_p7), [#allocation4], 4294965952 }
  0x67   : > { %9039 = dma.done.wait (%p9683_p6), [#allocation7], 86048   ;;  %p9684_p8 = pmov %p9681_p5 }
  0x68   : > { %p9685_p11 = pmov %p9681_p5 }
  0x69   : > { %9041 = vsyncadd (%p9684_p8), [#allocation7], 4294881248 }
  0x6a   : > { %9043 = dma.done.wait (%p9685_p11), [#allocation10], 86016   ;;  %p9686_p9 = pmov %p9681_p5 }
  0x6b   : > { %s284_s0 = sand.u32 1, %s9153_s24   ;;  %s9265_s1 = sand.u32 1, %s9060_s19  }
  0x6c   : > { %9045 = vsyncadd (%p9686_p9), [#allocation10], 4294881280  ;;  %s7533_s28 = smul.u32 7, %s9265_s1  ;;  %s285_s25 = scalar_lea.sflag [#allocation4], %s284_s0 }
  0x6d   : > { %p9687_p12 = scmp.ne.s32.totalorder %s9672_s26, 0 }
  0x6e   : > { %s9268_s30 = scalar_lea.vmem [#allocation11], %s7533_s28 }
  0x6f   : > { %9047 = dma.done.wait (%p9687_p12), %s285_s25, 112  }
  0x70   : > { %9049 = vsyncadd (%p9687_p12), %s285_s25, 4294967184  ;;  %s7534_s7 = smul.u32 14, %s9265_s1  ;;  %p6707_p13 = scmp.ne.s32.totalorder %s9068_s21, 0 }
  0x72   : > { %s9275_s9 = scalar_lea.vmem [#allocation12], %s7534_s7  ;;  %321 = sbr.rel (%p6707_p13) target bundleno = 1028 (0x404), region = 64 }
  0x77   : > { %v7646_v0 = vld [vmem:[#allocation6 + $0x74] ss:$8 sps:$4 sm:$0xff]   ;;  %v7648_v1 = vld [vmem:[#allocation6 + $0x70] ss:$8 sps:$4 sm:$0xff]   ;;  %v7652_v4 = vld [vmem:[#allocation6 + $0x64] ss:$8 sps:$4 sm:$0xff]   ;;  %v348_v37 = vlaneseq }
  0x78   : > { %4650 = vmatprep.subr.bf16.mxu0 %v7646_v0  ;;  %v7649_v2 = vld [vmem:[#allocation6 + $0x174] ss:$8 sps:$4 sm:$0xff]   ;;  %v7651_v3 = vld [vmem:[#allocation6 + $0x170] ss:$8 sps:$4 sm:$0xff]   ;;  %v7654_v5 = vld [vmem:[#allocation6 + $0x60] ss:$8 sps:$4 sm:$0xff]  }
  0x79   : > { %4651 = vmatpush1.bf16.msra.mxu0 %v7648_v1  ;;  %4691 = vmatprep.subr.bf16.mxu1 %v7649_v2  ;;  %v7655_v6 = vld [vmem:[#allocation6 + $0x164] ss:$8 sps:$4 sm:$0xff]   ;;  %v7657_v7 = vld [vmem:[#allocation6 + $0x160] ss:$8 sps:$4 sm:$0xff]   ;;  %v7658_v8 = vld [vmem:[#allocation6 + $0x54] ss:$8 sps:$4 sm:$0xff]  }
  0x7a   : > { %4692 = vmatpush1.bf16.msra.mxu1 %v7651_v3  ;;  %4652 = vmatprep.subr.bf16.mxu0 %v7652_v4  ;;  %v7660_v9 = vld [vmem:[#allocation6 + $0x50] ss:$8 sps:$4 sm:$0xff]   ;;  %v7661_v10 = vld [vmem:[#allocation6 + $0x154] ss:$8 sps:$4 sm:$0xff]   ;;  %v7664_v11 = vld [vmem:[#allocation6 + $0x44] ss:$8 sps:$4 sm:$0xff]  }
  0x7b   : > { %4693 = vmatprep.subr.bf16.mxu1 %v7655_v6  ;;  %v7663_v12 = vld [vmem:[#allocation6 + $0x150] ss:$8 sps:$4 sm:$0xff]   ;;  %v7667_v13 = vld [vmem:[#allocation6 + $0x144] ss:$8 sps:$4 sm:$0xff]   ;;  %v7666_v14 = vld [vmem:[#allocation6 + $0x40] ss:$8 sps:$4 sm:$0xff]  }
  0x7c   : > { %v7670_v15 = vld [vmem:[#allocation6 + $0x34] ss:$8 sps:$4 sm:$0xff]   ;;  %v7669_v16 = vld [vmem:[#allocation6 + $0x140] ss:$8 sps:$4 sm:$0xff]   ;;  %v7672_v18 = vld [vmem:[#allocation6 + $0x30] ss:$8 sps:$4 sm:$0xff]  }
  0x7d   : > { %4653 = vmatpush1.bf16.msra.mxu0 %v7654_v5  ;;  %v7673_v17 = vld [vmem:[#allocation6 + $0x134] ss:$8 sps:$4 sm:$0xff]   ;;  %v7676_v19 = vld [vmem:[#allocation6 + $0x24] ss:$8 sps:$4 sm:$0xff]   ;;  %v7675_v20 = vld [vmem:[#allocation6 + $0x130] ss:$8 sps:$4 sm:$0xff]  }
  0x7e   : > { %4654 = vmatprep.subr.bf16.mxu0 %v7658_v8  ;;  %4694 = vmatpush1.bf16.msra.mxu1 %v7657_v7  ;;  %v7679_v21 = vld [vmem:[#allocation6 + $0x124] ss:$8 sps:$4 sm:$0xff]   ;;  %v7678_v22 = vld [vmem:[#allocation6 + $0x20] ss:$8 sps:$4 sm:$0xff]   ;;  %v7682_v23 = vld [vmem:[#allocation6 + $0x14] ss:$8 sps:$4 sm:$0xff]  }
  0x7f   : > { %4695 = vmatprep.subr.bf16.mxu1 %v7661_v10  ;;  %v7681_v24 = vld [vmem:[#allocation6 + $0x120] ss:$8 sps:$4 sm:$0xff]   ;;  %v7685_v25 = vld [vmem:[#allocation6 + $0x114] ss:$8 sps:$4 sm:$0xff]   ;;  %v7684_v26 = vld [vmem:[#allocation6 + $0x10] ss:$8 sps:$4 sm:$0xff]  }
  0x80   : > { %v7688_v27 = vld [vmem:[#allocation6 + $0x4] ss:$8 sps:$4 sm:$0xff]   ;;  %v7687_v28 = vld [vmem:[#allocation6 + $0x110] ss:$8 sps:$4 sm:$0xff]   ;;  %v7690_v30 = vld [vmem:[#allocation6] ss:$8 sps:$4 sm:$0xff]  }
  0x81   : > { %4655 = vmatpush1.bf16.msra.mxu0 %v7660_v9  ;;  %v7691_v29 = vld [vmem:[#allocation6 + $0x104] ss:$8 sps:$4 sm:$0xff]   ;;  %v7694_v31 = vld [vmem:[#allocation6 + $0xf4] ss:$8 sps:$4 sm:$0xff]   ;;  %v7693_v32 = vld [vmem:[#allocation6 + $0x100] ss:$8 sps:$4 sm:$0xff]  }
  0x82   : > { %4656 = vmatprep.subr.bf16.mxu0 %v7664_v11  ;;  %4696 = vmatpush1.bf16.msra.mxu1 %v7663_v12  ;;  %v7697_v33 = vld [vmem:[#allocation6 + $0x1f4] ss:$8 sps:$4 sm:$0xff]   ;;  %v7696_v34 = vld [vmem:[#allocation6 + $0xf0] ss:$8 sps:$4 sm:$0xff]   ;;  %v9087_v35 = vmov 1983009808  }
  0x83   : > { %4697 = vmatprep.subr.bf16.mxu1 %v7667_v13  ;;  %v346_v36 = vunpack.c.l.s4 %v9087_v35  ;;  %v7700_v38 = vld [vmem:[#allocation6 + $0xe4] ss:$8 sps:$4 sm:$0xff]   ;;  %v7699_v39 = vld [vmem:[#allocation6 + $0x1f0] ss:$8 sps:$4 sm:$0xff]   ;;  %v7702_v41 = vld [vmem:[#allocation6 + $0xe0] ss:$8 sps:$4 sm:$0xff]  }
  0x84   : > { %v7703_v40 = vld [vmem:[#allocation6 + $0x1e4] ss:$8 sps:$4 sm:$0xff]   ;;  %v9278_v43 = vshrl.u32 %v348_v37, 7  ;;  %v7706_v44 = vld [vmem:[#allocation6 + $0xd4] ss:$8 sps:$4 sm:$0xff]  }
  0x85   : > { %4657 = vmatpush1.bf16.msra.mxu0 %v7666_v14  ;;  %v347_v42 = vunpack.c.0.s8 %v346_v36  ;;  %v7705_v45 = vld [vmem:[#allocation6 + $0x1e0] ss:$8 sps:$4 sm:$0xff]   ;;  %v7709_v46 = vld [vmem:[#allocation6 + $0x1d4] ss:$8 sps:$4 sm:$0xff]   ;;  %v7708_v47 = vld [vmem:[#allocation6 + $0xd0] ss:$8 sps:$4 sm:$0xff]  }
  0x86   : > { %4658 = vmatprep.subr.bf16.mxu0 %v7670_v15  ;;  %4698 = vmatpush1.bf16.msra.mxu1 %v7669_v16  ;;  %v7712_v49 = vld [vmem:[#allocation6 + $0xc4] ss:$8 sps:$4 sm:$0xff]   ;;  %v7711_v50 = vld [vmem:[#allocation6 + $0x1d0] ss:$8 sps:$4 sm:$0xff]   ;;  %v7714_v53 = vld [vmem:[#allocation6 + $0xc0] ss:$8 sps:$4 sm:$0xff]  }
  0x87   : > { %4699 = vmatprep.subr.bf16.mxu1 %v7673_v17  ;;  %v9281_v48 = vsub.s32 %v347_v42, %v9278_v43  ;;  %v7715_v51 = vld [vmem:[#allocation6 + $0x1c4] ss:$8 sps:$4 sm:$0xff]   ;;  %v7718_v56 = vld [vmem:[#allocation6 + $0xb4] ss:$8 sps:$4 sm:$0xff]   ;;  %v7717_v57 = vld [vmem:[#allocation6 + $0x1c0] ss:$8 sps:$4 sm:$0xff]  }
  0x88   : > { %v322_v52 = vld [vmem:[#allocation3] sm:$0xff]  ;;  %v7721_v60 = vld [vmem:[#allocation6 + $0x1b4] ss:$8 sps:$4 sm:$0xff]   ;;  %v7726_v4 = vld [vmem:[#allocation6 + $0xa0] ss:$8 sps:$4 sm:$0xff]  }
  0x89   : > { %4659 = vmatpush1.bf16.msra.mxu0 %v7672_v18  ;;  %v351_v54 = vrot.slane %v322_v52, %v9281_v48  ;;  %v344_v55 = vcombine.high %v322_v52, %v322_v52  ;;  %v7720_v61 = vld [vmem:[#allocation6 + $0xb0] ss:$8 sps:$4 sm:$0xff]   ;;  %v7724_v0 = vld [vmem:[#allocation6 + $0xa4] ss:$8 sps:$4 sm:$0xff]   ;;  %v7730_v5 = vld [vmem:[#allocation6 + $0x94] ss:$8 sps:$4 sm:$0xff]  }
  0x8a   : > { %4660 = vmatprep.subr.bf16.mxu0 %v7676_v19  ;;  %4700 = vmatpush1.bf16.msra.mxu1 %v7675_v20  ;;  %v7723_v1 = vld [vmem:[#allocation6 + $0x1b0] ss:$8 sps:$4 sm:$0xff]   ;;  %v7727_v3 = vld [vmem:[#allocation6 + $0x1a4] ss:$8 sps:$4 sm:$0xff]   ;;  %v7729_v6 = vld [vmem:[#allocation6 + $0x1a0] ss:$8 sps:$4 sm:$0xff]  }
  0x8b   : > { %4701 = vmatprep.subr.bf16.mxu1 %v7679_v21  ;;  %v359_v58 = vcombine.high %v351_v54, %v351_v54  ;;  %v358_v59 = vrot.slane %v344_v55, %v9281_v48  ;;  %v7733_v7 = vld [vmem:[#allocation6 + $0x194] ss:$8 sps:$4 sm:$0xff]   ;;  %v7732_v8 = vld [vmem:[#allocation6 + $0x90] ss:$8 sps:$4 sm:$0xff]   ;;  %v7736_v9 = vld [vmem:[#allocation6 + $0x84] ss:$8 sps:$4 sm:$0xff]   ;;  %v564_v15 = vpack.c.bf16 %v351_v54, %v351_v54 }
  0x8c   : > { %v7735_v10 = vld [vmem:[#allocation6 + $0x190] ss:$8 sps:$4 sm:$0xff]   ;;  %v7739_v11 = vld [vmem:[#allocation6 + $0x184] ss:$8 sps:$4 sm:$0xff]   ;;  %v7738_v12 = vld [vmem:[#allocation6 + $0x80] ss:$8 sps:$4 sm:$0xff]  }
  0x8d   : > { %4661 = vmatpush1.bf16.msra.mxu0 %v7678_v22  ;;  %v565_v62 = vpack.c.bf16 %v359_v58, %v359_v58  ;;  %v360_v63 = vcombine.high %v358_v59, %v358_v59  ;;  %v7744_v13 = vld [vmem:[#allocation6 + $0x274] ss:$8 sps:$4 sm:$0xff]   ;;  %v7741_v14 = vld [vmem:[#allocation6 + $0x180] ss:$8 sps:$4 sm:$0xff]   ;;  %v7742_v17 = vld [vmem:[#allocation6 + $0x270] ss:$8 sps:$4 sm:$0xff]   ;;  %v566_v18 = vpack.c.bf16 %v358_v59, %v358_v59 }
  0x8e   : > { %4662 = vmatprep.subr.bf16.mxu0 %v7682_v23  ;;  %4702 = vmatpush1.bf16.msra.mxu1 %v7681_v24  ;;  %v7748_v16 = vld [vmem:[#allocation6 + $0x374] ss:$8 sps:$4 sm:$0xff]   ;;  %v7751_v19 = vld [vmem:[#allocation6 + $0x264] ss:$8 sps:$4 sm:$0xff]   ;;  %v7746_v20 = vld [vmem:[#allocation6 + $0x370] ss:$8 sps:$4 sm:$0xff]  }
  0x8f   : > { %4703 = vmatprep.subr.bf16.mxu1 %v7685_v25  ;;  %4682 = vmatprep.mubr.bf16.mxu0 %v565_v62  ;;  %v567_v2 = vpack.c.bf16 %v360_v63, %v360_v63  ;;  %v7754_v21 = vld [vmem:[#allocation6 + $0x364] ss:$8 sps:$4 sm:$0xff]   ;;  %v7749_v22 = vld [vmem:[#allocation6 + $0x260] ss:$8 sps:$4 sm:$0xff]   ;;  %v7757_v23 = vld [vmem:[#allocation6 + $0x254] ss:$8 sps:$4 sm:$0xff]  }
  0x90   : > { %v7752_v24 = vld [vmem:[#allocation6 + $0x360] ss:$8 sps:$4 sm:$0xff]   ;;  %v7760_v25 = vld [vmem:[#allocation6 + $0x354] ss:$8 sps:$4 sm:$0xff]   ;;  %v7775_v35 = vld [vmem:[#allocation6 + $0x224] ss:$8 sps:$4 sm:$0xff]  }
  0x91   : > { %4663 = vmatpush1.bf16.msra.mxu0 %v7684_v26  ;;  %4723 = vmatprep.mubr.bf16.mxu1 %v567_v2  ;;  %v7755_v26 = vld [vmem:[#allocation6 + $0x250] ss:$8 sps:$4 sm:$0xff]   ;;  %v7778_v37 = vld [vmem:[#allocation6 + $0x324] ss:$8 sps:$4 sm:$0xff]   ;;  %v7784_v42 = vld [vmem:[#allocation6 + $0x314] ss:$8 sps:$4 sm:$0xff]  }
  0x92   : > { %4664 = vmatprep.subr.bf16.mxu0 %v7688_v27  ;;  %4704 = vmatpush1.bf16.msra.mxu1 %v7687_v28  ;;  %v7763_v27 = vld [vmem:[#allocation6 + $0x244] ss:$8 sps:$4 sm:$0xff]   ;;  %v7758_v28 = vld [vmem:[#allocation6 + $0x350] ss:$8 sps:$4 sm:$0xff]   ;;  %v7785_v55 = vld [vmem:[#allocation6 + $0x200] ss:$8 sps:$4 sm:$0xff]  }
  0x93   : > { %4705 = vmatprep.subr.bf16.mxu1 %v7691_v29  ;;  %v7766_v29 = vld [vmem:[#allocation6 + $0x344] ss:$8 sps:$4 sm:$0xff]   ;;  %v7770_v36 = vld [vmem:[#allocation6 + $0x330] ss:$8 sps:$4 sm:$0xff]   ;;  %v7788_v58 = vld [vmem:[#allocation6 + $0x300] ss:$8 sps:$4 sm:$0xff]  }
  0x94   : > { %v7790_v52 = vld [vmem:[#allocation6 + $0x304] ss:$8 sps:$4 sm:$0xff]   ;;  %v7796_v59 = vld [vmem:[#allocation6 + $0x3f4] ss:$8 sps:$4 sm:$0xff]   ;;  %v7794_v62 = vld [vmem:[#allocation6 + $0x3f0] ss:$8 sps:$4 sm:$0xff]  }
  0x95   : > { %4665 = vmatpush1.bf16.msra.mxu0 %v7690_v30  ;;  %v7761_v30 = vld [vmem:[#allocation6 + $0x240] ss:$8 sps:$4 sm:$0xff]   ;;  %v7802_v63 = vld [vmem:[#allocation6 + $0x3e4] ss:$8 sps:$4 sm:$0xff]  }
  0x96   : > { %4666 = vmatprep.subr.bf16.mxu0 %v7694_v31  ;;  %4706 = vmatpush1.bf16.msra.mxu1 %v7693_v32  ;;  %v7769_v31 = vld [vmem:[#allocation6 + $0x234] ss:$8 sps:$4 sm:$0xff]   ;;  %v7764_v32 = vld [vmem:[#allocation6 + $0x340] ss:$8 sps:$4 sm:$0xff]  }
  0x97   : > { %4707 = vmatprep.subr.bf16.mxu1 %v7697_v33  ;;  %v7772_v33 = vld [vmem:[#allocation6 + $0x334] ss:$8 sps:$4 sm:$0xff]   ;;  %v7800_v2 = vld [vmem:[#allocation6 + $0x3e0] ss:$8 sps:$4 sm:$0xff]  }
  0x99   : > { %4667 = vmatpush2.bf16.msra.mxu0 %v7696_v34  ;;  %v7767_v34 = vld [vmem:[#allocation6 + $0x230] ss:$8 sps:$4 sm:$0xff]  }
  0x9a   : > { %4668 = vmatprep.subr.bf16.mxu0 %v7700_v38  ;;  %4708 = vmatpush2.bf16.msra.mxu1 %v7699_v39  ;;  %v7773_v38 = vld [vmem:[#allocation6 + $0x220] ss:$8 sps:$4 sm:$0xff]   ;;  %v7781_v39 = vld [vmem:[#allocation6 + $0x214] ss:$8 sps:$4 sm:$0xff]  }
  0x9b   : > { %4709 = vmatprep.subr.bf16.mxu1 %v7703_v40  ;;  %v7776_v40 = vld [vmem:[#allocation6 + $0x320] ss:$8 sps:$4 sm:$0xff]  }
  0x9d   : > { %4669 = vmatpush2.bf16.msra.mxu0 %v7702_v41  ;;  %v323_v41 = vld [vmem:[#allocation3 + $0x8] sm:$0xff] }
  0x9e   : > { %4670 = vmatprep.subr.bf16.mxu0 %v7706_v44  ;;  %4710 = vmatpush2.bf16.msra.mxu1 %v7705_v45  ;;  %v9286_v44 = vrot.slane %v323_v41, %v9281_v48  ;;  %v361_v45 = vcombine.high %v323_v41, %v323_v41  ;;  %v7849_v41 = vld [vmem:[#allocation6 + $0x560] ss:$8 sps:$4 sm:$0xff]  }
  0x9f   : > { %4711 = vmatprep.subr.bf16.mxu1 %v7709_v46  ;;  %v7779_v46 = vld [vmem:[#allocation6 + $0x210] ss:$8 sps:$4 sm:$0xff]  }
  0xa1   : > { %4671 = vmatpush2.bf16.msra.mxu0 %v7708_v47  ;;  %v7787_v47 = vld [vmem:[#allocation6 + $0x204] ss:$8 sps:$4 sm:$0xff]  }
  0xa2   : > { %4672 = vmatprep.subr.bf16.mxu0 %v7712_v49  ;;  %4712 = vmatpush2.bf16.msra.mxu1 %v7711_v50  ;;  %v376_v49 = vcombine.high %v9286_v44, %v9286_v44  ;;  %v9291_v50 = vrot.slane %v361_v45, %v9281_v48  ;;  %v7857_v45 = vld [vmem:[#allocation6 + $0x554] ss:$8 sps:$4 sm:$0xff]  }
  0xa3   : > { %4713 = vmatprep.subr.bf16.mxu1 %v7715_v51  ;;  %v7782_v51 = vld [vmem:[#allocation6 + $0x310] ss:$8 sps:$4 sm:$0xff]  }
  0xa4   : > { %v377_v54 = vcombine.high %v9291_v50, %v9291_v50 }
  0xa5   : > { %4673 = vmatpush2.bf16.msra.mxu0 %v7714_v53  ;;  %v569_v53 = vpack.c.bf16 %v376_v49, %v376_v49  ;;  %v7860_v49 = vld [vmem:[#allocation6 + $0x444] ss:$8 sps:$4 sm:$0xff]  }
  0xa6   : > { %4674 = vmatprep.subr.bf16.mxu0 %v7718_v56  ;;  %4714 = vmatpush2.bf16.msra.mxu1 %v7717_v57  ;;  %v7793_v56 = vld [vmem:[#allocation6 + $0x2f4] ss:$8 sps:$4 sm:$0xff]   ;;  %v571_v57 = vpack.c.bf16 %v377_v54, %v377_v54  ;;  %v7861_v54 = vld [vmem:[#allocation6 + $0x540] ss:$8 sps:$4 sm:$0xff]  }
  0xa7   : > { %4715 = vmatprep.subr.bf16.mxu1 %v7721_v60  ;;  %v7791_v60 = vld [vmem:[#allocation6 + $0x2f0] ss:$8 sps:$4 sm:$0xff]  }
  0xa9   : > { %4675 = vmatpush2.bf16.msra.mxu0 %v7720_v61  ;;  %v7799_v61 = vld [vmem:[#allocation6 + $0x2e4] ss:$8 sps:$4 sm:$0xff]  }
  0xaa   : > { %4676 = vmatprep.subr.bf16.mxu0 %v7724_v0  ;;  %4716 = vmatpush2.bf16.msra.mxu1 %v7723_v1  ;;  %v7797_v0 = vld [vmem:[#allocation6 + $0x2e0] ss:$8 sps:$4 sm:$0xff]   ;;  %v7805_v1 = vld [vmem:[#allocation6 + $0x2d4] ss:$8 sps:$4 sm:$0xff]  }
  0xab   : > { %4717 = vmatprep.subr.bf16.mxu1 %v7727_v3  ;;  %v7808_v3 = vld [vmem:[#allocation6 + $0x3d4] ss:$8 sps:$4 sm:$0xff]  }
  0xad   : > { %4677 = vmatpush2.bf16.msra.mxu0 %v7726_v4  ;;  %v7803_v4 = vld [vmem:[#allocation6 + $0x2d0] ss:$8 sps:$4 sm:$0xff]  }
  0xae   : > { %4678 = vmatprep.subr.bf16.mxu0 %v7730_v5  ;;  %4718 = vmatpush2.bf16.msra.mxu1 %v7729_v6  ;;  %v7811_v5 = vld [vmem:[#allocation6 + $0x2c4] ss:$8 sps:$4 sm:$0xff]   ;;  %v7806_v6 = vld [vmem:[#allocation6 + $0x3d0] ss:$8 sps:$4 sm:$0xff]  }
  0xaf   : > { %4719 = vmatprep.subr.bf16.mxu1 %v7733_v7  ;;  %v7814_v7 = vld [vmem:[#allocation6 + $0x3c4] ss:$8 sps:$4 sm:$0xff]  }
  0xb1   : > { %4679 = vmatpush2.bf16.msra.mxu0 %v7732_v8  ;;  %v7809_v8 = vld [vmem:[#allocation6 + $0x2c0] ss:$8 sps:$4 sm:$0xff]  }
  0xb2   : > { %4680 = vmatprep.subr.bf16.mxu0 %v7736_v9  ;;  %4720 = vmatpush2.bf16.msra.mxu1 %v7735_v10  ;;  %v7817_v9 = vld [vmem:[#allocation6 + $0x2b4] ss:$8 sps:$4 sm:$0xff]   ;;  %v7812_v10 = vld [vmem:[#allocation6 + $0x3c0] ss:$8 sps:$4 sm:$0xff]  }
  0xb3   : > { %4721 = vmatprep.subr.bf16.mxu1 %v7739_v11  ;;  %v7820_v11 = vld [vmem:[#allocation6 + $0x3b4] ss:$8 sps:$4 sm:$0xff]  }
  0xb5   : > { %4681 = vmatpush2.bf16.msra.mxu0 %v7738_v12  ;;  %v7815_v12 = vld [vmem:[#allocation6 + $0x2b0] ss:$8 sps:$4 sm:$0xff]  }
  0xb6   : > { %4732 = vmatprep.subr.bf16.mxu0 %v7744_v13  ;;  %4722 = vmatpush2.bf16.msra.mxu1 %v7741_v14  ;;  %v7823_v13 = vld [vmem:[#allocation6 + $0x2a4] ss:$8 sps:$4 sm:$0xff]   ;;  %v7818_v14 = vld [vmem:[#allocation6 + $0x3b0] ss:$8 sps:$4 sm:$0xff]  }
  0xb7   : > { %4773 = vmatprep.subr.bf16.mxu1 %v7748_v16  ;;  %v7821_v16 = vld [vmem:[#allocation6 + $0x2a0] ss:$8 sps:$4 sm:$0xff]  }
  0xb8   : > { %4683 = vmatmul.mubr.bf16.vlgmr.msra.gmra.mxu0 %v564_v15  ;;  %v7826_v15 = vld [vmem:[#allocation6 + $0x3a4] ss:$8 sps:$4 sm:$0xff]  }
  0xb9   : > { %4733 = vmatpush1.bf16.msra.mxu0 %v7742_v17  ;;  %4724 = vmatmul.mubr.bf16.vlgmr.msra.gmra.mxu1 %v566_v18  ;;  %v7829_v17 = vld [vmem:[#allocation6 + $0x294] ss:$8 sps:$4 sm:$0xff]   ;;  %v7824_v18 = vld [vmem:[#allocation6 + $0x3a0] ss:$8 sps:$4 sm:$0xff]  }
  0xba   : > { %4734 = vmatprep.subr.bf16.mxu0 %v7751_v19  ;;  %4774 = vmatpush1.bf16.msra.mxu1 %v7746_v20  ;;  %v7832_v19 = vld [vmem:[#allocation6 + $0x394] ss:$8 sps:$4 sm:$0xff]   ;;  %v7827_v20 = vld [vmem:[#allocation6 + $0x290] ss:$8 sps:$4 sm:$0xff]  }
  0xbb   : > { %4775 = vmatprep.subr.bf16.mxu1 %v7754_v21  ;;  %4764 = vmatprep.mubr.bf16.mxu0 %v569_v53  ;;  %v7835_v21 = vld [vmem:[#allocation6 + $0x284] ss:$8 sps:$4 sm:$0xff]   ;;  %v7866_v53 = vld [vmem:[#allocation6 + $0x434] ss:$8 sps:$4 sm:$0xff]  }
  0xbc   : > { %4805 = vmatprep.mubr.bf16.mxu1 %v571_v57  ;;  %v7872_v57 = vld [vmem:[#allocation6 + $0x424] ss:$8 sps:$4 sm:$0xff]  }
  0xbd   : > { %4735 = vmatpush1.bf16.msra.mxu0 %v7749_v22  ;;  %v7830_v22 = vld [vmem:[#allocation6 + $0x390] ss:$8 sps:$4 sm:$0xff]  }
  0xbe   : > { %4736 = vmatprep.subr.bf16.mxu0 %v7757_v23  ;;  %4776 = vmatpush1.bf16.msra.mxu1 %v7752_v24  ;;  %v7838_v23 = vld [vmem:[#allocation6 + $0x384] ss:$8 sps:$4 sm:$0xff]   ;;  %v7833_v24 = vld [vmem:[#allocation6 + $0x280] ss:$8 sps:$4 sm:$0xff]  }
  0xbf   : > { %4777 = vmatprep.subr.bf16.mxu1 %v7760_v25  ;;  %v7841_v25 = vld [vmem:[#allocation6 + $0x474] ss:$8 sps:$4 sm:$0xff]  }
  0xc1   : > { %4737 = vmatpush1.bf16.msra.mxu0 %v7755_v26  ;;  %v7836_v26 = vld [vmem:[#allocation6 + $0x380] ss:$8 sps:$4 sm:$0xff]  }
  0xc2   : > { %4738 = vmatprep.subr.bf16.mxu0 %v7763_v27  ;;  %4778 = vmatpush1.bf16.msra.mxu1 %v7758_v28  ;;  %v568_v27 = vpack.c.bf16 %v9286_v44, %v9286_v44  ;;  %v7845_v28 = vld [vmem:[#allocation6 + $0x574] ss:$8 sps:$4 sm:$0xff]  }
  0xc3   : > { %4779 = vmatprep.subr.bf16.mxu1 %v7766_v29  ;;  %v7839_v29 = vld [vmem:[#allocation6 + $0x470] ss:$8 sps:$4 sm:$0xff]  }
  0xc5   : > { %4739 = vmatpush1.bf16.msra.mxu0 %v7761_v30  ;;  %v570_v30 = vpack.c.bf16 %v9291_v50, %v9291_v50  ;;  %v7855_v50 = vld [vmem:[#allocation6 + $0x550] ss:$8 sps:$4 sm:$0xff]  }
  0xc6   : > { %4740 = vmatprep.subr.bf16.mxu0 %v7769_v31  ;;  %4780 = vmatpush1.bf16.msra.mxu1 %v7764_v32  ;;  %v7848_v31 = vld [vmem:[#allocation6 + $0x464] ss:$8 sps:$4 sm:$0xff]   ;;  %v324_v32 = vld [vmem:[#allocation3 + $0x10] sm:$0xff] }
  0xc7   : > { %4781 = vmatprep.subr.bf16.mxu1 %v7772_v33  ;;  %v7843_v33 = vld [vmem:[#allocation6 + $0x570] ss:$8 sps:$4 sm:$0xff]  }
  0xc9   : > { %4741 = vmatpush1.bf16.msra.mxu0 %v7767_v34  ;;  %v9300_v34 = vrot.slane %v324_v32, %v9281_v48 }
  0xca   : > { %4742 = vmatprep.subr.bf16.mxu0 %v7775_v35  ;;  %4782 = vmatpush1.bf16.msra.mxu1 %v7770_v36  ;;  %v378_v35 = vcombine.high %v324_v32, %v324_v32  ;;  %v7851_v36 = vld [vmem:[#allocation6 + $0x564] ss:$8 sps:$4 sm:$0xff]  }
  0xcb   : > { %4783 = vmatprep.subr.bf16.mxu1 %v7778_v37  ;;  %v7846_v37 = vld [vmem:[#allocation6 + $0x460] ss:$8 sps:$4 sm:$0xff]  }
  0xcd   : > { %4743 = vmatpush1.bf16.msra.mxu0 %v7773_v38  ;;  %v393_v38 = vcombine.high %v9300_v34, %v9300_v34 }
  0xce   : > { %4744 = vmatprep.subr.bf16.mxu0 %v7781_v39  ;;  %4784 = vmatpush1.bf16.msra.mxu1 %v7776_v40  ;;  %v9305_v39 = vrot.slane %v378_v35, %v9281_v48  ;;  %v7854_v40 = vld [vmem:[#allocation6 + $0x454] ss:$8 sps:$4 sm:$0xff]   ;;  %v7924_v35 = vld [vmem:[#allocation6 + $0x490] ss:$8 sps:$4 sm:$0xff]  }
  0xcf   : > { %4785 = vmatprep.subr.bf16.mxu1 %v7784_v42  ;;  %v573_v42 = vpack.c.bf16 %v393_v38, %v393_v38  ;;  %v7927_v38 = vld [vmem:[#allocation6 + $0x590] ss:$8 sps:$4 sm:$0xff]  }
  0xd0   : > { %v394_v44 = vcombine.high %v9305_v39, %v9305_v39 }
  0xd1   : > { %4745 = vmatpush1.bf16.msra.mxu0 %v7779_v46  ;;  %v7852_v46 = vld [vmem:[#allocation6 + $0x450] ss:$8 sps:$4 sm:$0xff]  }
  0xd2   : > { %4746 = vmatprep.subr.bf16.mxu0 %v7787_v47  ;;  %4786 = vmatpush1.bf16.msra.mxu1 %v7782_v51  ;;  %v575_v47 = vpack.c.bf16 %v394_v44, %v394_v44  ;;  %v7863_v51 = vld [vmem:[#allocation6 + $0x544] ss:$8 sps:$4 sm:$0xff]  }
  0xd3   : > { %4787 = vmatprep.subr.bf16.mxu1 %v7790_v52  ;;  %v7858_v52 = vld [vmem:[#allocation6 + $0x440] ss:$8 sps:$4 sm:$0xff]  }
  0xd5   : > { %4747 = vmatpush1.bf16.msra.mxu0 %v7785_v55  ;;  %v7869_v55 = vld [vmem:[#allocation6 + $0x534] ss:$8 sps:$4 sm:$0xff]  }
  0xd6   : > { %4748 = vmatprep.subr.bf16.mxu0 %v7793_v56  ;;  %4788 = vmatpush1.bf16.msra.mxu1 %v7788_v58  ;;  %v7864_v56 = vld [vmem:[#allocation6 + $0x430] ss:$8 sps:$4 sm:$0xff]  }
  0xd7   : > { %4789 = vmatprep.subr.bf16.mxu1 %v7796_v59  ;;  %v7867_v58 = vld [vmem:[#allocation6 + $0x530] ss:$8 sps:$4 sm:$0xff]   ;;  %v7875_v59 = vld [vmem:[#allocation6 + $0x524] ss:$8 sps:$4 sm:$0xff]  }
  0xd9   : > { %4749 = vmatpush2.bf16.msra.mxu0 %v7791_v60  ;;  %v7870_v60 = vld [vmem:[#allocation6 + $0x420] ss:$8 sps:$4 sm:$0xff]  }
  0xda   : > { %4750 = vmatprep.subr.bf16.mxu0 %v7799_v61  ;;  %4790 = vmatpush2.bf16.msra.mxu1 %v7794_v62  ;;  %v7878_v61 = vld [vmem:[#allocation6 + $0x414] ss:$8 sps:$4 sm:$0xff]   ;;  %v7873_v62 = vld [vmem:[#allocation6 + $0x520] ss:$8 sps:$4 sm:$0xff]  }
  0xdb   : > { %4791 = vmatprep.subr.bf16.mxu1 %v7802_v63  ;;  %v7881_v63 = vld [vmem:[#allocation6 + $0x514] ss:$8 sps:$4 sm:$0xff]  }
  0xdd   : > { %4751 = vmatpush2.bf16.msra.mxu0 %v7797_v0  ;;  %v7876_v0 = vld [vmem:[#allocation6 + $0x410] ss:$8 sps:$4 sm:$0xff]  }
  0xde   : > { %4752 = vmatprep.subr.bf16.mxu0 %v7805_v1  ;;  %4792 = vmatpush2.bf16.msra.mxu1 %v7800_v2  ;;  %v7884_v1 = vld [vmem:[#allocation6 + $0x404] ss:$8 sps:$4 sm:$0xff]   ;;  %v7879_v2 = vld [vmem:[#allocation6 + $0x510] ss:$8 sps:$4 sm:$0xff]  }
  0xdf   : > { %4793 = vmatprep.subr.bf16.mxu1 %v7808_v3  ;;  %v7887_v3 = vld [vmem:[#allocation6 + $0x504] ss:$8 sps:$4 sm:$0xff]  }
  0xe1   : > { %4753 = vmatpush2.bf16.msra.mxu0 %v7803_v4  ;;  %v7882_v4 = vld [vmem:[#allocation6 + $0x400] ss:$8 sps:$4 sm:$0xff]  }
  0xe2   : > { %4754 = vmatprep.subr.bf16.mxu0 %v7811_v5  ;;  %4794 = vmatpush2.bf16.msra.mxu1 %v7806_v6  ;;  %v7890_v5 = vld [vmem:[#allocation6 + $0x4f4] ss:$8 sps:$4 sm:$0xff]   ;;  %v7885_v6 = vld [vmem:[#allocation6 + $0x500] ss:$8 sps:$4 sm:$0xff]  }
  0xe3   : > { %4795 = vmatprep.subr.bf16.mxu1 %v7814_v7  ;;  %v7893_v7 = vld [vmem:[#allocation6 + $0x5f4] ss:$8 sps:$4 sm:$0xff]  }
  0xe5   : > { %4755 = vmatpush2.bf16.msra.mxu0 %v7809_v8  ;;  %v7888_v8 = vld [vmem:[#allocation6 + $0x4f0] ss:$8 sps:$4 sm:$0xff]  }
  0xe6   : > { %4756 = vmatprep.subr.bf16.mxu0 %v7817_v9  ;;  %4796 = vmatpush2.bf16.msra.mxu1 %v7812_v10  ;;  %v7896_v9 = vld [vmem:[#allocation6 + $0x4e4] ss:$8 sps:$4 sm:$0xff]   ;;  %v7891_v10 = vld [vmem:[#allocation6 + $0x5f0] ss:$8 sps:$4 sm:$0xff]  }
  0xe7   : > { %4797 = vmatprep.subr.bf16.mxu1 %v7820_v11  ;;  %v7899_v11 = vld [vmem:[#allocation6 + $0x5e4] ss:$8 sps:$4 sm:$0xff]  }
  0xe9   : > { %4757 = vmatpush2.bf16.msra.mxu0 %v7815_v12  ;;  %v7894_v12 = vld [vmem:[#allocation6 + $0x4e0] ss:$8 sps:$4 sm:$0xff]  }
  0xea   : > { %4758 = vmatprep.subr.bf16.mxu0 %v7823_v13  ;;  %4798 = vmatpush2.bf16.msra.mxu1 %v7818_v14  ;;  %v7902_v13 = vld [vmem:[#allocation6 + $0x4d4] ss:$8 sps:$4 sm:$0xff]   ;;  %v7897_v14 = vld [vmem:[#allocation6 + $0x5e0] ss:$8 sps:$4 sm:$0xff]  }
  0xeb   : > { %4799 = vmatprep.subr.bf16.mxu1 %v7826_v15  ;;  %v7905_v15 = vld [vmem:[#allocation6 + $0x5d4] ss:$8 sps:$4 sm:$0xff]  }
  0xed   : > { %4759 = vmatpush2.bf16.msra.mxu0 %v7821_v16  ;;  %v7900_v16 = vld [vmem:[#allocation6 + $0x4d0] ss:$8 sps:$4 sm:$0xff]  }
  0xee   : > { %4760 = vmatprep.subr.bf16.mxu0 %v7829_v17  ;;  %4800 = vmatpush2.bf16.msra.mxu1 %v7824_v18  ;;  %v7908_v17 = vld [vmem:[#allocation6 + $0x4c4] ss:$8 sps:$4 sm:$0xff]   ;;  %v7903_v18 = vld [vmem:[#allocation6 + $0x5d0] ss:$8 sps:$4 sm:$0xff]  }
  0xef   : > { %4801 = vmatprep.subr.bf16.mxu1 %v7832_v19  ;;  %v7911_v19 = vld [vmem:[#allocation6 + $0x5c4] ss:$8 sps:$4 sm:$0xff]  }
  0xf1   : > { %4761 = vmatpush2.bf16.msra.mxu0 %v7827_v20  ;;  %v7906_v20 = vld [vmem:[#allocation6 + $0x4c0] ss:$8 sps:$4 sm:$0xff]  }
  0xf2   : > { %4762 = vmatprep.subr.bf16.mxu0 %v7835_v21  ;;  %4802 = vmatpush2.bf16.msra.mxu1 %v7830_v22  ;;  %v7914_v21 = vld [vmem:[#allocation6 + $0x4b4] ss:$8 sps:$4 sm:$0xff]   ;;  %v7909_v22 = vld [vmem:[#allocation6 + $0x5c0] ss:$8 sps:$4 sm:$0xff]  }
  0xf3   : > { %4803 = vmatprep.subr.bf16.mxu1 %v7838_v23  ;;  %v7917_v23 = vld [vmem:[#allocation6 + $0x5b4] ss:$8 sps:$4 sm:$0xff]  }
  0xf5   : > { %4763 = vmatpush2.bf16.msra.mxu0 %v7833_v24  ;;  %v7912_v24 = vld [vmem:[#allocation6 + $0x4b0] ss:$8 sps:$4 sm:$0xff]  }
  0xf6   : > { %4814 = vmatprep.subr.bf16.mxu0 %v7841_v25  ;;  %4804 = vmatpush2.bf16.msra.mxu1 %v7836_v26  ;;  %v7920_v25 = vld [vmem:[#allocation6 + $0x4a4] ss:$8 sps:$4 sm:$0xff]   ;;  %v7915_v26 = vld [vmem:[#allocation6 + $0x5b0] ss:$8 sps:$4 sm:$0xff]  }
  0xf7   : > { %4855 = vmatprep.subr.bf16.mxu1 %v7845_v28  ;;  %v325_v28 = vld [vmem:[#allocation3 + $0x18] sm:$0xff] }
  0xf8   : > { %4765 = vmatmul.mubr.bf16.vlgmr.msra.gmra.mxu0 %v568_v27  ;;  %v7923_v27 = vld [vmem:[#allocation6 + $0x5a4] ss:$8 sps:$4 sm:$0xff]   ;;  %v395_v32 = vcombine.high %v325_v28, %v325_v28 }
  0xf9   : > { %4815 = vmatpush1.bf16.msra.mxu0 %v7839_v29  ;;  %4806 = vmatmul.mubr.bf16.vlgmr.msra.gmra.mxu1 %v570_v30  ;;  %v7918_v29 = vld [vmem:[#allocation6 + $0x4a0] ss:$8 sps:$4 sm:$0xff]   ;;  %v7926_v30 = vld [vmem:[#allocation6 + $0x494] ss:$8 sps:$4 sm:$0xff]  }
  0xfa   : > { %4816 = vmatprep.subr.bf16.mxu0 %v7848_v31  ;;  %4856 = vmatpush1.bf16.msra.mxu1 %v7843_v33  ;;  %v7921_v31 = vld [vmem:[#allocation6 + $0x5a0] ss:$8 sps:$4 sm:$0xff]   ;;  %v7929_v33 = vld [vmem:[#allocation6 + $0x594] ss:$8 sps:$4 sm:$0xff]  }
  0xfb   : > { %4857 = vmatprep.subr.bf16.mxu1 %v7851_v36  ;;  %4846 = vmatprep.mubr.bf16.mxu0 %v573_v42  ;;  %v9310_v36 = vrot.slane %v325_v28, %v9281_v48  ;;  %v7930_v42 = vld [vmem:[#allocation6 + $0x480] ss:$8 sps:$4 sm:$0xff]   ;;  %v7997_v28 = vld [vmem:[#allocation6 + $0x6d0] ss:$8 sps:$4 sm:$0xff]  }
  0xfc   : > { %4887 = vmatprep.mubr.bf16.mxu1 %v575_v47 }
  0xfd   : > { %4817 = vmatpush1.bf16.msra.mxu0 %v7846_v37  ;;  %v7932_v37 = vld [vmem:[#allocation6 + $0x484] ss:$8 sps:$4 sm:$0xff]   ;;  %v410_v44 = vcombine.high %v9310_v36, %v9310_v36 }
  0xfe   : > { %4818 = vmatprep.subr.bf16.mxu0 %v7854_v40  ;;  %4858 = vmatpush1.bf16.msra.mxu1 %v7849_v41  ;;  %v9313_v40 = vrot.slane %v395_v32, %v9281_v48  ;;  %v7935_v41 = vld [vmem:[#allocation6 + $0x584] ss:$8 sps:$4 sm:$0xff]   ;;  %v8003_v32 = vld [vmem:[#allocation6 + $0x6c0] ss:$8 sps:$4 sm:$0xff]  }
  0xff   : > { %4859 = vmatprep.subr.bf16.mxu1 %v7857_v45  ;;  %v7938_v45 = vld [vmem:[#allocation6 + $0x674] ss:$8 sps:$4 sm:$0xff]  }
 0x100   : > { %v411_v47 = vcombine.high %v9313_v40, %v9313_v40 }
 0x101   : > { %4819 = vmatpush1.bf16.msra.mxu0 %v7852_v46  ;;  %v7933_v46 = vld [vmem:[#allocation6 + $0x580] ss:$8 sps:$4 sm:$0xff]  }
 0x102   : > { %4820 = vmatprep.subr.bf16.mxu0 %v7860_v49  ;;  %4860 = vmatpush1.bf16.msra.mxu1 %v7855_v50  ;;  %v572_v49 = vpack.c.bf16 %v9300_v34, %v9300_v34  ;;  %v7942_v50 = vld [vmem:[#allocation6 + $0x774] ss:$8 sps:$4 sm:$0xff]  }
 0x103   : > { %4861 = vmatprep.subr.bf16.mxu1 %v7863_v51  ;;  %v7936_v51 = vld [vmem:[#allocation6 + $0x670] ss:$8 sps:$4 sm:$0xff]   ;;  %v7951_v34 = vld [vmem:[#allocation6 + $0x654] ss:$8 sps:$4 sm:$0xff]  }
 0x105   : > { %4821 = vmatpush1.bf16.msra.mxu0 %v7858_v52  ;;  %v577_v52 = vpack.c.bf16 %v410_v44, %v410_v44  ;;  %v8020_v44 = vld [vmem:[#allocation6 + $0x7a4] ss:$8 sps:$4 sm:$0xff]  }
 0x106   : > { %4822 = vmatprep.subr.bf16.mxu0 %v7866_v53  ;;  %4862 = vmatpush1.bf16.msra.mxu1 %v7861_v54  ;;  %v574_v53 = vpack.c.bf16 %v9305_v39, %v9305_v39  ;;  %v7945_v54 = vld [vmem:[#allocation6 + $0x664] ss:$8 sps:$4 sm:$0xff]   ;;  %v7949_v39 = vld [vmem:[#allocation6 + $0x650] ss:$8 sps:$4 sm:$0xff]  }
 0x107   : > { %4863 = vmatprep.subr.bf16.mxu1 %v7869_v55  ;;  %v7940_v55 = vld [vmem:[#allocation6 + $0x770] ss:$8 sps:$4 sm:$0xff]  }
 0x109   : > { %4823 = vmatpush1.bf16.msra.mxu0 %v7864_v56  ;;  %v579_v56 = vpack.c.bf16 %v411_v47, %v411_v47  ;;  %v8023_v47 = vld [vmem:[#allocation6 + $0x694] ss:$8 sps:$4 sm:$0xff]  }
 0x10a   : > { %4824 = vmatprep.subr.bf16.mxu0 %v7872_v57  ;;  %4864 = vmatpush1.bf16.msra.mxu1 %v7867_v58  ;;  %v7948_v57 = vld [vmem:[#allocation6 + $0x764] ss:$8 sps:$4 sm:$0xff]   ;;  %v7943_v58 = vld [vmem:[#allocation6 + $0x660] ss:$8 sps:$4 sm:$0xff]  }
 0x10b   : > { %4865 = vmatprep.subr.bf16.mxu1 %v7875_v59  ;;  %v7946_v59 = vld [vmem:[#allocation6 + $0x760] ss:$8 sps:$4 sm:$0xff]  }
 0x10d   : > { %4825 = vmatpush1.bf16.msra.mxu0 %v7870_v60  ;;  %v7954_v60 = vld [vmem:[#allocation6 + $0x754] ss:$8 sps:$4 sm:$0xff]  }
 0x10e   : > { %4826 = vmatprep.subr.bf16.mxu0 %v7878_v61  ;;  %4866 = vmatpush1.bf16.msra.mxu1 %v7873_v62  ;;  %v7957_v61 = vld [vmem:[#allocation6 + $0x644] ss:$8 sps:$4 sm:$0xff]   ;;  %v7952_v62 = vld [vmem:[#allocation6 + $0x750] ss:$8 sps:$4 sm:$0xff]  }
 0x10f   : > { %4867 = vmatprep.subr.bf16.mxu1 %v7881_v63  ;;  %v7960_v63 = vld [vmem:[#allocation6 + $0x744] ss:$8 sps:$4 sm:$0xff]  }
 0x111   : > { %4827 = vmatpush1.bf16.msra.mxu0 %v7876_v0  ;;  %v7955_v0 = vld [vmem:[#allocation6 + $0x640] ss:$8 sps:$4 sm:$0xff]  }
 0x112   : > { %4828 = vmatprep.subr.bf16.mxu0 %v7884_v1  ;;  %4868 = vmatpush1.bf16.msra.mxu1 %v7879_v2  ;;  %v7963_v1 = vld [vmem:[#allocation6 + $0x634] ss:$8 sps:$4 sm:$0xff]   ;;  %v7958_v2 = vld [vmem:[#allocation6 + $0x740] ss:$8 sps:$4 sm:$0xff]  }
 0x113   : > { %4869 = vmatprep.subr.bf16.mxu1 %v7887_v3  ;;  %v7966_v3 = vld [vmem:[#allocation6 + $0x734] ss:$8 sps:$4 sm:$0xff]  }
 0x115   : > { %4829 = vmatpush1.bf16.msra.mxu0 %v7882_v4  ;;  %v7961_v4 = vld [vmem:[#allocation6 + $0x630] ss:$8 sps:$4 sm:$0xff]  }
 0x116   : > { %4830 = vmatprep.subr.bf16.mxu0 %v7890_v5  ;;  %4870 = vmatpush1.bf16.msra.mxu1 %v7885_v6  ;;  %v7969_v5 = vld [vmem:[#allocation6 + $0x624] ss:$8 sps:$4 sm:$0xff]   ;;  %v7964_v6 = vld [vmem:[#allocation6 + $0x730] ss:$8 sps:$4 sm:$0xff]  }
 0x117   : > { %4871 = vmatprep.subr.bf16.mxu1 %v7893_v7  ;;  %v7972_v7 = vld [vmem:[#allocation6 + $0x724] ss:$8 sps:$4 sm:$0xff]  }
 0x119   : > { %4831 = vmatpush2.bf16.msra.mxu0 %v7888_v8  ;;  %v7967_v8 = vld [vmem:[#allocation6 + $0x620] ss:$8 sps:$4 sm:$0xff]  }
 0x11a   : > { %4832 = vmatprep.subr.bf16.mxu0 %v7896_v9  ;;  %4872 = vmatpush2.bf16.msra.mxu1 %v7891_v10  ;;  %v7975_v9 = vld [vmem:[#allocation6 + $0x614] ss:$8 sps:$4 sm:$0xff]   ;;  %v7970_v10 = vld [vmem:[#allocation6 + $0x720] ss:$8 sps:$4 sm:$0xff]  }
 0x11b   : > { %4873 = vmatprep.subr.bf16.mxu1 %v7899_v11  ;;  %v7978_v11 = vld [vmem:[#allocation6 + $0x714] ss:$8 sps:$4 sm:$0xff]  }
 0x11d   : > { %4833 = vmatpush2.bf16.msra.mxu0 %v7894_v12  ;;  %v7973_v12 = vld [vmem:[#allocation6 + $0x610] ss:$8 sps:$4 sm:$0xff]  }
 0x11e   : > { %4834 = vmatprep.subr.bf16.mxu0 %v7902_v13  ;;  %4874 = vmatpush2.bf16.msra.mxu1 %v7897_v14  ;;  %v7981_v13 = vld [vmem:[#allocation6 + $0x604] ss:$8 sps:$4 sm:$0xff]   ;;  %v7976_v14 = vld [vmem:[#allocation6 + $0x710] ss:$8 sps:$4 sm:$0xff]  }
 0x11f   : > { %4875 = vmatprep.subr.bf16.mxu1 %v7905_v15  ;;  %v7984_v15 = vld [vmem:[#allocation6 + $0x704] ss:$8 sps:$4 sm:$0xff]  }
 0x121   : > { %4835 = vmatpush2.bf16.msra.mxu0 %v7900_v16  ;;  %v7979_v16 = vld [vmem:[#allocation6 + $0x600] ss:$8 sps:$4 sm:$0xff]  }
 0x122   : > { %4836 = vmatprep.subr.bf16.mxu0 %v7908_v17  ;;  %4876 = vmatpush2.bf16.msra.mxu1 %v7903_v18  ;;  %v7987_v17 = vld [vmem:[#allocation6 + $0x6f4] ss:$8 sps:$4 sm:$0xff]   ;;  %v7982_v18 = vld [vmem:[#allocation6 + $0x700] ss:$8 sps:$4 sm:$0xff]  }
 0x123   : > { %4877 = vmatprep.subr.bf16.mxu1 %v7911_v19  ;;  %v7990_v19 = vld [vmem:[#allocation6 + $0x7f4] ss:$8 sps:$4 sm:$0xff]  }
 0x125   : > { %4837 = vmatpush2.bf16.msra.mxu0 %v7906_v20  ;;  %v7985_v20 = vld [vmem:[#allocation6 + $0x6f0] ss:$8 sps:$4 sm:$0xff]  }
 0x126   : > { %4838 = vmatprep.subr.bf16.mxu0 %v7914_v21  ;;  %4878 = vmatpush2.bf16.msra.mxu1 %v7909_v22  ;;  %v7993_v21 = vld [vmem:[#allocation6 + $0x6e4] ss:$8 sps:$4 sm:$0xff]   ;;  %v7988_v22 = vld [vmem:[#allocation6 + $0x7f0] ss:$8 sps:$4 sm:$0xff]  }
 0x127   : > { %4879 = vmatprep.subr.bf16.mxu1 %v7917_v23  ;;  %v7996_v23 = vld [vmem:[#allocation6 + $0x7e4] ss:$8 sps:$4 sm:$0xff]  }
 0x129   : > { %4839 = vmatpush2.bf16.msra.mxu0 %v7912_v24  ;;  %v7991_v24 = vld [vmem:[#allocation6 + $0x6e0] ss:$8 sps:$4 sm:$0xff]  }
 0x12a   : > { %4840 = vmatprep.subr.bf16.mxu0 %v7920_v25  ;;  %4880 = vmatpush2.bf16.msra.mxu1 %v7915_v26  ;;  %v7999_v25 = vld [vmem:[#allocation6 + $0x6d4] ss:$8 sps:$4 sm:$0xff]   ;;  %v7994_v26 = vld [vmem:[#allocation6 + $0x7e0] ss:$8 sps:$4 sm:$0xff]  }
 0x12b   : > { %4881 = vmatprep.subr.bf16.mxu1 %v7923_v27  ;;  %v8002_v27 = vld [vmem:[#allocation6 + $0x7d4] ss:$8 sps:$4 sm:$0xff]  }
 0x12d   : > { %4841 = vmatpush2.bf16.msra.mxu0 %v7918_v29  ;;  %v8005_v29 = vld [vmem:[#allocation6 + $0x6c4] ss:$8 sps:$4 sm:$0xff]  }
 0x12e   : > { %4842 = vmatprep.subr.bf16.mxu0 %v7926_v30  ;;  %4882 = vmatpush2.bf16.msra.mxu1 %v7921_v31  ;;  %v8000_v30 = vld [vmem:[#allocation6 + $0x7d0] ss:$8 sps:$4 sm:$0xff]   ;;  %v8008_v31 = vld [vmem:[#allocation6 + $0x7c4] ss:$8 sps:$4 sm:$0xff]  }
 0x12f   : > { %4883 = vmatprep.subr.bf16.mxu1 %v7929_v33  ;;  %v8011_v33 = vld [vmem:[#allocation6 + $0x6b4] ss:$8 sps:$4 sm:$0xff]  }
 0x131   : > { %4843 = vmatpush2.bf16.msra.mxu0 %v7924_v35  ;;  %v8006_v35 = vld [vmem:[#allocation6 + $0x7c0] ss:$8 sps:$4 sm:$0xff]  }
 0x132   : > { %4844 = vmatprep.subr.bf16.mxu0 %v7932_v37  ;;  %4884 = vmatpush2.bf16.msra.mxu1 %v7927_v38  ;;  %v8014_v37 = vld [vmem:[#allocation6 + $0x7b4] ss:$8 sps:$4 sm:$0xff]   ;;  %v8009_v38 = vld [vmem:[#allocation6 + $0x6b0] ss:$8 sps:$4 sm:$0xff]  }
 0x133   : > { %4885 = vmatprep.subr.bf16.mxu1 %v7935_v41  ;;  %v8017_v41 = vld [vmem:[#allocation6 + $0x6a4] ss:$8 sps:$4 sm:$0xff]  }
 0x135   : > { %4845 = vmatpush2.bf16.msra.mxu0 %v7930_v42  ;;  %v8012_v42 = vld [vmem:[#allocation6 + $0x7b0] ss:$8 sps:$4 sm:$0xff]  }
 0x136   : > { %4896 = vmatprep.subr.bf16.mxu0 %v7938_v45  ;;  %4886 = vmatpush2.bf16.msra.mxu1 %v7933_v46  ;;  %v326_v45 = vld [vmem:[#allocation3 + $0x20] sm:$0xff]  ;;  %v8015_v46 = vld [vmem:[#allocation6 + $0x6a0] ss:$8 sps:$4 sm:$0xff]  }
 0x137   : > { %4937 = vmatprep.subr.bf16.mxu1 %v7942_v50  ;;  %v412_v50 = vcombine.high %v326_v45, %v326_v45 }
 0x138   : > { %4847 = vmatmul.mubr.bf16.vlgmr.msra.gmra.mxu0 %v572_v49  ;;  %v8018_v49 = vld [vmem:[#allocation6 + $0x7a0] ss:$8 sps:$4 sm:$0xff]  }
 0x139   : > { %4897 = vmatpush1.bf16.msra.mxu0 %v7936_v51  ;;  %4928 = vmatprep.mubr.bf16.mxu0 %v577_v52  ;;  %v8026_v51 = vld [vmem:[#allocation6 + $0x794] ss:$8 sps:$4 sm:$0xff]   ;;  %v8021_v52 = vld [vmem:[#allocation6 + $0x690] ss:$8 sps:$4 sm:$0xff]  }
 0x13a   : > { %4888 = vmatmul.mubr.bf16.vlgmr.msra.gmra.mxu1 %v574_v53  ;;  %4898 = vmatprep.subr.bf16.mxu0 %v7945_v54  ;;  %v9324_v53 = vrot.slane %v326_v45, %v9281_v48  ;;  %v8029_v54 = vld [vmem:[#allocation6 + $0x684] ss:$8 sps:$4 sm:$0xff]   ;;  %v8070_v45 = vld [vmem:[#allocation6 + $0x810] ss:$8 sps:$4 sm:$0xff]  }
 0x13b   : > { %4938 = vmatpush1.bf16.msra.mxu1 %v7940_v55  ;;  %4969 = vmatprep.mubr.bf16.mxu1 %v579_v56  ;;  %v8024_v55 = vld [vmem:[#allocation6 + $0x790] ss:$8 sps:$4 sm:$0xff]   ;;  %v9327_v56 = vrot.slane %v412_v50, %v9281_v48  ;;  %v8076_v50 = vld [vmem:[#allocation6 + $0x800] ss:$8 sps:$4 sm:$0xff]  }
 0x13c   : > { %4939 = vmatprep.subr.bf16.mxu1 %v7948_v57  ;;  %v8032_v57 = vld [vmem:[#allocation6 + $0x784] ss:$8 sps:$4 sm:$0xff]  }
 0x13d   : > { %4899 = vmatpush1.bf16.msra.mxu0 %v7943_v58  ;;  %v8027_v58 = vld [vmem:[#allocation6 + $0x680] ss:$8 sps:$4 sm:$0xff]  }
 0x13e   : > { %4900 = vmatprep.subr.bf16.mxu0 %v7951_v34  ;;  %v1282_v34 = vsub.s32 0, %v9278_v43 }
 0x13f   : > { %4940 = vmatpush1.bf16.msra.mxu1 %v7946_v59  ;;  %v427_v59 = vcombine.high %v9324_v53, %v9324_v53 }
 0x140   : > { %4941 = vmatprep.subr.bf16.mxu1 %v7954_v60  ;;  %v1278_v60 = vld [vmem:[#allocation8] sm:$0x3] }
 0x141   : > { %4901 = vmatpush1.bf16.msra.mxu0 %v7949_v39  ;;  %v8035_v39 = vld [vmem:[#allocation6 + $0x874] ss:$8 sps:$4 sm:$0xff]  }
 0x142   : > { %4902 = vmatprep.subr.bf16.mxu0 %v7957_v61  ;;  %v8030_v61 = vld [vmem:[#allocation6 + $0x780] ss:$8 sps:$4 sm:$0xff]  }
 0x143   : > { %4942 = vmatpush1.bf16.msra.mxu1 %v7952_v62  ;;  %v1286_v62 = vsub.s32 1, %v9278_v43 }
 0x144   : > { %4943 = vmatprep.subr.bf16.mxu1 %v7960_v63  ;;  %v428_v63 = vcombine.high %v9327_v56, %v9327_v56 }
 0x145   : > { %4903 = vmatpush1.bf16.msra.mxu0 %v7955_v0  ;;  %v576_v0 = vpack.c.bf16 %v9310_v36, %v9310_v36  ;;  %v8040_v36 = vld [vmem:[#allocation6 + $0x860] ss:$8 sps:$4 sm:$0xff]  }
 0x146   : > { %4904 = vmatprep.subr.bf16.mxu0 %v7963_v1  ;;  %v8039_v1 = vld [vmem:[#allocation6 + $0x974] ss:$8 sps:$4 sm:$0xff]  }
 0x147   : > { %4944 = vmatpush1.bf16.msra.mxu1 %v7958_v2  ;;  %v1283_v2 = vrot.slane %v1278_v60, %v1282_v34  ;;  %v8090_v34 = vld [vmem:[#allocation6 + $0x8e4] ss:$8 sps:$4 sm:$0xff]  }
 0x148   : > { %4945 = vmatprep.subr.bf16.mxu1 %v7966_v3  ;;  %v8033_v3 = vld [vmem:[#allocation6 + $0x870] ss:$8 sps:$4 sm:$0xff]  }
 0x149   : > { %4905 = vmatpush1.bf16.msra.mxu0 %v7961_v4  ;;  %v581_v4 = vpack.c.bf16 %v427_v59, %v427_v59  ;;  %v8088_v59 = vld [vmem:[#allocation6 + $0x8e0] ss:$8 sps:$4 sm:$0xff]  }
 0x14a   : > { %4906 = vmatprep.subr.bf16.mxu0 %v7969_v5  ;;  %v578_v5 = vpack.c.bf16 %v9313_v40, %v9313_v40 }
 0x14b   : > { %4946 = vmatpush1.bf16.msra.mxu1 %v7964_v6  ;;  %v8042_v6 = vld [vmem:[#allocation6 + $0x864] ss:$8 sps:$4 sm:$0xff]  }
 0x14c   : > { %4947 = vmatprep.subr.bf16.mxu1 %v7972_v7  ;;  %v1287_v7 = vrot.slane %v1278_v60, %v1286_v62  ;;  %v8093_v60 = vld [vmem:[#allocation6 + $0x9e4] ss:$8 sps:$4 sm:$0xff]   ;;  %v8094_v62 = vld [vmem:[#allocation6 + $0x8d0] ss:$8 sps:$4 sm:$0xff]  }
 0x14d   : > { %4907 = vmatpush1.bf16.msra.mxu0 %v7967_v8  ;;  %v8037_v8 = vld [vmem:[#allocation6 + $0x970] ss:$8 sps:$4 sm:$0xff]  }
 0x14e   : > { %4908 = vmatprep.subr.bf16.mxu0 %v7975_v9  ;;  %v583_v9 = vpack.c.bf16 %v428_v63, %v428_v63  ;;  %v8099_v63 = vld [vmem:[#allocation6 + $0x9d4] ss:$8 sps:$4 sm:$0xff]  }
 0x14f   : > { %4948 = vmatpush1.bf16.msra.mxu1 %v7970_v10 }
 0x150   : > { %4949 = vmatprep.subr.bf16.mxu1 %v7978_v11  ;;  %v8045_v11 = vld [vmem:[#allocation6 + $0x964] ss:$8 sps:$4 sm:$0xff]  }
 0x151   : > { %4909 = vmatpush1.bf16.msra.mxu0 %v7973_v12 }
 0x152   : > { %4910 = vmatprep.subr.bf16.mxu0 %v7981_v13 }
 0x153   : > { %4950 = vmatpush1.bf16.msra.mxu1 %v7976_v14 }
 0x154   : > { %4951 = vmatprep.subr.bf16.mxu1 %v7984_v15  ;;  %v8048_v15 = vld [vmem:[#allocation6 + $0x854] ss:$8 sps:$4 sm:$0xff]  }
 0x155   : > { %4911 = vmatpush1.bf16.msra.mxu0 %v7979_v16 }
 0x156   : > { %4912 = vmatprep.subr.bf16.mxu0 %v7987_v17  ;;  %v8043_v17 = vld [vmem:[#allocation6 + $0x960] ss:$8 sps:$4 sm:$0xff]  }
 0x157   : > { %4952 = vmatpush1.bf16.msra.mxu1 %v7982_v18 }
 0x158   : > { %4953 = vmatprep.subr.bf16.mxu1 %v7990_v19 }
 0x159   : > { %4913 = vmatpush2.bf16.msra.mxu0 %v7985_v20  ;;  %v8051_v20 = vld [vmem:[#allocation6 + $0x954] ss:$8 sps:$4 sm:$0xff]  }
 0x15a   : > { %4914 = vmatprep.subr.bf16.mxu0 %v7993_v21 }
 0x15b   : > { %4954 = vmatpush2.bf16.msra.mxu1 %v7988_v22  ;;  %v8046_v22 = vld [vmem:[#allocation6 + $0x850] ss:$8 sps:$4 sm:$0xff]  }
 0x15c   : > { %4955 = vmatprep.subr.bf16.mxu1 %v7996_v23  ;;  %v8049_v23 = vld [vmem:[#allocation6 + $0x950] ss:$8 sps:$4 sm:$0xff]  }
 0x15d   : > { %4915 = vmatpush2.bf16.msra.mxu0 %v7991_v24 }
 0x15e   : > { %4916 = vmatprep.subr.bf16.mxu0 %v7999_v25  ;;  %v8054_v25 = vld [vmem:[#allocation6 + $0x844] ss:$8 sps:$4 sm:$0xff]  }
 0x15f   : > { %4956 = vmatpush2.bf16.msra.mxu1 %v7994_v26 }
 0x160   : > { %4957 = vmatprep.subr.bf16.mxu1 %v8002_v27  ;;  %v8052_v27 = vld [vmem:[#allocation6 + $0x840] ss:$8 sps:$4 sm:$0xff]  }
 0x161   : > { %4917 = vmatpush2.bf16.msra.mxu0 %v7997_v28  ;;  %v8057_v28 = vld [vmem:[#allocation6 + $0x944] ss:$8 sps:$4 sm:$0xff]  }
 0x162   : > { %4918 = vmatprep.subr.bf16.mxu0 %v8005_v29 }
 0x163   : > { %4958 = vmatpush2.bf16.msra.mxu1 %v8000_v30  ;;  %v8055_v30 = vld [vmem:[#allocation6 + $0x940] ss:$8 sps:$4 sm:$0xff]  }
 0x164   : > { %4959 = vmatprep.subr.bf16.mxu1 %v8008_v31  ;;  %v8060_v31 = vld [vmem:[#allocation6 + $0x834] ss:$8 sps:$4 sm:$0xff]  }
 0x165   : > { %4919 = vmatpush2.bf16.msra.mxu0 %v8003_v32  ;;  %v8058_v32 = vld [vmem:[#allocation6 + $0x830] ss:$8 sps:$4 sm:$0xff]  }
 0x166   : > { %4920 = vmatprep.subr.bf16.mxu0 %v8011_v33  ;;  %v8063_v33 = vld [vmem:[#allocation6 + $0x934] ss:$8 sps:$4 sm:$0xff]  }
 0x167   : > { %4960 = vmatpush2.bf16.msra.mxu1 %v8006_v35  ;;  %v8061_v35 = vld [vmem:[#allocation6 + $0x930] ss:$8 sps:$4 sm:$0xff]  }
 0x168   : > { %4961 = vmatprep.subr.bf16.mxu1 %v8014_v37  ;;  %v8066_v37 = vld [vmem:[#allocation6 + $0x824] ss:$8 sps:$4 sm:$0xff]  }
 0x169   : > { %4921 = vmatpush2.bf16.msra.mxu0 %v8009_v38  ;;  %v8064_v38 = vld [vmem:[#allocation6 + $0x820] ss:$8 sps:$4 sm:$0xff]  }
 0x16a   : > { %4922 = vmatprep.subr.bf16.mxu0 %v8017_v41  ;;  %v8069_v41 = vld [vmem:[#allocation6 + $0x924] ss:$8 sps:$4 sm:$0xff]  }
 0x16b   : > { %4962 = vmatpush2.bf16.msra.mxu1 %v8012_v42  ;;  %v8067_v42 = vld [vmem:[#allocation6 + $0x920] ss:$8 sps:$4 sm:$0xff]  }
 0x16c   : > { %4963 = vmatprep.subr.bf16.mxu1 %v8020_v44  ;;  %v8072_v44 = vld [vmem:[#allocation6 + $0x814] ss:$8 sps:$4 sm:$0xff]  }
 0x16d   : > { %4923 = vmatpush2.bf16.msra.mxu0 %v8015_v46  ;;  %v8075_v46 = vld [vmem:[#allocation6 + $0x914] ss:$8 sps:$4 sm:$0xff]  }
 0x16e   : > { %4924 = vmatprep.subr.bf16.mxu0 %v8023_v47  ;;  %v8073_v47 = vld [vmem:[#allocation6 + $0x910] ss:$8 sps:$4 sm:$0xff]  }
 0x16f   : > { %4964 = vmatpush2.bf16.msra.mxu1 %v8018_v49  ;;  %v8078_v49 = vld [vmem:[#allocation6 + $0x804] ss:$8 sps:$4 sm:$0xff]  }
 0x170   : > { %4965 = vmatprep.subr.bf16.mxu1 %v8026_v51  ;;  %v8081_v51 = vld [vmem:[#allocation6 + $0x904] ss:$8 sps:$4 sm:$0xff]  }
 0x171   : > { %4925 = vmatpush2.bf16.msra.mxu0 %v8021_v52  ;;  %v8079_v52 = vld [vmem:[#allocation6 + $0x900] ss:$8 sps:$4 sm:$0xff]  }
 0x172   : > { %4926 = vmatprep.subr.bf16.mxu0 %v8029_v54  ;;  %v8084_v54 = vld [vmem:[#allocation6 + $0x8f4] ss:$8 sps:$4 sm:$0xff]  }
 0x173   : > { %4966 = vmatpush2.bf16.msra.mxu1 %v8024_v55  ;;  %v8082_v55 = vld [vmem:[#allocation6 + $0x8f0] ss:$8 sps:$4 sm:$0xff]  }
 0x174   : > { %4967 = vmatprep.subr.bf16.mxu1 %v8032_v57  ;;  %v8087_v57 = vld [vmem:[#allocation6 + $0x9f4] ss:$8 sps:$4 sm:$0xff]  }
 0x175   : > { %4927 = vmatpush2.bf16.msra.mxu0 %v8027_v58  ;;  %v8085_v58 = vld [vmem:[#allocation6 + $0x9f0] ss:$8 sps:$4 sm:$0xff]  }
 0x176   : > { %4978 = vmatprep.subr.bf16.mxu0 %v8035_v39  ;;  %v8091_v39 = vld [vmem:[#allocation6 + $0x9e0] ss:$8 sps:$4 sm:$0xff]  }
 0x177   : > { %4968 = vmatpush2.bf16.msra.mxu1 %v8030_v61  ;;  %v8096_v61 = vld [vmem:[#allocation6 + $0x8d4] ss:$8 sps:$4 sm:$0xff]  }
 0x178   : > { %v4684_v10 = vpop.f32.mrf.mxu0  ;;  %4929 = vmatmul.mubr.bf16.vlgmr.msra.gmra.mxu0 %v576_v0  ;;  %5019 = vmatprep.subr.bf16.mxu1 %v8039_v1  ;;  %v8097_v0 = vld [vmem:[#allocation6 + $0x9d0] ss:$8 sps:$4 sm:$0xff]   ;;  %v8102_v1 = vld [vmem:[#allocation6 + $0x8c4] ss:$8 sps:$4 sm:$0xff]  }
 0x179   : > { %v4685_v12 = vadd.f32 %v4684_v10, %v1283_v2  ;;  %4979 = vmatpush1.bf16.msra.mxu0 %v8033_v3  ;;  %5010 = vmatprep.mubr.bf16.mxu0 %v581_v4  ;;  %v4725_v14 = vpop.f32.mrf.mxu1  ;;  %v8100_v2 = vld [vmem:[#allocation6 + $0x8c0] ss:$8 sps:$4 sm:$0xff]   ;;  %v8105_v3 = vld [vmem:[#allocation6 + $0x9c4] ss:$8 sps:$4 sm:$0xff]  }
 0x17a   : > { %v4686_v13 = vpop.f32.mrf.mxu0  ;;  %4970 = vmatmul.mubr.bf16.vlgmr.msra.gmra.mxu1 %v578_v5  ;;  %4980 = vmatprep.subr.bf16.mxu0 %v8042_v6  ;;  %v8103_v4 = vld [vmem:[#allocation6 + $0x9c0] ss:$8 sps:$4 sm:$0xff]   ;;  %v8108_v5 = vld [vmem:[#allocation6 + $0x8b4] ss:$8 sps:$4 sm:$0xff]   ;;  %v8106_v6 = vld [vmem:[#allocation6 + $0x8b0] ss:$8 sps:$4 sm:$0xff]  }
 0x17b   : > { %v4687_v16 = vadd.f32 %v4686_v13, %v1287_v7  ;;  %v9339_v40 = vadd.f32 %v4725_v14, %v4685_v12  ;;  %5020 = vmatpush1.bf16.msra.mxu1 %v8037_v8  ;;  %5051 = vmatprep.mubr.bf16.mxu1 %v583_v9  ;;  %v4727_v19 = vpop.f32.mrf.mxu1  ;;  %v8111_v7 = vld [vmem:[#allocation6 + $0x9b4] ss:$8 sps:$4 sm:$0xff]   ;;  %v8109_v8 = vld [vmem:[#allocation6 + $0x9b0] ss:$8 sps:$4 sm:$0xff]   ;;  %v8114_v9 = vld [vmem:[#allocation6 + $0x8a4] ss:$8 sps:$4 sm:$0xff]  }
 0x17c   : > { %v4688_v18 = vpop.f32.mrf.mxu0  ;;  %5021 = vmatprep.subr.bf16.mxu1 %v8045_v11  ;;  %v8117_v10 = vld [vmem:[#allocation6 + $0x9a4] ss:$8 sps:$4 sm:$0xff]   ;;  %v327_v11 = vld [vmem:[#allocation3 + $0x28] sm:$0xff]  ;;  %v8112_v12 = vld [vmem:[#allocation6 + $0x8a0] ss:$8 sps:$4 sm:$0xff]  }
 0x17d   : > { %v9341_v21 = vadd.f32 %v4727_v19, %v4687_v16  ;;  %4981 = vmatpush1.bf16.msra.mxu0 %v8040_v36  ;;  %v4729_v26 = vpop.f32.mrf.mxu1  ;;  %v8120_v36 = vld [vmem:[#allocation6 + $0x894] ss:$8 sps:$4 sm:$0xff]   ;;  %v8115_v13 = vld [vmem:[#allocation6 + $0x9a0] ss:$8 sps:$4 sm:$0xff]   ;;  %v429_v14 = vcombine.high %v327_v11, %v327_v11  ;;  %v8118_v16 = vld [vmem:[#allocation6 + $0x890] ss:$8 sps:$4 sm:$0xff]  }
 0x17e   : > { %v4689_v24 = vpop.f32.mrf.mxu0  ;;  %4982 = vmatprep.subr.bf16.mxu0 %v8048_v15  ;;  %v8123_v15 = vld [vmem:[#allocation6 + $0x994] ss:$8 sps:$4 sm:$0xff]   ;;  %v8126_v18 = vld [vmem:[#allocation6 + $0x884] ss:$8 sps:$4 sm:$0xff]   ;;  %v8121_v19 = vld [vmem:[#allocation6 + $0x990] ss:$8 sps:$4 sm:$0xff]  }
 0x17f   : > { %5022 = vmatpush1.bf16.msra.mxu1 %v8043_v17  ;;  %v4730_v29 = vpop.f32.mrf.mxu1  ;;  %v9344_v17 = vrot.slane %v327_v11, %v9281_v48  ;;  %v8127_v24 = vld [vmem:[#allocation6 + $0x980] ss:$8 sps:$4 sm:$0xff]   ;;  %v8132_v26 = vld [vmem:[#allocation6 + $0xa74] ss:$8 sps:$4 sm:$0xff]   ;;  %v8178_v11 = vld [vmem:[#allocation6 + $0xb04] ss:$8 sps:$4 sm:$0xff]  }
 0x180   : > { %5023 = vmatprep.subr.bf16.mxu1 %v8051_v20  ;;  %v9347_v20 = vrot.slane %v429_v14, %v9281_v48  ;;  %v580_v29 = vpack.c.bf16 %v9324_v53, %v9324_v53  ;;  %v8140_v53 = vld [vmem:[#allocation6 + $0xb60] ss:$8 sps:$4 sm:$0xff]   ;;  %v8184_v14 = vld [vmem:[#allocation6 + $0xbf4] ss:$8 sps:$4 sm:$0xff]  }
 0x181   : > { %4983 = vmatpush1.bf16.msra.mxu0 %v8046_v22  ;;  %v8124_v22 = vld [vmem:[#allocation6 + $0x880] ss:$8 sps:$4 sm:$0xff]  }
 0x182   : > { %4984 = vmatprep.subr.bf16.mxu0 %v8054_v25  ;;  %v444_v25 = vcombine.high %v9344_v17, %v9344_v17 }
 0x183   : > { %5024 = vmatpush1.bf16.msra.mxu1 %v8049_v23  ;;  %v8129_v23 = vld [vmem:[#allocation6 + $0x984] ss:$8 sps:$4 sm:$0xff]  }
 0x184   : > { %5025 = vmatprep.subr.bf16.mxu1 %v8057_v28  ;;  %v445_v28 = vcombine.high %v9347_v20, %v9347_v20 }
 0x185   : > { %4985 = vmatpush1.bf16.msra.mxu0 %v8052_v27  ;;  %v8130_v27 = vld [vmem:[#allocation6 + $0xa70] ss:$8 sps:$4 sm:$0xff]  }
 0x186   : > { %4986 = vmatprep.subr.bf16.mxu0 %v8060_v31  ;;  %v8134_v31 = vld [vmem:[#allocation6 + $0xb70] ss:$8 sps:$4 sm:$0xff]  }
 0x187   : > { %5026 = vmatpush1.bf16.msra.mxu1 %v8055_v30  ;;  %v8136_v30 = vld [vmem:[#allocation6 + $0xb74] ss:$8 sps:$4 sm:$0xff]  }
 0x188   : > { %5027 = vmatprep.subr.bf16.mxu1 %v8063_v33  ;;  %v582_v33 = vpack.c.bf16 %v9327_v56, %v9327_v56 }
 0x189   : > { %4987 = vmatpush1.bf16.msra.mxu0 %v8058_v32  ;;  %v585_v32 = vpack.c.bf16 %v444_v25, %v444_v25  ;;  %v8196_v25 = vld [vmem:[#allocation6 + $0xbd4] ss:$8 sps:$4 sm:$0xff]  }
 0x18a   : > { %4988 = vmatprep.subr.bf16.mxu0 %v8066_v37  ;;  %v8137_v37 = vld [vmem:[#allocation6 + $0xa60] ss:$8 sps:$4 sm:$0xff]  }
 0x18b   : > { %5028 = vmatpush1.bf16.msra.mxu1 %v8061_v35  ;;  %v8139_v35 = vld [vmem:[#allocation6 + $0xa64] ss:$8 sps:$4 sm:$0xff]  }
 0x18c   : > { %5029 = vmatprep.subr.bf16.mxu1 %v8069_v41 }
 0x18d   : > { %4989 = vmatpush1.bf16.msra.mxu0 %v8064_v38  ;;  %v587_v38 = vpack.c.bf16 %v445_v28, %v445_v28  ;;  %v8197_v28 = vld [vmem:[#allocation6 + $0xac0] ss:$8 sps:$4 sm:$0xff]  }
 0x18e   : > { %4990 = vmatprep.subr.bf16.mxu0 %v8072_v44 }
 0x18f   : > { %5030 = vmatpush1.bf16.msra.mxu1 %v8067_v42  ;;  %v8142_v42 = vld [vmem:[#allocation6 + $0xb64] ss:$8 sps:$4 sm:$0xff]  }
 0x190   : > { %5031 = vmatprep.subr.bf16.mxu1 %v8075_v46 }
 0x191   : > { %4991 = vmatpush1.bf16.msra.mxu0 %v8070_v45 }
 0x192   : > { %4992 = vmatprep.subr.bf16.mxu0 %v8078_v49 }
 0x193   : > { %5032 = vmatpush1.bf16.msra.mxu1 %v8073_v47  ;;  %v8145_v47 = vld [vmem:[#allocation6 + $0xa54] ss:$8 sps:$4 sm:$0xff]  }
 0x194   : > { %5033 = vmatprep.subr.bf16.mxu1 %v8081_v51 }
 0x195   : > { %4993 = vmatpush1.bf16.msra.mxu0 %v8076_v50  ;;  %v8143_v50 = vld [vmem:[#allocation6 + $0xa50] ss:$8 sps:$4 sm:$0xff]  }
 0x196   : > { %4994 = vmatprep.subr.bf16.mxu0 %v8084_v54  ;;  %v8148_v54 = vld [vmem:[#allocation6 + $0xb54] ss:$8 sps:$4 sm:$0xff]  }
 0x197   : > { %5034 = vmatpush1.bf16.msra.mxu1 %v8079_v52 }
 0x198   : > { %5035 = vmatprep.subr.bf16.mxu1 %v8087_v57 }
 0x199   : > { %4995 = vmatpush2.bf16.msra.mxu0 %v8082_v55  ;;  %v8146_v55 = vld [vmem:[#allocation6 + $0xb50] ss:$8 sps:$4 sm:$0xff]  }
 0x19a   : > { %4996 = vmatprep.subr.bf16.mxu0 %v8090_v34 }
 0x19b   : > { %5036 = vmatpush2.bf16.msra.mxu1 %v8085_v58  ;;  %v8151_v58 = vld [vmem:[#allocation6 + $0xa44] ss:$8 sps:$4 sm:$0xff]  }
 0x19c   : > { %5037 = vmatprep.subr.bf16.mxu1 %v8093_v60 }
 0x19d   : > { %4997 = vmatpush2.bf16.msra.mxu0 %v8088_v59  ;;  %v8149_v59 = vld [vmem:[#allocation6 + $0xa40] ss:$8 sps:$4 sm:$0xff]  }
 0x19e   : > { %4998 = vmatprep.subr.bf16.mxu0 %v8096_v61  ;;  %v8157_v61 = vld [vmem:[#allocation6 + $0xa34] ss:$8 sps:$4 sm:$0xff]  }
 0x19f   : > { %5038 = vmatpush2.bf16.msra.mxu1 %v8091_v39  ;;  %v8152_v39 = vld [vmem:[#allocation6 + $0xb40] ss:$8 sps:$4 sm:$0xff]  }
 0x1a0   : > { %5039 = vmatprep.subr.bf16.mxu1 %v8099_v63  ;;  %v8160_v63 = vld [vmem:[#allocation6 + $0xb34] ss:$8 sps:$4 sm:$0xff]  }
 0x1a1   : > { %4999 = vmatpush2.bf16.msra.mxu0 %v8094_v62  ;;  %v8155_v62 = vld [vmem:[#allocation6 + $0xa30] ss:$8 sps:$4 sm:$0xff]  }
 0x1a2   : > { %5000 = vmatprep.subr.bf16.mxu0 %v8102_v1  ;;  %v8163_v1 = vld [vmem:[#allocation6 + $0xa24] ss:$8 sps:$4 sm:$0xff]  }
 0x1a3   : > { %5040 = vmatpush2.bf16.msra.mxu1 %v8097_v0  ;;  %v8158_v0 = vld [vmem:[#allocation6 + $0xb30] ss:$8 sps:$4 sm:$0xff]  }
 0x1a4   : > { %5041 = vmatprep.subr.bf16.mxu1 %v8105_v3  ;;  %v8166_v3 = vld [vmem:[#allocation6 + $0xb24] ss:$8 sps:$4 sm:$0xff]  }
 0x1a5   : > { %5001 = vmatpush2.bf16.msra.mxu0 %v8100_v2  ;;  %v8161_v2 = vld [vmem:[#allocation6 + $0xa20] ss:$8 sps:$4 sm:$0xff]  }
 0x1a6   : > { %5002 = vmatprep.subr.bf16.mxu0 %v8108_v5  ;;  %v8169_v5 = vld [vmem:[#allocation6 + $0xa14] ss:$8 sps:$4 sm:$0xff]  }
 0x1a7   : > { %5042 = vmatpush2.bf16.msra.mxu1 %v8103_v4  ;;  %v8164_v4 = vld [vmem:[#allocation6 + $0xb20] ss:$8 sps:$4 sm:$0xff]  }
 0x1a8   : > { %5043 = vmatprep.subr.bf16.mxu1 %v8111_v7  ;;  %v8172_v7 = vld [vmem:[#allocation6 + $0xb14] ss:$8 sps:$4 sm:$0xff]  }
 0x1a9   : > { %5003 = vmatpush2.bf16.msra.mxu0 %v8106_v6  ;;  %v8167_v6 = vld [vmem:[#allocation6 + $0xa10] ss:$8 sps:$4 sm:$0xff]  }
 0x1aa   : > { %5004 = vmatprep.subr.bf16.mxu0 %v8114_v9  ;;  %v8175_v9 = vld [vmem:[#allocation6 + $0xa04] ss:$8 sps:$4 sm:$0xff]  }
 0x1ab   : > { %5044 = vmatpush2.bf16.msra.mxu1 %v8109_v8  ;;  %v8170_v8 = vld [vmem:[#allocation6 + $0xb10] ss:$8 sps:$4 sm:$0xff]  }
 0x1ac   : > { %5045 = vmatprep.subr.bf16.mxu1 %v8117_v10  ;;  %v8173_v10 = vld [vmem:[#allocation6 + $0xa00] ss:$8 sps:$4 sm:$0xff]  }
 0x1ad   : > { %5005 = vmatpush2.bf16.msra.mxu0 %v8112_v12  ;;  %v8176_v12 = vld [vmem:[#allocation6 + $0xb00] ss:$8 sps:$4 sm:$0xff]  }
 0x1ae   : > { %5006 = vmatprep.subr.bf16.mxu0 %v8120_v36  ;;  %v8181_v36 = vld [vmem:[#allocation6 + $0xaf4] ss:$8 sps:$4 sm:$0xff]  }
 0x1af   : > { %5046 = vmatpush2.bf16.msra.mxu1 %v8115_v13  ;;  %v8179_v13 = vld [vmem:[#allocation6 + $0xaf0] ss:$8 sps:$4 sm:$0xff]  }
 0x1b0   : > { %5047 = vmatprep.subr.bf16.mxu1 %v8123_v15  ;;  %v8182_v15 = vld [vmem:[#allocation6 + $0xbf0] ss:$8 sps:$4 sm:$0xff]  }
 0x1b1   : > { %5007 = vmatpush2.bf16.msra.mxu0 %v8118_v16  ;;  %v8187_v16 = vld [vmem:[#allocation6 + $0xae4] ss:$8 sps:$4 sm:$0xff]  }
 0x1b2   : > { %5008 = vmatprep.subr.bf16.mxu0 %v8126_v18  ;;  %v8185_v18 = vld [vmem:[#allocation6 + $0xae0] ss:$8 sps:$4 sm:$0xff]  }
 0x1b3   : > { %5048 = vmatpush2.bf16.msra.mxu1 %v8121_v19  ;;  %v8190_v19 = vld [vmem:[#allocation6 + $0xbe4] ss:$8 sps:$4 sm:$0xff]  }
 0x1b4   : > { %5049 = vmatprep.subr.bf16.mxu1 %v8129_v23  ;;  %v8193_v23 = vld [vmem:[#allocation6 + $0xad4] ss:$8 sps:$4 sm:$0xff]  }
 0x1b5   : > { %5009 = vmatpush2.bf16.msra.mxu0 %v8124_v22  ;;  %v8188_v22 = vld [vmem:[#allocation6 + $0xbe0] ss:$8 sps:$4 sm:$0xff]  }
 0x1b6   : > { %5060 = vmatprep.subr.bf16.mxu0 %v8132_v26  ;;  %v8194_v26 = vld [vmem:[#allocation6 + $0xbd0] ss:$8 sps:$4 sm:$0xff]  }
 0x1b7   : > { %5050 = vmatpush2.bf16.msra.mxu1 %v8127_v24  ;;  %v8191_v24 = vld [vmem:[#allocation6 + $0xad0] ss:$8 sps:$4 sm:$0xff]  }
 0x1b8   : > { %v4766_v41 = vpop.f32.mrf.mxu0  ;;  %5011 = vmatmul.mubr.bf16.vlgmr.msra.gmra.mxu0 %v580_v29  ;;  %5101 = vmatprep.subr.bf16.mxu1 %v8136_v30  ;;  %v8202_v29 = vld [vmem:[#allocation6 + $0xbc4] ss:$8 sps:$4 sm:$0xff]   ;;  %v8200_v30 = vld [vmem:[#allocation6 + $0xbc0] ss:$8 sps:$4 sm:$0xff]  }
 0x1b9   : > { %v4767_v44 = vadd.f32 %v4766_v41, %v9339_v40  ;;  %5061 = vmatpush1.bf16.msra.mxu0 %v8130_v27  ;;  %5092 = vmatprep.mubr.bf16.mxu0 %v585_v32  ;;  %v4807_v46 = vpop.f32.mrf.mxu1  ;;  %v8199_v27 = vld [vmem:[#allocation6 + $0xac4] ss:$8 sps:$4 sm:$0xff]   ;;  %v8203_v32 = vld [vmem:[#allocation6 + $0xab0] ss:$8 sps:$4 sm:$0xff]   ;;  %v328_v41 = vld [vmem:[#allocation3 + $0x30] sm:$0xff] }
 0x1ba   : > { %v4768_v45 = vpop.f32.mrf.mxu0  ;;  %5052 = vmatmul.mubr.bf16.vlgmr.msra.gmra.mxu1 %v582_v33  ;;  %5062 = vmatprep.subr.bf16.mxu0 %v8139_v35  ;;  %v8208_v33 = vld [vmem:[#allocation6 + $0xbb4] ss:$8 sps:$4 sm:$0xff]   ;;  %v8206_v35 = vld [vmem:[#allocation6 + $0xbb0] ss:$8 sps:$4 sm:$0xff]  }
 0x1bb   : > { %v4769_v56 = vadd.f32 %v4768_v45, %v9341_v21  ;;  %v9359_v49 = vadd.f32 %v4807_v46, %v4767_v44  ;;  %5102 = vmatpush1.bf16.msra.mxu1 %v8134_v31  ;;  %5133 = vmatprep.mubr.bf16.mxu1 %v587_v38  ;;  %v4809_v52 = vpop.f32.mrf.mxu1  ;;  %v8154_v21 = vld [vmem:[#allocation6 + $0xb44] ss:$8 sps:$4 sm:$0xff]   ;;  %v8205_v31 = vld [vmem:[#allocation6 + $0xab4] ss:$8 sps:$4 sm:$0xff]   ;;  %v446_v45 = vcombine.high %v328_v41, %v328_v41 }
 0x1bc   : > { %v4770_v51 = vpop.f32.mrf.mxu0  ;;  %5103 = vmatprep.subr.bf16.mxu1 %v8142_v42  ;;  %v8214_v38 = vld [vmem:[#allocation6 + $0xba4] ss:$8 sps:$4 sm:$0xff]   ;;  %v8209_v42 = vld [vmem:[#allocation6 + $0xaa0] ss:$8 sps:$4 sm:$0xff]   ;;  %v8217_v44 = vld [vmem:[#allocation6 + $0xa94] ss:$8 sps:$4 sm:$0xff]  }
 0x1bd   : > { %v9361_v40 = vadd.f32 %v4809_v52, %v4769_v56  ;;  %5063 = vmatpush1.bf16.msra.mxu0 %v8137_v37  ;;  %v4811_v34 = vpop.f32.mrf.mxu1  ;;  %v8211_v37 = vld [vmem:[#allocation6 + $0xaa4] ss:$8 sps:$4 sm:$0xff]   ;;  %v8220_v46 = vld [vmem:[#allocation6 + $0xb94] ss:$8 sps:$4 sm:$0xff]   ;;  %v9364_v56 = vrot.slane %v328_v41, %v9281_v48  ;;  %v8218_v51 = vld [vmem:[#allocation6 + $0xb90] ss:$8 sps:$4 sm:$0xff]   ;;  %v9367_v52 = vrot.slane %v446_v45, %v9281_v48 }
 0x1be   : > { %v4771_v57 = vpop.f32.mrf.mxu0  ;;  %5064 = vmatprep.subr.bf16.mxu0 %v8145_v47  ;;  %v8215_v47 = vld [vmem:[#allocation6 + $0xa90] ss:$8 sps:$4 sm:$0xff]   ;;  %v8224_v34 = vld [vmem:[#allocation6 + $0xb80] ss:$8 sps:$4 sm:$0xff]  }
 0x1bf   : > { %5104 = vmatpush1.bf16.msra.mxu1 %v8140_v53  ;;  %v4812_v60 = vpop.f32.mrf.mxu1  ;;  %v8212_v53 = vld [vmem:[#allocation6 + $0xba0] ss:$8 sps:$4 sm:$0xff]   ;;  %v461_v57 = vcombine.high %v9364_v56, %v9364_v56  ;;  %v8276_v45 = vld [vmem:[#allocation6 + $0xcf0] ss:$8 sps:$4 sm:$0xff]  }
 0x1c0   : > { %5105 = vmatprep.subr.bf16.mxu1 %v8148_v54  ;;  %v8226_v54 = vld [vmem:[#allocation6 + $0xb84] ss:$8 sps:$4 sm:$0xff]   ;;  %v8233_v60 = vld [vmem:[#allocation6 + $0xd74] ss:$8 sps:$4 sm:$0xff]   ;;  %v8270_v41 = vld [vmem:[#allocation6 + $0xc00] ss:$8 sps:$4 sm:$0xff]  }
 0x1c1   : > { %5065 = vmatpush1.bf16.msra.mxu0 %v8143_v50  ;;  %v8223_v50 = vld [vmem:[#allocation6 + $0xa84] ss:$8 sps:$4 sm:$0xff]  }
 0x1c2   : > { %5066 = vmatprep.subr.bf16.mxu0 %v8151_v58  ;;  %v8229_v58 = vld [vmem:[#allocation6 + $0xc74] ss:$8 sps:$4 sm:$0xff]  }
 0x1c3   : > { %5106 = vmatpush1.bf16.msra.mxu1 %v8146_v55  ;;  %v8221_v55 = vld [vmem:[#allocation6 + $0xa80] ss:$8 sps:$4 sm:$0xff]  }
 0x1c4   : > { %5107 = vmatprep.subr.bf16.mxu1 %v8154_v21  ;;  %v584_v21 = vpack.c.bf16 %v9344_v17, %v9344_v17  ;;  %v8234_v17 = vld [vmem:[#allocation6 + $0xc60] ss:$8 sps:$4 sm:$0xff]  }
 0x1c5   : > { %5067 = vmatpush1.bf16.msra.mxu0 %v8149_v59  ;;  %v462_v59 = vcombine.high %v9367_v52, %v9367_v52 }
 0x1c6   : > { %5068 = vmatprep.subr.bf16.mxu0 %v8157_v61  ;;  %v589_v61 = vpack.c.bf16 %v461_v57, %v461_v57  ;;  %v8293_v57 = vld [vmem:[#allocation6 + $0xdd4] ss:$8 sps:$4 sm:$0xff]  }
 0x1c7   : > { %5108 = vmatpush1.bf16.msra.mxu1 %v8152_v39  ;;  %v8227_v39 = vld [vmem:[#allocation6 + $0xc70] ss:$8 sps:$4 sm:$0xff]  }
 0x1c8   : > { %5109 = vmatprep.subr.bf16.mxu1 %v8160_v63  ;;  %v8236_v63 = vld [vmem:[#allocation6 + $0xc64] ss:$8 sps:$4 sm:$0xff]  }
 0x1c9   : > { %5069 = vmatpush1.bf16.msra.mxu0 %v8155_v62  ;;  %v586_v62 = vpack.c.bf16 %v9347_v20, %v9347_v20 }
 0x1ca   : > { %5070 = vmatprep.subr.bf16.mxu0 %v8163_v1  ;;  %v591_v1 = vpack.c.bf16 %v462_v59, %v462_v59  ;;  %v8291_v59 = vld [vmem:[#allocation6 + $0xdd0] ss:$8 sps:$4 sm:$0xff]  }
 0x1cb   : > { %5110 = vmatpush1.bf16.msra.mxu1 %v8158_v0  ;;  %v8231_v0 = vld [vmem:[#allocation6 + $0xd70] ss:$8 sps:$4 sm:$0xff]  }
 0x1cc   : > { %5111 = vmatprep.subr.bf16.mxu1 %v8166_v3  ;;  %v8239_v3 = vld [vmem:[#allocation6 + $0xd64] ss:$8 sps:$4 sm:$0xff]  }
 0x1cd   : > { %5071 = vmatpush1.bf16.msra.mxu0 %v8161_v2 }
 0x1ce   : > { %5072 = vmatprep.subr.bf16.mxu0 %v8169_v5 }
 0x1cf   : > { %5112 = vmatpush1.bf16.msra.mxu1 %v8164_v4 }
 0x1d0   : > { %5113 = vmatprep.subr.bf16.mxu1 %v8172_v7  ;;  %v8242_v7 = vld [vmem:[#allocation6 + $0xc54] ss:$8 sps:$4 sm:$0xff]  }
 0x1d1   : > { %5073 = vmatpush1.bf16.msra.mxu0 %v8167_v6 }
 0x1d2   : > { %5074 = vmatprep.subr.bf16.mxu0 %v8175_v9  ;;  %v8237_v9 = vld [vmem:[#allocation6 + $0xd60] ss:$8 sps:$4 sm:$0xff]  }
 0x1d3   : > { %5114 = vmatpush1.bf16.msra.mxu1 %v8170_v8 }
 0x1d4   : > { %5115 = vmatprep.subr.bf16.mxu1 %v8178_v11 }
 0x1d5   : > { %5075 = vmatpush1.bf16.msra.mxu0 %v8173_v10 }
 0x1d6   : > { %5076 = vmatprep.subr.bf16.mxu0 %v8181_v36  ;;  %v8240_v36 = vld [vmem:[#allocation6 + $0xc50] ss:$8 sps:$4 sm:$0xff]  }
 0x1d7   : > { %5116 = vmatpush1.bf16.msra.mxu1 %v8176_v12  ;;  %v8245_v12 = vld [vmem:[#allocation6 + $0xd54] ss:$8 sps:$4 sm:$0xff]  }
 0x1d8   : > { %5117 = vmatprep.subr.bf16.mxu1 %v8184_v14  ;;  %v8248_v14 = vld [vmem:[#allocation6 + $0xc44] ss:$8 sps:$4 sm:$0xff]  }
 0x1d9   : > { %5077 = vmatpush2.bf16.msra.mxu0 %v8179_v13 }
 0x1da   : > { %5078 = vmatprep.subr.bf16.mxu0 %v8187_v16  ;;  %v8243_v16 = vld [vmem:[#allocation6 + $0xd50] ss:$8 sps:$4 sm:$0xff]  }
 0x1db   : > { %5118 = vmatpush2.bf16.msra.mxu1 %v8182_v15 }
 0x1dc   : > { %5119 = vmatprep.subr.bf16.mxu1 %v8190_v19  ;;  %v8246_v19 = vld [vmem:[#allocation6 + $0xc40] ss:$8 sps:$4 sm:$0xff]  }
 0x1dd   : > { %5079 = vmatpush2.bf16.msra.mxu0 %v8185_v18 }
 0x1de   : > { %5080 = vmatprep.subr.bf16.mxu0 %v8193_v23  ;;  %v8249_v23 = vld [vmem:[#allocation6 + $0xd40] ss:$8 sps:$4 sm:$0xff]  }
 0x1df   : > { %5120 = vmatpush2.bf16.msra.mxu1 %v8188_v22  ;;  %v8254_v22 = vld [vmem:[#allocation6 + $0xc34] ss:$8 sps:$4 sm:$0xff]  }
 0x1e0   : > { %5121 = vmatprep.subr.bf16.mxu1 %v8196_v25  ;;  %v8252_v25 = vld [vmem:[#allocation6 + $0xc30] ss:$8 sps:$4 sm:$0xff]  }
 0x1e1   : > { %5081 = vmatpush2.bf16.msra.mxu0 %v8191_v24  ;;  %v8257_v24 = vld [vmem:[#allocation6 + $0xd34] ss:$8 sps:$4 sm:$0xff]  }
 0x1e2   : > { %5082 = vmatprep.subr.bf16.mxu0 %v8199_v27  ;;  %v8255_v27 = vld [vmem:[#allocation6 + $0xd30] ss:$8 sps:$4 sm:$0xff]  }
 0x1e3   : > { %5122 = vmatpush2.bf16.msra.mxu1 %v8194_v26  ;;  %v8260_v26 = vld [vmem:[#allocation6 + $0xc24] ss:$8 sps:$4 sm:$0xff]  }
 0x1e4   : > { %5123 = vmatprep.subr.bf16.mxu1 %v8202_v29  ;;  %v8258_v29 = vld [vmem:[#allocation6 + $0xc20] ss:$8 sps:$4 sm:$0xff]  }
 0x1e5   : > { %5083 = vmatpush2.bf16.msra.mxu0 %v8197_v28  ;;  %v8263_v28 = vld [vmem:[#allocation6 + $0xd24] ss:$8 sps:$4 sm:$0xff]  }
 0x1e6   : > { %5084 = vmatprep.subr.bf16.mxu0 %v8205_v31  ;;  %v8261_v31 = vld [vmem:[#allocation6 + $0xd20] ss:$8 sps:$4 sm:$0xff]  }
 0x1e7   : > { %5124 = vmatpush2.bf16.msra.mxu1 %v8200_v30  ;;  %v8266_v30 = vld [vmem:[#allocation6 + $0xc14] ss:$8 sps:$4 sm:$0xff]  }
 0x1e8   : > { %5125 = vmatprep.subr.bf16.mxu1 %v8208_v33  ;;  %v8264_v33 = vld [vmem:[#allocation6 + $0xc10] ss:$8 sps:$4 sm:$0xff]  }
 0x1e9   : > { %5085 = vmatpush2.bf16.msra.mxu0 %v8203_v32  ;;  %v8269_v32 = vld [vmem:[#allocation6 + $0xd14] ss:$8 sps:$4 sm:$0xff]  }
 0x1ea   : > { %5086 = vmatprep.subr.bf16.mxu0 %v8211_v37  ;;  %v8267_v37 = vld [vmem:[#allocation6 + $0xd10] ss:$8 sps:$4 sm:$0xff]  }
 0x1eb   : > { %5126 = vmatpush2.bf16.msra.mxu1 %v8206_v35  ;;  %v8272_v35 = vld [vmem:[#allocation6 + $0xc04] ss:$8 sps:$4 sm:$0xff]  }
 0x1ec   : > { %5127 = vmatprep.subr.bf16.mxu1 %v8214_v38  ;;  %v8275_v38 = vld [vmem:[#allocation6 + $0xd04] ss:$8 sps:$4 sm:$0xff]  }
 0x1ed   : > { %5087 = vmatpush2.bf16.msra.mxu0 %v8209_v42  ;;  %v8278_v42 = vld [vmem:[#allocation6 + $0xcf4] ss:$8 sps:$4 sm:$0xff]  }
 0x1ee   : > { %5088 = vmatprep.subr.bf16.mxu0 %v8217_v44  ;;  %v8273_v44 = vld [vmem:[#allocation6 + $0xd00] ss:$8 sps:$4 sm:$0xff]  }
 0x1ef   : > { %5128 = vmatpush2.bf16.msra.mxu1 %v8212_v53  ;;  %v8281_v53 = vld [vmem:[#allocation6 + $0xdf4] ss:$8 sps:$4 sm:$0xff]  }
 0x1f0   : > { %5129 = vmatprep.subr.bf16.mxu1 %v8220_v46  ;;  %v8284_v46 = vld [vmem:[#allocation6 + $0xce4] ss:$8 sps:$4 sm:$0xff]  }
 0x1f1   : > { %5089 = vmatpush2.bf16.msra.mxu0 %v8215_v47  ;;  %v8279_v47 = vld [vmem:[#allocation6 + $0xdf0] ss:$8 sps:$4 sm:$0xff]  }
 0x1f2   : > { %5090 = vmatprep.subr.bf16.mxu0 %v8223_v50  ;;  %v8287_v50 = vld [vmem:[#allocation6 + $0xde4] ss:$8 sps:$4 sm:$0xff]  }
 0x1f3   : > { %5130 = vmatpush2.bf16.msra.mxu1 %v8218_v51  ;;  %v8282_v51 = vld [vmem:[#allocation6 + $0xce0] ss:$8 sps:$4 sm:$0xff]  }
 0x1f4   : > { %5131 = vmatprep.subr.bf16.mxu1 %v8226_v54  ;;  %v8290_v54 = vld [vmem:[#allocation6 + $0xcd4] ss:$8 sps:$4 sm:$0xff]  }
 0x1f5   : > { %5091 = vmatpush2.bf16.msra.mxu0 %v8221_v55  ;;  %v8285_v55 = vld [vmem:[#allocation6 + $0xde0] ss:$8 sps:$4 sm:$0xff]  }
 0x1f6   : > { %5142 = vmatprep.subr.bf16.mxu0 %v8229_v58  ;;  %v8288_v58 = vld [vmem:[#allocation6 + $0xcd0] ss:$8 sps:$4 sm:$0xff]  }
 0x1f7   : > { %5132 = vmatpush2.bf16.msra.mxu1 %v8224_v34  ;;  %v8296_v34 = vld [vmem:[#allocation6 + $0xcc4] ss:$8 sps:$4 sm:$0xff]  }
 0x1f8   : > { %v4848_v2 = vpop.f32.mrf.mxu0  ;;  %5093 = vmatmul.mubr.bf16.vlgmr.msra.gmra.mxu0 %v584_v21  ;;  %5183 = vmatprep.subr.bf16.mxu1 %v8233_v60  ;;  %v8299_v21 = vld [vmem:[#allocation6 + $0xdc4] ss:$8 sps:$4 sm:$0xff]   ;;  %v8294_v60 = vld [vmem:[#allocation6 + $0xcc0] ss:$8 sps:$4 sm:$0xff]  }
 0x1f9   : > { %v4849_v4 = vadd.f32 %v4848_v2, %v9359_v49  ;;  %5143 = vmatpush1.bf16.msra.mxu0 %v8227_v39  ;;  %5174 = vmatprep.mubr.bf16.mxu0 %v589_v61  ;;  %v8302_v39 = vld [vmem:[#allocation6 + $0xcb4] ss:$8 sps:$4 sm:$0xff]   ;;  %v8297_v61 = vld [vmem:[#allocation6 + $0xdc0] ss:$8 sps:$4 sm:$0xff]   ;;  %v8311_v2 = vld [vmem:[#allocation6 + $0xda4] ss:$8 sps:$4 sm:$0xff]  }
 0x1fa   : > { %v4850_v5 = vpop.f32.mrf.mxu0  ;;  %v4889_v6 = vpop.f32.mrf.mxu1  ;;  %5134 = vmatmul.mubr.bf16.vlgmr.msra.gmra.mxu1 %v586_v62  ;;  %5144 = vmatprep.subr.bf16.mxu0 %v8236_v63  ;;  %v8305_v62 = vld [vmem:[#allocation6 + $0xdb4] ss:$8 sps:$4 sm:$0xff]   ;;  %v8300_v63 = vld [vmem:[#allocation6 + $0xcb0] ss:$8 sps:$4 sm:$0xff]  }
 0x1fb   : > { %v4851_v20 = vadd.f32 %v4850_v5, %v9361_v40  ;;  %v9379_v8 = vadd.f32 %v4889_v6, %v4849_v4  ;;  %5184 = vmatpush1.bf16.msra.mxu1 %v8231_v0  ;;  %5215 = vmatprep.mubr.bf16.mxu1 %v591_v1  ;;  %v8251_v40 = vld [vmem:[#allocation6 + $0xd44] ss:$8 sps:$4 sm:$0xff]   ;;  %v8303_v1 = vld [vmem:[#allocation6 + $0xdb0] ss:$8 sps:$4 sm:$0xff]   ;;  %v8306_v4 = vld [vmem:[#allocation6 + $0xca0] ss:$8 sps:$4 sm:$0xff]  }
 0x1fc   : > { %v4852_v10 = vpop.f32.mrf.mxu0  ;;  %v4891_v11 = vpop.f32.mrf.mxu1  ;;  %5185 = vmatprep.subr.bf16.mxu1 %v8239_v3  ;;  %v8308_v0 = vld [vmem:[#allocation6 + $0xca4] ss:$8 sps:$4 sm:$0xff]   ;;  %v8309_v5 = vld [vmem:[#allocation6 + $0xda0] ss:$8 sps:$4 sm:$0xff]  }
 0x1fd   : > { %v9381_v49 = vadd.f32 %v4891_v11, %v4851_v20  ;;  %5145 = vmatpush1.bf16.msra.mxu0 %v8234_v17  ;;  %v329_v3 = vld [vmem:[#allocation3 + $0x38] sm:$0xff]  ;;  %v8314_v17 = vld [vmem:[#allocation6 + $0xc94] ss:$8 sps:$4 sm:$0xff]   ;;  %v8312_v20 = vld [vmem:[#allocation6 + $0xc90] ss:$8 sps:$4 sm:$0xff]  }
 0x1fe   : > { %v4853_v13 = vpop.f32.mrf.mxu0  ;;  %5146 = vmatprep.subr.bf16.mxu0 %v8242_v7  ;;  %v4893_v15 = vpop.f32.mrf.mxu1  ;;  %v463_v6 = vcombine.high %v329_v3, %v329_v3  ;;  %v8317_v7 = vld [vmem:[#allocation6 + $0xd94] ss:$8 sps:$4 sm:$0xff]   ;;  %v8320_v10 = vld [vmem:[#allocation6 + $0xc84] ss:$8 sps:$4 sm:$0xff]   ;;  %v8315_v11 = vld [vmem:[#allocation6 + $0xd90] ss:$8 sps:$4 sm:$0xff]  }
 0x1ff   : > { %5186 = vmatpush1.bf16.msra.mxu1 %v8237_v9  ;;  %v9384_v9 = vrot.slane %v329_v3, %v9281_v48  ;;  %v8318_v13 = vld [vmem:[#allocation6 + $0xc80] ss:$8 sps:$4 sm:$0xff]   ;;  %v8326_v15 = vld [vmem:[#allocation6 + $0xe74] ss:$8 sps:$4 sm:$0xff]  }
 0x200   : > { %5187 = vmatprep.subr.bf16.mxu1 %v8245_v12  ;;  %v4894_v18 = vpop.f32.mrf.mxu1  ;;  %v9387_v12 = vrot.slane %v463_v6, %v9281_v48  ;;  %v8367_v3 = vld [vmem:[#allocation6 + $0xe00] ss:$8 sps:$4 sm:$0xff]   ;;  %v8373_v6 = vld [vmem:[#allocation6 + $0xef0] ss:$8 sps:$4 sm:$0xff]  }
 0x201   : > { %5147 = vmatpush1.bf16.msra.mxu0 %v8240_v36  ;;  %v8323_v36 = vld [vmem:[#allocation6 + $0xd84] ss:$8 sps:$4 sm:$0xff]   ;;  %v588_v18 = vpack.c.bf16 %v9364_v56, %v9364_v56  ;;  %v8331_v56 = vld [vmem:[#allocation6 + $0xe60] ss:$8 sps:$4 sm:$0xff]  }
 0x202   : > { %5148 = vmatprep.subr.bf16.mxu0 %v8248_v14  ;;  %v478_v14 = vcombine.high %v9384_v9, %v9384_v9 }
 0x203   : > { %5188 = vmatpush1.bf16.msra.mxu1 %v8243_v16  ;;  %v8321_v16 = vld [vmem:[#allocation6 + $0xd80] ss:$8 sps:$4 sm:$0xff]  }
 0x204   : > { %5189 = vmatprep.subr.bf16.mxu1 %v8251_v40  ;;  %v479_v40 = vcombine.high %v9387_v12, %v9387_v12 }
 0x205   : > { %5149 = vmatpush1.bf16.msra.mxu0 %v8246_v19  ;;  %v8330_v19 = vld [vmem:[#allocation6 + $0xf74] ss:$8 sps:$4 sm:$0xff]  }
 0x206   : > { %5150 = vmatprep.subr.bf16.mxu0 %v8254_v22  ;;  %v8324_v22 = vld [vmem:[#allocation6 + $0xe70] ss:$8 sps:$4 sm:$0xff]  }
 0x207   : > { %5190 = vmatpush1.bf16.msra.mxu1 %v8249_v23  ;;  %v593_v23 = vpack.c.bf16 %v478_v14, %v478_v14  ;;  %v8390_v14 = vld [vmem:[#allocation6 + $0xfd4] ss:$8 sps:$4 sm:$0xff]  }
 0x208   : > { %5191 = vmatprep.subr.bf16.mxu1 %v8257_v24  ;;  %v590_v24 = vpack.c.bf16 %v9367_v52, %v9367_v52 }
 0x209   : > { %5151 = vmatpush1.bf16.msra.mxu0 %v8252_v25  ;;  %v8333_v25 = vld [vmem:[#allocation6 + $0xe64] ss:$8 sps:$4 sm:$0xff]  }
 0x20a   : > { %5152 = vmatprep.subr.bf16.mxu0 %v8260_v26  ;;  %v8328_v26 = vld [vmem:[#allocation6 + $0xf70] ss:$8 sps:$4 sm:$0xff]  }
 0x20b   : > { %5192 = vmatpush1.bf16.msra.mxu1 %v8255_v27  ;;  %v595_v27 = vpack.c.bf16 %v479_v40, %v479_v40  ;;  %v8388_v40 = vld [vmem:[#allocation6 + $0xfd0] ss:$8 sps:$4 sm:$0xff]  }
 0x20c   : > { %5193 = vmatprep.subr.bf16.mxu1 %v8263_v28 }
 0x20d   : > { %5153 = vmatpush1.bf16.msra.mxu0 %v8258_v29  ;;  %v8336_v29 = vld [vmem:[#allocation6 + $0xf64] ss:$8 sps:$4 sm:$0xff]  }
 0x20e   : > { %5154 = vmatprep.subr.bf16.mxu0 %v8266_v30 }
 0x20f   : > { %5194 = vmatpush1.bf16.msra.mxu1 %v8261_v31 }
 0x210   : > { %5195 = vmatprep.subr.bf16.mxu1 %v8269_v32 }
 0x211   : > { %5155 = vmatpush1.bf16.msra.mxu0 %v8264_v33  ;;  %v8339_v33 = vld [vmem:[#allocation6 + $0xe54] ss:$8 sps:$4 sm:$0xff]  }
 0x212   : > { %5156 = vmatprep.subr.bf16.mxu0 %v8272_v35 }
 0x213   : > { %5196 = vmatpush1.bf16.msra.mxu1 %v8267_v37  ;;  %v8334_v37 = vld [vmem:[#allocation6 + $0xf60] ss:$8 sps:$4 sm:$0xff]  }
 0x214   : > { %5197 = vmatprep.subr.bf16.mxu1 %v8275_v38 }
 0x215   : > { %5157 = vmatpush1.bf16.msra.mxu0 %v8270_v41 }
 0x216   : > { %5158 = vmatprep.subr.bf16.mxu0 %v8278_v42  ;;  %v8342_v42 = vld [vmem:[#allocation6 + $0xf54] ss:$8 sps:$4 sm:$0xff]  }
 0x217   : > { %5198 = vmatpush1.bf16.msra.mxu1 %v8273_v44  ;;  %v8337_v44 = vld [vmem:[#allocation6 + $0xe50] ss:$8 sps:$4 sm:$0xff]  }
 0x218   : > { %5199 = vmatprep.subr.bf16.mxu1 %v8281_v53 }
 0x219   : > { %5159 = vmatpush2.bf16.msra.mxu0 %v8276_v45  ;;  %v8345_v45 = vld [vmem:[#allocation6 + $0xe44] ss:$8 sps:$4 sm:$0xff]  }
 0x21a   : > { %5160 = vmatprep.subr.bf16.mxu0 %v8284_v46 }
 0x21b   : > { %5200 = vmatpush2.bf16.msra.mxu1 %v8279_v47  ;;  %v8340_v47 = vld [vmem:[#allocation6 + $0xf50] ss:$8 sps:$4 sm:$0xff]  }
 0x21c   : > { %5201 = vmatprep.subr.bf16.mxu1 %v8287_v50 }
 0x21d   : > { %5161 = vmatpush2.bf16.msra.mxu0 %v8282_v51  ;;  %v8343_v51 = vld [vmem:[#allocation6 + $0xe40] ss:$8 sps:$4 sm:$0xff]  }
 0x21e   : > { %5162 = vmatprep.subr.bf16.mxu0 %v8290_v54  ;;  %v8351_v54 = vld [vmem:[#allocation6 + $0xe34] ss:$8 sps:$4 sm:$0xff]  }
 0x21f   : > { %5202 = vmatpush2.bf16.msra.mxu1 %v8285_v55  ;;  %v8346_v55 = vld [vmem:[#allocation6 + $0xf40] ss:$8 sps:$4 sm:$0xff]  }
 0x220   : > { %5203 = vmatprep.subr.bf16.mxu1 %v8293_v57  ;;  %v8354_v57 = vld [vmem:[#allocation6 + $0xf34] ss:$8 sps:$4 sm:$0xff]  }
 0x221   : > { %5163 = vmatpush2.bf16.msra.mxu0 %v8288_v58  ;;  %v8349_v58 = vld [vmem:[#allocation6 + $0xe30] ss:$8 sps:$4 sm:$0xff]  }
 0x222   : > { %5164 = vmatprep.subr.bf16.mxu0 %v8296_v34  ;;  %v8357_v34 = vld [vmem:[#allocation6 + $0xe24] ss:$8 sps:$4 sm:$0xff]  }
 0x223   : > { %5204 = vmatpush2.bf16.msra.mxu1 %v8291_v59  ;;  %v8352_v59 = vld [vmem:[#allocation6 + $0xf30] ss:$8 sps:$4 sm:$0xff]  }
 0x224   : > { %5205 = vmatprep.subr.bf16.mxu1 %v8299_v21  ;;  %v8360_v21 = vld [vmem:[#allocation6 + $0xf24] ss:$8 sps:$4 sm:$0xff]  }
 0x225   : > { %5165 = vmatpush2.bf16.msra.mxu0 %v8294_v60  ;;  %v8355_v60 = vld [vmem:[#allocation6 + $0xe20] ss:$8 sps:$4 sm:$0xff]  }
 0x226   : > { %5166 = vmatprep.subr.bf16.mxu0 %v8302_v39  ;;  %v8363_v39 = vld [vmem:[#allocation6 + $0xe14] ss:$8 sps:$4 sm:$0xff]  }
 0x227   : > { %5206 = vmatpush2.bf16.msra.mxu1 %v8297_v61  ;;  %v8358_v61 = vld [vmem:[#allocation6 + $0xf20] ss:$8 sps:$4 sm:$0xff]  }
 0x228   : > { %5207 = vmatprep.subr.bf16.mxu1 %v8305_v62  ;;  %v8366_v62 = vld [vmem:[#allocation6 + $0xf14] ss:$8 sps:$4 sm:$0xff]  }
 0x229   : > { %5167 = vmatpush2.bf16.msra.mxu0 %v8300_v63  ;;  %v8361_v63 = vld [vmem:[#allocation6 + $0xe10] ss:$8 sps:$4 sm:$0xff]  }
 0x22a   : > { %5168 = vmatprep.subr.bf16.mxu0 %v8308_v0  ;;  %v8369_v0 = vld [vmem:[#allocation6 + $0xe04] ss:$8 sps:$4 sm:$0xff]  }
 0x22b   : > { %5208 = vmatpush2.bf16.msra.mxu1 %v8303_v1  ;;  %v8364_v1 = vld [vmem:[#allocation6 + $0xf10] ss:$8 sps:$4 sm:$0xff]  }
 0x22c   : > { %5209 = vmatprep.subr.bf16.mxu1 %v8311_v2  ;;  %v8372_v2 = vld [vmem:[#allocation6 + $0xf04] ss:$8 sps:$4 sm:$0xff]  }
 0x22d   : > { %5169 = vmatpush2.bf16.msra.mxu0 %v8306_v4  ;;  %v8375_v4 = vld [vmem:[#allocation6 + $0xef4] ss:$8 sps:$4 sm:$0xff]  }
 0x22e   : > { %5170 = vmatprep.subr.bf16.mxu0 %v8314_v17  ;;  %v8370_v17 = vld [vmem:[#allocation6 + $0xf00] ss:$8 sps:$4 sm:$0xff]  }
 0x22f   : > { %5210 = vmatpush2.bf16.msra.mxu1 %v8309_v5  ;;  %v8378_v5 = vld [vmem:[#allocation6 + $0xff4] ss:$8 sps:$4 sm:$0xff]  }
 0x230   : > { %5211 = vmatprep.subr.bf16.mxu1 %v8317_v7  ;;  %v8381_v7 = vld [vmem:[#allocation6 + $0xee4] ss:$8 sps:$4 sm:$0xff]  }
 0x231   : > { %5171 = vmatpush2.bf16.msra.mxu0 %v8312_v20  ;;  %v8376_v20 = vld [vmem:[#allocation6 + $0xff0] ss:$8 sps:$4 sm:$0xff]  }
 0x232   : > { %5172 = vmatprep.subr.bf16.mxu0 %v8320_v10  ;;  %v8384_v10 = vld [vmem:[#allocation6 + $0xfe4] ss:$8 sps:$4 sm:$0xff]  }
 0x233   : > { %5212 = vmatpush2.bf16.msra.mxu1 %v8315_v11  ;;  %v8379_v11 = vld [vmem:[#allocation6 + $0xee0] ss:$8 sps:$4 sm:$0xff]  }
 0x234   : > { %5213 = vmatprep.subr.bf16.mxu1 %v8323_v36  ;;  %v8387_v36 = vld [vmem:[#allocation6 + $0xed4] ss:$8 sps:$4 sm:$0xff]  }
 0x235   : > { %5173 = vmatpush2.bf16.msra.mxu0 %v8318_v13  ;;  %v8382_v13 = vld [vmem:[#allocation6 + $0xfe0] ss:$8 sps:$4 sm:$0xff]  }
 0x236   : > { %5224 = vmatprep.subr.bf16.mxu0 %v8326_v15  ;;  %v8385_v15 = vld [vmem:[#allocation6 + $0xed0] ss:$8 sps:$4 sm:$0xff]  }
 0x237   : > { %5214 = vmatpush2.bf16.msra.mxu1 %v8321_v16  ;;  %v8393_v16 = vld [vmem:[#allocation6 + $0xec4] ss:$8 sps:$4 sm:$0xff]  }
 0x238   : > { %v4930_v28 = vpop.f32.mrf.mxu0  ;;  %5175 = vmatmul.mubr.bf16.vlgmr.msra.gmra.mxu0 %v588_v18  ;;  %5265 = vmatprep.subr.bf16.mxu1 %v8330_v19  ;;  %v8396_v18 = vld [vmem:[#allocation6 + $0xfc4] ss:$8 sps:$4 sm:$0xff]   ;;  %v8391_v19 = vld [vmem:[#allocation6 + $0xec0] ss:$8 sps:$4 sm:$0xff]  }
 0x239   : > { %v4931_v30 = vadd.f32 %v4930_v28, %v9379_v8  ;;  %5225 = vmatpush1.bf16.msra.mxu0 %v8324_v22  ;;  %5256 = vmatprep.mubr.bf16.mxu0 %v593_v23  ;;  %v8399_v22 = vld [vmem:[#allocation6 + $0xeb4] ss:$8 sps:$4 sm:$0xff]   ;;  %v8394_v23 = vld [vmem:[#allocation6 + $0xfc0] ss:$8 sps:$4 sm:$0xff]   ;;  %v8408_v28 = vld [vmem:[#allocation6 + $0xfa4] ss:$8 sps:$4 sm:$0xff]  }
 0x23a   : > { %v4932_v31 = vpop.f32.mrf.mxu0  ;;  %v4971_v32 = vpop.f32.mrf.mxu1  ;;  %5216 = vmatmul.mubr.bf16.vlgmr.msra.gmra.mxu1 %v590_v24  ;;  %5226 = vmatprep.subr.bf16.mxu0 %v8333_v25  ;;  %v8402_v24 = vld [vmem:[#allocation6 + $0xfb4] ss:$8 sps:$4 sm:$0xff]   ;;  %v8397_v25 = vld [vmem:[#allocation6 + $0xeb0] ss:$8 sps:$4 sm:$0xff]  }
 0x23b   : > { %v4933_v52 = vadd.f32 %v4932_v31, %v9381_v49  ;;  %v9399_v35 = vadd.f32 %v4971_v32, %v4931_v30  ;;  %5266 = vmatpush1.bf16.msra.mxu1 %v8328_v26  ;;  %5297 = vmatprep.mubr.bf16.mxu1 %v595_v27  ;;  %v8348_v49 = vld [vmem:[#allocation6 + $0xf44] ss:$8 sps:$4 sm:$0xff]   ;;  %v8400_v27 = vld [vmem:[#allocation6 + $0xfb0] ss:$8 sps:$4 sm:$0xff]   ;;  %v8403_v30 = vld [vmem:[#allocation6 + $0xea0] ss:$8 sps:$4 sm:$0xff]  }
 0x23c   : > { %v4934_v38 = vpop.f32.mrf.mxu0  ;;  %v4973_v41 = vpop.f32.mrf.mxu1  ;;  %5267 = vmatprep.subr.bf16.mxu1 %v8336_v29  ;;  %v8405_v26 = vld [vmem:[#allocation6 + $0xea4] ss:$8 sps:$4 sm:$0xff]   ;;  %v8406_v31 = vld [vmem:[#allocation6 + $0xfa0] ss:$8 sps:$4 sm:$0xff]  }
 0x23d   : > { %v9401_v8 = vadd.f32 %v4973_v41, %v4933_v52  ;;  %5227 = vmatpush1.bf16.msra.mxu0 %v8331_v56  ;;  %v330_v29 = vld [vmem:[#allocation3 + $0x40] sm:$0xff]  ;;  %v8411_v56 = vld [vmem:[#allocation6 + $0xe94] ss:$8 sps:$4 sm:$0xff]  }
 0x23e   : > { %v4935_v53 = vpop.f32.mrf.mxu0  ;;  %5228 = vmatprep.subr.bf16.mxu0 %v8339_v33  ;;  %v4975_v46 = vpop.f32.mrf.mxu1  ;;  %v480_v32 = vcombine.high %v330_v29, %v330_v29  ;;  %v8414_v33 = vld [vmem:[#allocation6 + $0xf94] ss:$8 sps:$4 sm:$0xff]   ;;  %v8409_v52 = vld [vmem:[#allocation6 + $0xe90] ss:$8 sps:$4 sm:$0xff]   ;;  %v8417_v38 = vld [vmem:[#allocation6 + $0xe84] ss:$8 sps:$4 sm:$0xff]  }
 0x23f   : > { %5268 = vmatpush1.bf16.msra.mxu1 %v8334_v37  ;;  %v9404_v37 = vrot.slane %v330_v29, %v9281_v48  ;;  %v8412_v41 = vld [vmem:[#allocation6 + $0xf90] ss:$8 sps:$4 sm:$0xff]   ;;  %v8415_v53 = vld [vmem:[#allocation6 + $0xe80] ss:$8 sps:$4 sm:$0xff]   ;;  %v8423_v46 = vld [vmem:[#allocation6 + $0x1074] ss:$8 sps:$4 sm:$0xff]  }
 0x240   : > { %5269 = vmatprep.subr.bf16.mxu1 %v8342_v42  ;;  %v4976_v50 = vpop.f32.mrf.mxu1  ;;  %v9407_v42 = vrot.slane %v480_v32, %v9281_v48  ;;  %v8464_v29 = vld [vmem:[#allocation6 + $0x1000] ss:$8 sps:$4 sm:$0xff]   ;;  %v8470_v32 = vld [vmem:[#allocation6 + $0x10f0] ss:$8 sps:$4 sm:$0xff]  }
 0x241   : > { %5229 = vmatpush1.bf16.msra.mxu0 %v8337_v44  ;;  %v8420_v44 = vld [vmem:[#allocation6 + $0xf84] ss:$8 sps:$4 sm:$0xff]   ;;  %v592_v50 = vpack.c.bf16 %v9384_v9, %v9384_v9  ;;  %v8428_v9 = vld [vmem:[#allocation6 + $0x1060] ss:$8 sps:$4 sm:$0xff]  }
 0x242   : > { %5230 = vmatprep.subr.bf16.mxu0 %v8345_v45  ;;  %v495_v45 = vcombine.high %v9404_v37, %v9404_v37 }
 0x243   : > { %5270 = vmatpush1.bf16.msra.mxu1 %v8340_v47  ;;  %v8418_v47 = vld [vmem:[#allocation6 + $0xf80] ss:$8 sps:$4 sm:$0xff]  }
 0x244   : > { %5271 = vmatprep.subr.bf16.mxu1 %v8348_v49  ;;  %v496_v49 = vcombine.high %v9407_v42, %v9407_v42 }
 0x245   : > { %5231 = vmatpush1.bf16.msra.mxu0 %v8343_v51  ;;  %v8427_v51 = vld [vmem:[#allocation6 + $0x1174] ss:$8 sps:$4 sm:$0xff]  }
 0x246   : > { %5232 = vmatprep.subr.bf16.mxu0 %v8351_v54  ;;  %v8421_v54 = vld [vmem:[#allocation6 + $0x1070] ss:$8 sps:$4 sm:$0xff]  }
 0x247   : > { %5272 = vmatpush1.bf16.msra.mxu1 %v8346_v55  ;;  %v597_v55 = vpack.c.bf16 %v495_v45, %v495_v45  ;;  %v8487_v45 = vld [vmem:[#allocation6 + $0x11d4] ss:$8 sps:$4 sm:$0xff]  }
 0x248   : > { %5273 = vmatprep.subr.bf16.mxu1 %v8354_v57  ;;  %v594_v57 = vpack.c.bf16 %v9387_v12, %v9387_v12 }
 0x249   : > { %5233 = vmatpush1.bf16.msra.mxu0 %v8349_v58  ;;  %v8430_v58 = vld [vmem:[#allocation6 + $0x1064] ss:$8 sps:$4 sm:$0xff]  }
 0x24a   : > { %5234 = vmatprep.subr.bf16.mxu0 %v8357_v34  ;;  %v8425_v34 = vld [vmem:[#allocation6 + $0x1170] ss:$8 sps:$4 sm:$0xff]  }
 0x24b   : > { %5274 = vmatpush1.bf16.msra.mxu1 %v8352_v59  ;;  %v599_v59 = vpack.c.bf16 %v496_v49, %v496_v49  ;;  %v8485_v49 = vld [vmem:[#allocation6 + $0x11d0] ss:$8 sps:$4 sm:$0xff]  }
 0x24c   : > { %5275 = vmatprep.subr.bf16.mxu1 %v8360_v21 }
 0x24d   : > { %5235 = vmatpush1.bf16.msra.mxu0 %v8355_v60  ;;  %v8433_v60 = vld [vmem:[#allocation6 + $0x1164] ss:$8 sps:$4 sm:$0xff]  }
 0x24e   : > { %5236 = vmatprep.subr.bf16.mxu0 %v8363_v39 }
 0x24f   : > { %5276 = vmatpush1.bf16.msra.mxu1 %v8358_v61 }
 0x250   : > { %5277 = vmatprep.subr.bf16.mxu1 %v8366_v62 }
 0x251   : > { %5237 = vmatpush1.bf16.msra.mxu0 %v8361_v63  ;;  %v8436_v63 = vld [vmem:[#allocation6 + $0x1054] ss:$8 sps:$4 sm:$0xff]  }
 0x252   : > { %5238 = vmatprep.subr.bf16.mxu0 %v8369_v0 }
 0x253   : > { %5278 = vmatpush1.bf16.msra.mxu1 %v8364_v1  ;;  %v8431_v1 = vld [vmem:[#allocation6 + $0x1160] ss:$8 sps:$4 sm:$0xff]  }
 0x254   : > { %5279 = vmatprep.subr.bf16.mxu1 %v8372_v2 }
 0x255   : > { %5239 = vmatpush1.bf16.msra.mxu0 %v8367_v3 }
 0x256   : > { %5240 = vmatprep.subr.bf16.mxu0 %v8375_v4  ;;  %v8439_v4 = vld [vmem:[#allocation6 + $0x1154] ss:$8 sps:$4 sm:$0xff]  }
 0x257   : > { %5280 = vmatpush1.bf16.msra.mxu1 %v8370_v17  ;;  %v8434_v17 = vld [vmem:[#allocation6 + $0x1050] ss:$8 sps:$4 sm:$0xff]  }
 0x258   : > { %5281 = vmatprep.subr.bf16.mxu1 %v8378_v5 }
 0x259   : > { %5241 = vmatpush2.bf16.msra.mxu0 %v8373_v6  ;;  %v8442_v6 = vld [vmem:[#allocation6 + $0x1044] ss:$8 sps:$4 sm:$0xff]  }
 0x25a   : > { %5242 = vmatprep.subr.bf16.mxu0 %v8381_v7 }
 0x25b   : > { %5282 = vmatpush2.bf16.msra.mxu1 %v8376_v20  ;;  %v8437_v20 = vld [vmem:[#allocation6 + $0x1150] ss:$8 sps:$4 sm:$0xff]  }
 0x25c   : > { %5283 = vmatprep.subr.bf16.mxu1 %v8384_v10 }
 0x25d   : > { %5243 = vmatpush2.bf16.msra.mxu0 %v8379_v11  ;;  %v8440_v11 = vld [vmem:[#allocation6 + $0x1040] ss:$8 sps:$4 sm:$0xff]  }
 0x25e   : > { %5244 = vmatprep.subr.bf16.mxu0 %v8387_v36  ;;  %v8448_v36 = vld [vmem:[#allocation6 + $0x1034] ss:$8 sps:$4 sm:$0xff]  }
 0x25f   : > { %5284 = vmatpush2.bf16.msra.mxu1 %v8382_v13  ;;  %v8443_v13 = vld [vmem:[#allocation6 + $0x1140] ss:$8 sps:$4 sm:$0xff]  }
 0x260   : > { %5285 = vmatprep.subr.bf16.mxu1 %v8390_v14  ;;  %v8451_v14 = vld [vmem:[#allocation6 + $0x1134] ss:$8 sps:$4 sm:$0xff]  }
 0x261   : > { %5245 = vmatpush2.bf16.msra.mxu0 %v8385_v15  ;;  %v8446_v15 = vld [vmem:[#allocation6 + $0x1030] ss:$8 sps:$4 sm:$0xff]  }
 0x262   : > { %5246 = vmatprep.subr.bf16.mxu0 %v8393_v16  ;;  %v8454_v16 = vld [vmem:[#allocation6 + $0x1024] ss:$8 sps:$4 sm:$0xff]  }
 0x263   : > { %5286 = vmatpush2.bf16.msra.mxu1 %v8388_v40  ;;  %v8449_v40 = vld [vmem:[#allocation6 + $0x1130] ss:$8 sps:$4 sm:$0xff]  }
 0x264   : > { %5287 = vmatprep.subr.bf16.mxu1 %v8396_v18  ;;  %v8457_v18 = vld [vmem:[#allocation6 + $0x1124] ss:$8 sps:$4 sm:$0xff]  }
 0x265   : > { %5247 = vmatpush2.bf16.msra.mxu0 %v8391_v19  ;;  %v8452_v19 = vld [vmem:[#allocation6 + $0x1020] ss:$8 sps:$4 sm:$0xff]  }
 0x266   : > { %5248 = vmatprep.subr.bf16.mxu0 %v8399_v22  ;;  %v8460_v22 = vld [vmem:[#allocation6 + $0x1014] ss:$8 sps:$4 sm:$0xff]  }
 0x267   : > { %5288 = vmatpush2.bf16.msra.mxu1 %v8394_v23  ;;  %v8455_v23 = vld [vmem:[#allocation6 + $0x1120] ss:$8 sps:$4 sm:$0xff]  }
 0x268   : > { %5289 = vmatprep.subr.bf16.mxu1 %v8402_v24  ;;  %v8463_v24 = vld [vmem:[#allocation6 + $0x1114] ss:$8 sps:$4 sm:$0xff]  }
 0x269   : > { %5249 = vmatpush2.bf16.msra.mxu0 %v8397_v25  ;;  %v8458_v25 = vld [vmem:[#allocation6 + $0x1010] ss:$8 sps:$4 sm:$0xff]  }
 0x26a   : > { %5250 = vmatprep.subr.bf16.mxu0 %v8405_v26  ;;  %v8466_v26 = vld [vmem:[#allocation6 + $0x1004] ss:$8 sps:$4 sm:$0xff]  }
 0x26b   : > { %5290 = vmatpush2.bf16.msra.mxu1 %v8400_v27  ;;  %v8461_v27 = vld [vmem:[#allocation6 + $0x1110] ss:$8 sps:$4 sm:$0xff]  }
 0x26c   : > { %5291 = vmatprep.subr.bf16.mxu1 %v8408_v28  ;;  %v8469_v28 = vld [vmem:[#allocation6 + $0x1104] ss:$8 sps:$4 sm:$0xff]  }
 0x26d   : > { %5251 = vmatpush2.bf16.msra.mxu0 %v8403_v30  ;;  %v8472_v30 = vld [vmem:[#allocation6 + $0x10f4] ss:$8 sps:$4 sm:$0xff]  }
 0x26e   : > { %5252 = vmatprep.subr.bf16.mxu0 %v8411_v56  ;;  %v8467_v56 = vld [vmem:[#allocation6 + $0x1100] ss:$8 sps:$4 sm:$0xff]  }
 0x26f   : > { %5292 = vmatpush2.bf16.msra.mxu1 %v8406_v31  ;;  %v8475_v31 = vld [vmem:[#allocation6 + $0x11f4] ss:$8 sps:$4 sm:$0xff]  }
 0x270   : > { %5293 = vmatprep.subr.bf16.mxu1 %v8414_v33  ;;  %v8478_v33 = vld [vmem:[#allocation6 + $0x10e4] ss:$8 sps:$4 sm:$0xff]  }
 0x271   : > { %5253 = vmatpush2.bf16.msra.mxu0 %v8409_v52  ;;  %v8473_v52 = vld [vmem:[#allocation6 + $0x11f0] ss:$8 sps:$4 sm:$0xff]  }
 0x272   : > { %5254 = vmatprep.subr.bf16.mxu0 %v8417_v38  ;;  %v8481_v38 = vld [vmem:[#allocation6 + $0x11e4] ss:$8 sps:$4 sm:$0xff]  }
 0x273   : > { %5294 = vmatpush2.bf16.msra.mxu1 %v8412_v41  ;;  %v8476_v41 = vld [vmem:[#allocation6 + $0x10e0] ss:$8 sps:$4 sm:$0xff]  }
 0x274   : > { %5295 = vmatprep.subr.bf16.mxu1 %v8420_v44  ;;  %v8484_v44 = vld [vmem:[#allocation6 + $0x10d4] ss:$8 sps:$4 sm:$0xff]  }
 0x275   : > { %5255 = vmatpush2.bf16.msra.mxu0 %v8415_v53  ;;  %v8479_v53 = vld [vmem:[#allocation6 + $0x11e0] ss:$8 sps:$4 sm:$0xff]  }
 0x276   : > { %5306 = vmatprep.subr.bf16.mxu0 %v8423_v46  ;;  %v8482_v46 = vld [vmem:[#allocation6 + $0x10d0] ss:$8 sps:$4 sm:$0xff]  }
 0x277   : > { %5296 = vmatpush2.bf16.msra.mxu1 %v8418_v47  ;;  %v8490_v47 = vld [vmem:[#allocation6 + $0x10c4] ss:$8 sps:$4 sm:$0xff]  }
 0x278   : > { %v5012_v21 = vpop.f32.mrf.mxu0  ;;  %5257 = vmatmul.mubr.bf16.vlgmr.msra.gmra.mxu0 %v592_v50  ;;  %5347 = vmatprep.subr.bf16.mxu1 %v8427_v51  ;;  %v8493_v50 = vld [vmem:[#allocation6 + $0x11c4] ss:$8 sps:$4 sm:$0xff]   ;;  %v8488_v51 = vld [vmem:[#allocation6 + $0x10c0] ss:$8 sps:$4 sm:$0xff]  }
 0x279   : > { %v5013_v39 = vadd.f32 %v5012_v21, %v9399_v35  ;;  %5307 = vmatpush1.bf16.msra.mxu0 %v8421_v54  ;;  %5338 = vmatprep.mubr.bf16.mxu0 %v597_v55  ;;  %v8496_v54 = vld [vmem:[#allocation6 + $0x10b4] ss:$8 sps:$4 sm:$0xff]   ;;  %v8491_v55 = vld [vmem:[#allocation6 + $0x11c0] ss:$8 sps:$4 sm:$0xff]   ;;  %v8505_v21 = vld [vmem:[#allocation6 + $0x11a4] ss:$8 sps:$4 sm:$0xff]  }
 0x27a   : > { %v5014_v61 = vpop.f32.mrf.mxu0  ;;  %v5053_v62 = vpop.f32.mrf.mxu1  ;;  %5298 = vmatmul.mubr.bf16.vlgmr.msra.gmra.mxu1 %v594_v57  ;;  %5308 = vmatprep.subr.bf16.mxu0 %v8430_v58  ;;  %v8499_v57 = vld [vmem:[#allocation6 + $0x11b4] ss:$8 sps:$4 sm:$0xff]   ;;  %v8494_v58 = vld [vmem:[#allocation6 + $0x10b0] ss:$8 sps:$4 sm:$0xff]  }
 0x27b   : > { %v5015_v12 = vadd.f32 %v5014_v61, %v9401_v8  ;;  %v9419_v0 = vadd.f32 %v5053_v62, %v5013_v39  ;;  %5348 = vmatpush1.bf16.msra.mxu1 %v8425_v34  ;;  %5379 = vmatprep.mubr.bf16.mxu1 %v599_v59  ;;  %v8445_v8 = vld [vmem:[#allocation6 + $0x1144] ss:$8 sps:$4 sm:$0xff]   ;;  %v8497_v59 = vld [vmem:[#allocation6 + $0x11b0] ss:$8 sps:$4 sm:$0xff]   ;;  %v8500_v39 = vld [vmem:[#allocation6 + $0x10a0] ss:$8 sps:$4 sm:$0xff]  }
 0x27c   : > { %v5016_v2 = vpop.f32.mrf.mxu0  ;;  %v5055_v3 = vpop.f32.mrf.mxu1  ;;  %5349 = vmatprep.subr.bf16.mxu1 %v8433_v60  ;;  %v8502_v34 = vld [vmem:[#allocation6 + $0x10a4] ss:$8 sps:$4 sm:$0xff]   ;;  %v331_v60 = vld [vmem:[#allocation3 + $0x48] sm:$0xff]  ;;  %v8503_v61 = vld [vmem:[#allocation6 + $0x11a0] ss:$8 sps:$4 sm:$0xff]  }
 0x27d   : > { %v9421_v35 = vadd.f32 %v5055_v3, %v5015_v12  ;;  %5309 = vmatpush1.bf16.msra.mxu0 %v8428_v9  ;;  %v8508_v9 = vld [vmem:[#allocation6 + $0x1094] ss:$8 sps:$4 sm:$0xff]   ;;  %v497_v62 = vcombine.high %v331_v60, %v331_v60  ;;  %v8506_v12 = vld [vmem:[#allocation6 + $0x1090] ss:$8 sps:$4 sm:$0xff]   ;;  %v8514_v2 = vld [vmem:[#allocation6 + $0x1084] ss:$8 sps:$4 sm:$0xff]  }
 0x27e   : > { %v5017_v5 = vpop.f32.mrf.mxu0  ;;  %5310 = vmatprep.subr.bf16.mxu0 %v8436_v63  ;;  %v5057_v7 = vpop.f32.mrf.mxu1  ;;  %v8511_v63 = vld [vmem:[#allocation6 + $0x1194] ss:$8 sps:$4 sm:$0xff]   ;;  %v8509_v3 = vld [vmem:[#allocation6 + $0x1190] ss:$8 sps:$4 sm:$0xff]  }
 0x27f   : > { %5350 = vmatpush1.bf16.msra.mxu1 %v8431_v1  ;;  %v9424_v1 = vrot.slane %v331_v60, %v9281_v48  ;;  %v8512_v5 = vld [vmem:[#allocation6 + $0x1080] ss:$8 sps:$4 sm:$0xff]   ;;  %v8520_v7 = vld [vmem:[#allocation6 + $0x1274] ss:$8 sps:$4 sm:$0xff]  }
 0x280   : > { %5351 = vmatprep.subr.bf16.mxu1 %v8439_v4  ;;  %v5058_v10 = vpop.f32.mrf.mxu1  ;;  %v9427_v4 = vrot.slane %v497_v62, %v9281_v48  ;;  %v8524_v48 = vld [vmem:[#allocation6 + $0x1374] ss:$8 sps:$4 sm:$0xff]   ;;  %v8575_v62 = vld [vmem:[#allocation6 + $0x12e4] ss:$8 sps:$4 sm:$0xff]  }
 0x281   : > { %5311 = vmatpush1.bf16.msra.mxu0 %v8434_v17  ;;  %v8517_v17 = vld [vmem:[#allocation6 + $0x1184] ss:$8 sps:$4 sm:$0xff]   ;;  %v596_v10 = vpack.c.bf16 %v9404_v37, %v9404_v37  ;;  %v8525_v37 = vld [vmem:[#allocation6 + $0x1260] ss:$8 sps:$4 sm:$0xff]   ;;  %v8569_v60 = vld [vmem:[#allocation6 + $0x12f4] ss:$8 sps:$4 sm:$0xff]  }
 0x282   : > { %5312 = vmatprep.subr.bf16.mxu0 %v8442_v6  ;;  %v512_v6 = vcombine.high %v9424_v1, %v9424_v1 }
 0x283   : > { %5352 = vmatpush1.bf16.msra.mxu1 %v8437_v20  ;;  %v8515_v20 = vld [vmem:[#allocation6 + $0x1180] ss:$8 sps:$4 sm:$0xff]  }
 0x284   : > { %5353 = vmatprep.subr.bf16.mxu1 %v8445_v8  ;;  %v513_v8 = vcombine.high %v9427_v4, %v9427_v4 }
 0x285   : > { %5313 = vmatpush1.bf16.msra.mxu0 %v8440_v11  ;;  %v8518_v11 = vld [vmem:[#allocation6 + $0x1270] ss:$8 sps:$4 sm:$0xff]  }
 0x286   : > { %5314 = vmatprep.subr.bf16.mxu0 %v8448_v36  ;;  %v601_v36 = vpack.c.bf16 %v512_v6, %v512_v6  ;;  %v8579_v6 = vld [vmem:[#allocation6 + $0x12d0] ss:$8 sps:$4 sm:$0xff]  }
 0x287   : > { %5354 = vmatpush1.bf16.msra.mxu1 %v8443_v13  ;;  %v598_v13 = vpack.c.bf16 %v9407_v42, %v9407_v42 }
 0x288   : > { %5355 = vmatprep.subr.bf16.mxu1 %v8451_v14  ;;  %v8527_v14 = vld [vmem:[#allocation6 + $0x1264] ss:$8 sps:$4 sm:$0xff]  }
 0x289   : > { %5315 = vmatpush1.bf16.msra.mxu0 %v8446_v15  ;;  %v8522_v15 = vld [vmem:[#allocation6 + $0x1370] ss:$8 sps:$4 sm:$0xff]  }
 0x28a   : > { %5316 = vmatprep.subr.bf16.mxu0 %v8454_v16  ;;  %v603_v16 = vpack.c.bf16 %v513_v8, %v513_v8  ;;  %v8590_v8 = vld [vmem:[#allocation6 + $0x13c4] ss:$8 sps:$4 sm:$0xff]  }
 0x28b   : > { %5356 = vmatpush1.bf16.msra.mxu1 %v8449_v40 }
 0x28c   : > { %5357 = vmatprep.subr.bf16.mxu1 %v8457_v18  ;;  %v8530_v18 = vld [vmem:[#allocation6 + $0x1364] ss:$8 sps:$4 sm:$0xff]  }
 0x28d   : > { %5317 = vmatpush1.bf16.msra.mxu0 %v8452_v19 }
 0x28e   : > { %5318 = vmatprep.subr.bf16.mxu0 %v8460_v22 }
 0x28f   : > { %5358 = vmatpush1.bf16.msra.mxu1 %v8455_v23 }
 0x290   : > { %5359 = vmatprep.subr.bf16.mxu1 %v8463_v24  ;;  %v8533_v24 = vld [vmem:[#allocation6 + $0x1254] ss:$8 sps:$4 sm:$0xff]  }
 0x291   : > { %5319 = vmatpush1.bf16.msra.mxu0 %v8458_v25 }
 0x292   : > { %5320 = vmatprep.subr.bf16.mxu0 %v8466_v26  ;;  %v8528_v26 = vld [vmem:[#allocation6 + $0x1360] ss:$8 sps:$4 sm:$0xff]  }
 0x293   : > { %5360 = vmatpush1.bf16.msra.mxu1 %v8461_v27 }
 0x294   : > { %5361 = vmatprep.subr.bf16.mxu1 %v8469_v28 }
 0x295   : > { %5321 = vmatpush1.bf16.msra.mxu0 %v8464_v29  ;;  %v8536_v29 = vld [vmem:[#allocation6 + $0x1354] ss:$8 sps:$4 sm:$0xff]  }
 0x296   : > { %5322 = vmatprep.subr.bf16.mxu0 %v8472_v30  ;;  %v8531_v30 = vld [vmem:[#allocation6 + $0x1250] ss:$8 sps:$4 sm:$0xff]  }
 0x297   : > { %5362 = vmatpush1.bf16.msra.mxu1 %v8467_v56 }
 0x298   : > { %5363 = vmatprep.subr.bf16.mxu1 %v8475_v31  ;;  %v8539_v31 = vld [vmem:[#allocation6 + $0x1244] ss:$8 sps:$4 sm:$0xff]  }
 0x299   : > { %5323 = vmatpush2.bf16.msra.mxu0 %v8470_v32 }
 0x29a   : > { %5324 = vmatprep.subr.bf16.mxu0 %v8478_v33  ;;  %v8534_v33 = vld [vmem:[#allocation6 + $0x1350] ss:$8 sps:$4 sm:$0xff]  }
 0x29b   : > { %5364 = vmatpush2.bf16.msra.mxu1 %v8473_v52 }
 0x29c   : > { %5365 = vmatprep.subr.bf16.mxu1 %v8481_v38  ;;  %v8537_v38 = vld [vmem:[#allocation6 + $0x1240] ss:$8 sps:$4 sm:$0xff]  }
 0x29d   : > { %5325 = vmatpush2.bf16.msra.mxu0 %v8476_v41  ;;  %v8545_v41 = vld [vmem:[#allocation6 + $0x1234] ss:$8 sps:$4 sm:$0xff]  }
 0x29e   : > { %5326 = vmatprep.subr.bf16.mxu0 %v8484_v44  ;;  %v8540_v44 = vld [vmem:[#allocation6 + $0x1340] ss:$8 sps:$4 sm:$0xff]  }
 0x29f   : > { %5366 = vmatpush2.bf16.msra.mxu1 %v8479_v53  ;;  %v8548_v53 = vld [vmem:[#allocation6 + $0x1334] ss:$8 sps:$4 sm:$0xff]  }
 0x2a0   : > { %5367 = vmatprep.subr.bf16.mxu1 %v8487_v45  ;;  %v8543_v45 = vld [vmem:[#allocation6 + $0x1230] ss:$8 sps:$4 sm:$0xff]  }
 0x2a1   : > { %5327 = vmatpush2.bf16.msra.mxu0 %v8482_v46  ;;  %v8551_v46 = vld [vmem:[#allocation6 + $0x1224] ss:$8 sps:$4 sm:$0xff]  }
 0x2a2   : > { %5328 = vmatprep.subr.bf16.mxu0 %v8490_v47  ;;  %v8546_v47 = vld [vmem:[#allocation6 + $0x1330] ss:$8 sps:$4 sm:$0xff]  }
 0x2a3   : > { %5368 = vmatpush2.bf16.msra.mxu1 %v8485_v49  ;;  %v8554_v49 = vld [vmem:[#allocation6 + $0x1324] ss:$8 sps:$4 sm:$0xff]  }
 0x2a4   : > { %5369 = vmatprep.subr.bf16.mxu1 %v8493_v50  ;;  %v8549_v50 = vld [vmem:[#allocation6 + $0x1220] ss:$8 sps:$4 sm:$0xff]  }
 0x2a5   : > { %5329 = vmatpush2.bf16.msra.mxu0 %v8488_v51  ;;  %v8557_v51 = vld [vmem:[#allocation6 + $0x1214] ss:$8 sps:$4 sm:$0xff]  }
 0x2a6   : > { %5330 = vmatprep.subr.bf16.mxu0 %v8496_v54  ;;  %v8552_v54 = vld [vmem:[#allocation6 + $0x1320] ss:$8 sps:$4 sm:$0xff]  }
 0x2a7   : > { %5370 = vmatpush2.bf16.msra.mxu1 %v8491_v55  ;;  %v8560_v55 = vld [vmem:[#allocation6 + $0x1314] ss:$8 sps:$4 sm:$0xff]  }
 0x2a8   : > { %5371 = vmatprep.subr.bf16.mxu1 %v8499_v57  ;;  %v8555_v57 = vld [vmem:[#allocation6 + $0x1210] ss:$8 sps:$4 sm:$0xff]  }
 0x2a9   : > { %5331 = vmatpush2.bf16.msra.mxu0 %v8494_v58  ;;  %v8563_v58 = vld [vmem:[#allocation6 + $0x1204] ss:$8 sps:$4 sm:$0xff]  }
 0x2aa   : > { %5332 = vmatprep.subr.bf16.mxu0 %v8502_v34  ;;  %v8558_v34 = vld [vmem:[#allocation6 + $0x1310] ss:$8 sps:$4 sm:$0xff]  }
 0x2ab   : > { %5372 = vmatpush2.bf16.msra.mxu1 %v8497_v59  ;;  %v8566_v59 = vld [vmem:[#allocation6 + $0x1304] ss:$8 sps:$4 sm:$0xff]  }
 0x2ac   : > { %5373 = vmatprep.subr.bf16.mxu1 %v8505_v21  ;;  %v8561_v21 = vld [vmem:[#allocation6 + $0x1200] ss:$8 sps:$4 sm:$0xff]  }
 0x2ad   : > { %5333 = vmatpush2.bf16.msra.mxu0 %v8500_v39  ;;  %v8564_v39 = vld [vmem:[#allocation6 + $0x1300] ss:$8 sps:$4 sm:$0xff]  }
 0x2ae   : > { %5334 = vmatprep.subr.bf16.mxu0 %v8508_v9  ;;  %v8572_v9 = vld [vmem:[#allocation6 + $0x13f4] ss:$8 sps:$4 sm:$0xff]  }
 0x2af   : > { %5374 = vmatpush2.bf16.msra.mxu1 %v8503_v61  ;;  %v8567_v61 = vld [vmem:[#allocation6 + $0x12f0] ss:$8 sps:$4 sm:$0xff]  }
 0x2b0   : > { %5375 = vmatprep.subr.bf16.mxu1 %v8511_v63  ;;  %v8570_v63 = vld [vmem:[#allocation6 + $0x13f0] ss:$8 sps:$4 sm:$0xff]  }
 0x2b1   : > { %5335 = vmatpush2.bf16.msra.mxu0 %v8506_v12  ;;  %v8578_v12 = vld [vmem:[#allocation6 + $0x13e4] ss:$8 sps:$4 sm:$0xff]  }
 0x2b2   : > { %5336 = vmatprep.subr.bf16.mxu0 %v8514_v2  ;;  %v8573_v2 = vld [vmem:[#allocation6 + $0x12e0] ss:$8 sps:$4 sm:$0xff]  }
 0x2b3   : > { %5376 = vmatpush2.bf16.msra.mxu1 %v8509_v3  ;;  %v8581_v3 = vld [vmem:[#allocation6 + $0x12d4] ss:$8 sps:$4 sm:$0xff]  }
 0x2b4   : > { %5377 = vmatprep.subr.bf16.mxu1 %v8517_v17  ;;  %v8576_v17 = vld [vmem:[#allocation6 + $0x13e0] ss:$8 sps:$4 sm:$0xff]  }
 0x2b5   : > { %5337 = vmatpush2.bf16.msra.mxu0 %v8512_v5  ;;  %v8584_v5 = vld [vmem:[#allocation6 + $0x13d4] ss:$8 sps:$4 sm:$0xff]  }
 0x2b6   : > { %5388 = vmatprep.subr.bf16.mxu0 %v8520_v7  ;;  %v8587_v7 = vld [vmem:[#allocation6 + $0x12c4] ss:$8 sps:$4 sm:$0xff]  }
 0x2b7   : > { %5378 = vmatpush2.bf16.msra.mxu1 %v8515_v20  ;;  %v8582_v20 = vld [vmem:[#allocation6 + $0x13d0] ss:$8 sps:$4 sm:$0xff]  }
 0x2b8   : > { %v5094_v40 = vpop.f32.mrf.mxu0  ;;  %5339 = vmatmul.mubr.bf16.vlgmr.msra.gmra.mxu0 %v596_v10  ;;  %5429 = vmatprep.subr.bf16.mxu1 %v8524_v48  ;;  %v8585_v10 = vld [vmem:[#allocation6 + $0x12c0] ss:$8 sps:$4 sm:$0xff]   ;;  %v8593_v48 = vld [vmem:[#allocation6 + $0x12b4] ss:$8 sps:$4 sm:$0xff]  }
 0x2b9   : > { %v5095_v19 = vadd.f32 %v5094_v40, %v9419_v0  ;;  %5389 = vmatpush1.bf16.msra.mxu0 %v8518_v11  ;;  %5420 = vmatprep.mubr.bf16.mxu0 %v601_v36  ;;  %v8588_v11 = vld [vmem:[#allocation6 + $0x13c0] ss:$8 sps:$4 sm:$0xff]   ;;  %v8596_v36 = vld [vmem:[#allocation6 + $0x13b4] ss:$8 sps:$4 sm:$0xff]  }
 0x2ba   : > { %v5096_v22 = vpop.f32.mrf.mxu0  ;;  %v5135_v23 = vpop.f32.mrf.mxu1  ;;  %5380 = vmatmul.mubr.bf16.vlgmr.msra.gmra.mxu1 %v598_v13  ;;  %5390 = vmatprep.subr.bf16.mxu0 %v8527_v14  ;;  %v8591_v13 = vld [vmem:[#allocation6 + $0x12b0] ss:$8 sps:$4 sm:$0xff]   ;;  %v8599_v14 = vld [vmem:[#allocation6 + $0x12a4] ss:$8 sps:$4 sm:$0xff]   ;;  %v8597_v40 = vld [vmem:[#allocation6 + $0x12a0] ss:$8 sps:$4 sm:$0xff]  }
 0x2bb   : > { %v5097_v42 = vadd.f32 %v5096_v22, %v9421_v35  ;;  %v9439_v25 = vadd.f32 %v5135_v23, %v5095_v19  ;;  %5430 = vmatpush1.bf16.msra.mxu1 %v8522_v15  ;;  %5461 = vmatprep.mubr.bf16.mxu1 %v603_v16  ;;  %v8542_v35 = vld [vmem:[#allocation6 + $0x1344] ss:$8 sps:$4 sm:$0xff]   ;;  %v8594_v15 = vld [vmem:[#allocation6 + $0x13b0] ss:$8 sps:$4 sm:$0xff]   ;;  %v8600_v19 = vld [vmem:[#allocation6 + $0x13a0] ss:$8 sps:$4 sm:$0xff]  }
 0x2bc   : > { %v5098_v27 = vpop.f32.mrf.mxu0  ;;  %v5137_v28 = vpop.f32.mrf.mxu1  ;;  %5431 = vmatprep.subr.bf16.mxu1 %v8530_v18  ;;  %v8602_v16 = vld [vmem:[#allocation6 + $0x13a4] ss:$8 sps:$4 sm:$0xff]   ;;  %v8605_v18 = vld [vmem:[#allocation6 + $0x1294] ss:$8 sps:$4 sm:$0xff]   ;;  %v8603_v22 = vld [vmem:[#allocation6 + $0x1290] ss:$8 sps:$4 sm:$0xff]  }
 0x2bd   : > { %v9441_v0 = vadd.f32 %v5137_v28, %v5097_v42  ;;  %5391 = vmatpush1.bf16.msra.mxu0 %v8525_v37  ;;  %v8608_v37 = vld [vmem:[#allocation6 + $0x1394] ss:$8 sps:$4 sm:$0xff]   ;;  %v8611_v23 = vld [vmem:[#allocation6 + $0x1284] ss:$8 sps:$4 sm:$0xff]   ;;  %v8606_v42 = vld [vmem:[#allocation6 + $0x1390] ss:$8 sps:$4 sm:$0xff]  }
 0x2be   : > { %v5099_v56 = vpop.f32.mrf.mxu0  ;;  %5392 = vmatprep.subr.bf16.mxu0 %v8533_v24  ;;  %v5139_v32 = vpop.f32.mrf.mxu1  ;;  %v9443_v24 = vld.sshfl [vmem:[#allocation3 + $0x50] sm:$0x33 pattern:$0x76325410]  ;;  %v8609_v27 = vld [vmem:[#allocation6 + $0x1280] ss:$8 sps:$4 sm:$0xff]  }
 0x2bf   : > { %5432 = vmatpush1.bf16.msra.mxu1 %v8528_v26  ;;  %v8614_v26 = vld [vmem:[#allocation6 + $0x1384] ss:$8 sps:$4 sm:$0xff]   ;;  %v521_v28 = vcombine.high %v9443_v24, %v9443_v24  ;;  %v600_v56 = vpack.c.bf16 %v9424_v1, %v9424_v1  ;;  %v8624_v1 = vld [vmem:[#allocation6 + $0x1454] ss:$8 sps:$4 sm:$0xff]  }
 0x2c0   : > { %5433 = vmatprep.subr.bf16.mxu1 %v8536_v29  ;;  %v5140_v52 = vpop.f32.mrf.mxu1  ;;  %v8617_v29 = vld [vmem:[#allocation6 + $0x1474] ss:$8 sps:$4 sm:$0xff]  }
 0x2c1   : > { %5393 = vmatpush1.bf16.msra.mxu0 %v8531_v30  ;;  %v8612_v30 = vld [vmem:[#allocation6 + $0x1380] ss:$8 sps:$4 sm:$0xff]   ;;  %v605_v32 = vpack.c.bf16 %v521_v28, %v521_v28 }
 0x2c2   : > { %5394 = vmatprep.subr.bf16.mxu0 %v8539_v31  ;;  %v8615_v31 = vld [vmem:[#allocation6 + $0x1470] ss:$8 sps:$4 sm:$0xff]  }
 0x2c3   : > { %5434 = vmatpush1.bf16.msra.mxu1 %v8534_v33  ;;  %v602_v33 = vpack.c.bf16 %v9427_v4, %v9427_v4 }
 0x2c4   : > { %5435 = vmatprep.subr.bf16.mxu1 %v8542_v35  ;;  %v8621_v35 = vld [vmem:[#allocation6 + $0x1464] ss:$8 sps:$4 sm:$0xff]  }
 0x2c5   : > { %5395 = vmatpush1.bf16.msra.mxu0 %v8537_v38 }
 0x2c6   : > { %5396 = vmatprep.subr.bf16.mxu0 %v8545_v41  ;;  %v8619_v41 = vld [vmem:[#allocation6 + $0x1460] ss:$8 sps:$4 sm:$0xff]  }
 0x2c7   : > { %5436 = vmatpush1.bf16.msra.mxu1 %v8540_v44 }
 0x2c8   : > { %5437 = vmatprep.subr.bf16.mxu1 %v8548_v53 }
 0x2c9   : > { %5397 = vmatpush1.bf16.msra.mxu0 %v8543_v45 }
 0x2ca   : > { %5398 = vmatprep.subr.bf16.mxu0 %v8551_v46 }
 0x2cb   : > { %5438 = vmatpush1.bf16.msra.mxu1 %v8546_v47 }
 0x2cc   : > { %5439 = vmatprep.subr.bf16.mxu1 %v8554_v49 }
 0x2cd   : > { %5399 = vmatpush1.bf16.msra.mxu0 %v8549_v50  ;;  %v8622_v50 = vld [vmem:[#allocation6 + $0x1450] ss:$8 sps:$4 sm:$0xff]  }
 0x2ce   : > { %5400 = vmatprep.subr.bf16.mxu0 %v8557_v51 }
 0x2cf   : > { %5440 = vmatpush1.bf16.msra.mxu1 %v8552_v54 }
 0x2d0   : > { %5441 = vmatprep.subr.bf16.mxu1 %v8560_v55 }
 0x2d1   : > { %5401 = vmatpush1.bf16.msra.mxu0 %v8555_v57  ;;  %v8625_v57 = vld [vmem:[#allocation6 + $0x1440] ss:$8 sps:$4 sm:$0xff]  }
 0x2d2   : > { %5402 = vmatprep.subr.bf16.mxu0 %v8563_v58  ;;  %v8630_v58 = vld [vmem:[#allocation6 + $0x1434] ss:$8 sps:$4 sm:$0xff]  }
 0x2d3   : > { %5442 = vmatpush1.bf16.msra.mxu1 %v8558_v34  ;;  %v8628_v34 = vld [vmem:[#allocation6 + $0x1430] ss:$8 sps:$4 sm:$0xff]  }
 0x2d4   : > { %5443 = vmatprep.subr.bf16.mxu1 %v8566_v59  ;;  %v8631_v59 = vld [vmem:[#allocation6 + $0x1420] ss:$8 sps:$4 sm:$0xff]  }
 0x2d5   : > { %5403 = vmatpush1.bf16.msra.mxu0 %v8561_v21  ;;  %v8636_v21 = vld [vmem:[#allocation6 + $0x1414] ss:$8 sps:$4 sm:$0xff]  }
 0x2d6   : > { %5404 = vmatprep.subr.bf16.mxu0 %v8569_v60  ;;  %v8634_v60 = vld [vmem:[#allocation6 + $0x1410] ss:$8 sps:$4 sm:$0xff]  }
 0x2d7   : > { %5444 = vmatpush1.bf16.msra.mxu1 %v8564_v39  ;;  %v8639_v39 = vld [vmem:[#allocation6 + $0x1404] ss:$8 sps:$4 sm:$0xff]  }
 0x2d8   : > { %5445 = vmatprep.subr.bf16.mxu1 %v8572_v9  ;;  %v8637_v9 = vld [vmem:[#allocation6 + $0x1400] ss:$8 sps:$4 sm:$0xff]  }
 0x2d9   : > { %5405 = vmatpush2.bf16.msra.mxu0 %v8567_v61  ;;  %v8642_v61 = vld [vmem:[#allocation6 + $0x14f4] ss:$8 sps:$4 sm:$0xff]  }
 0x2da   : > { %5406 = vmatprep.subr.bf16.mxu0 %v8575_v62  ;;  %v8640_v62 = vld [vmem:[#allocation6 + $0x14f0] ss:$8 sps:$4 sm:$0xff]  }
 0x2db   : > { %5446 = vmatpush2.bf16.msra.mxu1 %v8570_v63  ;;  %v8645_v63 = vld [vmem:[#allocation6 + $0x14e4] ss:$8 sps:$4 sm:$0xff]  }
 0x2dc   : > { %5447 = vmatprep.subr.bf16.mxu1 %v8578_v12  ;;  %v8643_v12 = vld [vmem:[#allocation6 + $0x14e0] ss:$8 sps:$4 sm:$0xff]  }
 0x2dd   : > { %5407 = vmatpush2.bf16.msra.mxu0 %v8573_v2  ;;  %v8648_v2 = vld [vmem:[#allocation6 + $0x14d4] ss:$8 sps:$4 sm:$0xff]  }
 0x2de   : > { %5408 = vmatprep.subr.bf16.mxu0 %v8581_v3  ;;  %v8646_v3 = vld [vmem:[#allocation6 + $0x14d0] ss:$8 sps:$4 sm:$0xff]  }
 0x2df   : > { %5448 = vmatpush2.bf16.msra.mxu1 %v8576_v17  ;;  %v8651_v17 = vld [vmem:[#allocation6 + $0x14c4] ss:$8 sps:$4 sm:$0xff]  }
 0x2e0   : > { %5449 = vmatprep.subr.bf16.mxu1 %v8584_v5  ;;  %v8649_v5 = vld [vmem:[#allocation6 + $0x14c0] ss:$8 sps:$4 sm:$0xff]  }
 0x2e1   : > { %5409 = vmatpush2.bf16.msra.mxu0 %v8579_v6  ;;  %v8654_v6 = vld [vmem:[#allocation6 + $0x14b4] ss:$8 sps:$4 sm:$0xff]  }
 0x2e2   : > { %5410 = vmatprep.subr.bf16.mxu0 %v8587_v7  ;;  %v8652_v7 = vld [vmem:[#allocation6 + $0x14b0] ss:$8 sps:$4 sm:$0xff]  }
 0x2e3   : > { %5450 = vmatpush2.bf16.msra.mxu1 %v8582_v20  ;;  %v8657_v20 = vld [vmem:[#allocation6 + $0x14a4] ss:$8 sps:$4 sm:$0xff]  }
 0x2e4   : > { %5451 = vmatprep.subr.bf16.mxu1 %v8590_v8  ;;  %v8655_v8 = vld [vmem:[#allocation6 + $0x14a0] ss:$8 sps:$4 sm:$0xff]  }
 0x2e5   : > { %5411 = vmatpush2.bf16.msra.mxu0 %v8585_v10  ;;  %v8660_v10 = vld [vmem:[#allocation6 + $0x1494] ss:$8 sps:$4 sm:$0xff]  }
 0x2e6   : > { %5412 = vmatprep.subr.bf16.mxu0 %v8593_v48  ;;  %v8658_v48 = vld [vmem:[#allocation6 + $0x1490] ss:$8 sps:$4 sm:$0xff]  }
 0x2e7   : > { %5452 = vmatpush2.bf16.msra.mxu1 %v8588_v11  ;;  %v8663_v11 = vld [vmem:[#allocation6 + $0x1484] ss:$8 sps:$4 sm:$0xff]  }
 0x2e8   : > { %5453 = vmatprep.subr.bf16.mxu1 %v8596_v36  ;;  %v8661_v36 = vld [vmem:[#allocation6 + $0x1480] ss:$8 sps:$4 sm:$0xff]  }
 0x2e9   : > { %5413 = vmatpush2.bf16.msra.mxu0 %v8591_v13  ;;  %v604_v13 = vpack.c.bf16 %v9443_v24, %v9443_v24 }
 0x2ea   : > { %5414 = vmatprep.subr.bf16.mxu0 %v8599_v14 }
 0x2eb   : > { %5454 = vmatpush2.bf16.msra.mxu1 %v8594_v15 }
 0x2ec   : > { %5455 = vmatprep.subr.bf16.mxu1 %v8602_v16 }
 0x2ed   : > { %5415 = vmatpush2.bf16.msra.mxu0 %v8597_v40 }
 0x2ee   : > { %5416 = vmatprep.subr.bf16.mxu0 %v8605_v18 }
 0x2ef   : > { %5456 = vmatpush2.bf16.msra.mxu1 %v8600_v19 }
 0x2f0   : > { %5457 = vmatprep.subr.bf16.mxu1 %v8608_v37 }
 0x2f1   : > { %5417 = vmatpush2.bf16.msra.mxu0 %v8603_v22 }
 0x2f2   : > { %5418 = vmatprep.subr.bf16.mxu0 %v8611_v23 }
 0x2f3   : > { %5458 = vmatpush2.bf16.msra.mxu1 %v8606_v42 }
 0x2f4   : > { %5459 = vmatprep.subr.bf16.mxu1 %v8614_v26 }
 0x2f5   : > { %5419 = vmatpush2.bf16.msra.mxu0 %v8609_v27 }
 0x2f6   : > { %5470 = vmatprep.subr.bf16.mxu0 %v8617_v29 }
 0x2f7   : > { %5460 = vmatpush2.bf16.msra.mxu1 %v8612_v30 }
 0x2f8   : > { %v5176_v52 = vpop.f32.mrf.mxu0  ;;  %5421 = vmatmul.mubr.bf16.vlgmr.msra.gmra.mxu0 %v600_v56 }
 0x2f9   : > { %v5177_v38 = vadd.f32 %v5176_v52, %v9439_v25  ;;  %5471 = vmatpush1.bf16.msra.mxu0 %v8615_v31  ;;  %5502 = vmatprep.mubr.bf16.mxu0 %v605_v32  ;;  %v8627_v25 = vld [vmem:[#allocation6 + $0x1444] ss:$8 sps:$4 sm:$0xff]  }
 0x2fa   : > { %v5178_v44 = vpop.f32.mrf.mxu0  ;;  %v5217_v53 = vpop.f32.mrf.mxu1  ;;  %5462 = vmatmul.mubr.bf16.vlgmr.msra.gmra.mxu1 %v602_v33  ;;  %5472 = vmatprep.subr.bf16.mxu0 %v8621_v35 }
 0x2fb   : > { %v5179_v45 = vadd.f32 %v5178_v44, %v9441_v0  ;;  %v9453_v46 = vadd.f32 %v5217_v53, %v5177_v38  ;;  %v8633_v0 = vld [vmem:[#allocation6 + $0x1424] ss:$8 sps:$4 sm:$0xff]  }
 0x2fc   : > { %v5180_v47 = vpop.f32.mrf.mxu0  ;;  %v5219_v4 = vpop.f32.mrf.mxu1 }
 0x2fd   : > { %v9455_v49 = vadd.f32 %v5219_v4, %v5179_v45  ;;  %5473 = vmatpush1.bf16.msra.mxu0 %v8619_v41 }
 0x2fe   : > { %v5181_v51 = vpop.f32.mrf.mxu0  ;;  %5474 = vmatprep.subr.bf16.mxu0 %v8624_v1  ;;  %v5221_v54 = vpop.f32.mrf.mxu1 }
 0x300   : > { %v5222_v55 = vpop.f32.mrf.mxu1 }
 0x301   : > { %5475 = vmatpush1.bf16.msra.mxu0 %v8622_v50 }
 0x302   : > { %5476 = vmatprep.subr.bf16.mxu0 %v8627_v25  ;;  %v9088_v25 = vmov 1966171168  }
 0x303   : > { %v5519_v54 = vunpack.c.l.s4 %v9088_v25 }
 0x305   : > { %5477 = vmatpush1.bf16.msra.mxu0 %v8625_v57 }
 0x306   : > { %5478 = vmatprep.subr.bf16.mxu0 %v8630_v58 }
 0x309   : > { %5479 = vmatpush1.bf16.msra.mxu0 %v8628_v34 }
 0x30a   : > { %5480 = vmatprep.subr.bf16.mxu0 %v8633_v0  ;;  %v5520_v0 = vunpack.c.0.s8 %v5519_v54 }
 0x30d   : > { %5481 = vmatpush1.bf16.msra.mxu0 %v8631_v59 }
 0x30e   : > { %5482 = vmatprep.subr.bf16.mxu0 %v8636_v21 }
 0x311   : > { %5483 = vmatpush1.bf16.msra.mxu0 %v8634_v60 }
 0x312   : > { %5484 = vmatprep.subr.bf16.mxu0 %v8639_v39 }
 0x315   : > { %5485 = vmatpush1.bf16.msra.mxu0 %v8637_v9 }
 0x316   : > { %5486 = vmatprep.subr.bf16.mxu0 %v8642_v61  ;;  %v5523_v61 = vsub.s32 %v5520_v0, %v9278_v43 }
 0x319   : > { %5487 = vmatpush2.bf16.msra.mxu0 %v8640_v62 }
 0x31a   : > { %5488 = vmatprep.subr.bf16.mxu0 %v8645_v63 }
 0x31d   : > { %5489 = vmatpush2.bf16.msra.mxu0 %v8643_v12 }
 0x31e   : > { %5490 = vmatprep.subr.bf16.mxu0 %v8648_v2 }
 0x321   : > { %5491 = vmatpush2.bf16.msra.mxu0 %v8646_v3 }
 0x322   : > { %5492 = vmatprep.subr.bf16.mxu0 %v8651_v17 }
 0x325   : > { %5493 = vmatpush2.bf16.msra.mxu0 %v8649_v5 }
 0x326   : > { %5494 = vmatprep.subr.bf16.mxu0 %v8654_v6 }
 0x329   : > { %5495 = vmatpush2.bf16.msra.mxu0 %v8652_v7 }
 0x32a   : > { %5496 = vmatprep.subr.bf16.mxu0 %v8657_v20 }
 0x32d   : > { %5497 = vmatpush2.bf16.msra.mxu0 %v8655_v8 }
 0x32e   : > { %5498 = vmatprep.subr.bf16.mxu0 %v8660_v10 }
 0x331   : > { %5499 = vmatpush2.bf16.msra.mxu0 %v8658_v48 }
 0x332   : > { %5500 = vmatprep.subr.bf16.mxu0 %v8663_v11 }
 0x335   : > { %5501 = vmatpush2.bf16.msra.mxu0 %v8661_v36 }
 0x338   : > { %v5258_v14 = vpop.f32.mrf.mxu0  ;;  %5503 = vmatmul.mubr.bf16.vlgmr.msra.gmra.mxu0 %v604_v13 }
 0x339   : > { %v5259_v15 = vadd.f32 %v5258_v14, %v9453_v46 }
 0x33a   : > { %v5260_v16 = vpop.f32.mrf.mxu0  ;;  %v5299_v40 = vpop.f32.mrf.mxu1 }
 0x33b   : > { %v5261_v18 = vadd.f32 %v5260_v16, %v9455_v49  ;;  %v5300_v19 = vadd.f32 %v5299_v40, %v5259_v15 }
 0x33c   : > { %v5262_v37 = vpop.f32.mrf.mxu0  ;;  %v5301_v22 = vpop.f32.mrf.mxu1 }
 0x33d   : > { %v5302_v23 = vadd.f32 %v5301_v22, %v5261_v18 }
 0x33e   : > { %v5263_v42 = vpop.f32.mrf.mxu0  ;;  %v5303_v26 = vpop.f32.mrf.mxu1 }
 0x340   : > { %v5304_v27 = vpop.f32.mrf.mxu1 }
 0x378   : > { %v5340_v28 = vpop.f32.mrf.mxu0 }
 0x379   : > { %v5341_v29 = vadd.f32 %v5340_v28, %v5300_v19 }
 0x37a   : > { %v5342_v30 = vpop.f32.mrf.mxu0  ;;  %v5381_v24 = vpop.f32.mrf.mxu1 }
 0x37b   : > { %v5343_v56 = vadd.f32 %v5342_v30, %v5302_v23  ;;  %v5382_v31 = vadd.f32 %v5381_v24, %v5341_v29 }
 0x37c   : > { %v5344_v32 = vpop.f32.mrf.mxu0  ;;  %v5383_v33 = vpop.f32.mrf.mxu1 }
 0x37d   : > { %v5384_v35 = vadd.f32 %v5383_v33, %v5343_v56 }
 0x37e   : > { %v5345_v52 = vpop.f32.mrf.mxu0  ;;  %v5385_v38 = vpop.f32.mrf.mxu1 }
 0x380   : > { %v5386_v41 = vpop.f32.mrf.mxu1 }
 0x3b8   : > { %v5422_v44 = vpop.f32.mrf.mxu0 }
 0x3b9   : > { %v5423_v50 = vadd.f32 %v5422_v44, %v5382_v31 }
 0x3ba   : > { %v5424_v53 = vpop.f32.mrf.mxu0  ;;  %v5463_v1 = vpop.f32.mrf.mxu1 }
 0x3bb   : > { %v5425_v51 = vadd.f32 %v5424_v53, %v5384_v35  ;;  %v5464_v55 = vadd.f32 %v5463_v1, %v5423_v50 }
 0x3bc   : > { %v5426_v45 = vpop.f32.mrf.mxu0  ;;  %v5465_v46 = vpop.f32.mrf.mxu1 }
 0x3bd   : > { %v5466_v58 = vadd.f32 %v5465_v46, %v5425_v51 }
 0x3be   : > { %v5427_v47 = vpop.f32.mrf.mxu0  ;;  %v5467_v4 = vpop.f32.mrf.mxu1 }
 0x3c0   : > { %v5468_v49 = vpop.f32.mrf.mxu1 }
 0x3f8   : > { %v5504_v57 = vpop.f32.mrf.mxu0 }
 0x3f9   : > { %v5505_v34 = vadd.f32 %v5504_v57, %v5464_v55 }
 0x3fa   : > { %v5506_v59 = vpop.f32.mrf.mxu0 }
 0x3fb   : > { %v5507_v21 = vadd.f32 %v5506_v59, %v5466_v58  ;;  %v5511_v39 = vmax.f32 %v5505_v34, 0.0 }
 0x3fc   : > { %v5508_v60 = vpop.f32.mrf.mxu0 }
 0x3fd   : > { %v5512_v9 = vmax.f32 %v5507_v21, 0.0 }
 0x3fe   : > { %v5509_v62 = vpop.f32.mrf.mxu0 }
 0x3ff   : > { %v7381_v63 = vpack.c.bf16 %v5512_v9, %v5511_v39 }
 0x401   : > { %v5524_v12 = vrot.slane %v7381_v63, %v5523_v61 }
 0x403   : > { %7382 = vst.sshfl [vmem:[#allocation2] sm:$0x5 pattern:$0x73625140] %v5524_v12 }
 0x404 PF: > { %s7508_s24 = smul.u32 896, %s9068_s21  ;;  %v5668_v2 = vlaneseq  ;;  %v9089_v5 = vmov 1966171168   ;;  %s6570_s12 = sshll.u32 %s9275_s9, 4  ;;  %s6571_s12 = int_to_ptr.vmem [resolvable:$true] %s6570_s12 }
 0x405   : > { %v5713_v6 = vunpack.c.l.s4 %v9089_v5  ;;  %s7509_s11 = smul.u32 224, %s9068_s21  ;;  %s6554_s8 = scalar_lea.sflag [#allocation5], %s9265_s1 }
 0x406   : > { %v9465_v17 = vshrl.u32 %v5668_v2, 7  ;;  %s9467_s26 = scalar_lea.vmem [#allocation9], %s7508_s24  ;;  %s8984_s16 = scalar_lea.vmem %s6571_s12, 224 }
 0x407   : > { %v8664_v43 = vld [vmem:[%s9467_s26 + $0x18c] ss:$28 sps:$4 sm:$0xff]   ;;  %v8666_v7 = vld [vmem:[%s9467_s26 + $0x194] ss:$28 sps:$4 sm:$0xff]   ;;  %v5714_v8 = vunpack.c.0.s8 %v5713_v6  ;;  %v8672_v13 = vld [vmem:[%s9467_s26 + $0x15c] ss:$28 sps:$4 sm:$0xff]   ;;  %s6568_s14 = scalar_lea.hbm %s9666_s5, %s7509_s11  ;;  %p8985_p1 = scmp.ne.s32.totalorder %s6571_s12, %s8984_s16 }
 0x408   : > { %6304 = vmatprep.subr.bf16.mxu0 %v8664_v43  ;;  %v8668_v10 = vld [vmem:[%s9467_s26 + $0x188] ss:$28 sps:$4 sm:$0xff]   ;;  %v8669_v48 = vld [vmem:[%s9467_s26 + $0x190] ss:$28 sps:$4 sm:$0xff]   ;;  %6345 = vmatprep.subr.bf16.mxu1 %v8666_v7  ;;  %v8675_v15 = vld [vmem:[%s9467_s26 + $0x158] ss:$28 sps:$4 sm:$0xff]  }
 0x409   : > { %v8670_v11 = vld [vmem:[%s9467_s26 + $0x154] ss:$28 sps:$4 sm:$0xff]   ;;  %v9477_v36 = vsub.s32 %v5714_v8, %v9465_v17  ;;  %6305 = vmatpush1.bf16.msra.mxu0 %v8668_v10  ;;  %6346 = vmatpush1.bf16.msra.mxu1 %v8669_v48  ;;  %v8676_v40 = vld [vmem:[%s9467_s26 + $0x11c] ss:$28 sps:$4 sm:$0xff]   ;;  %v8678_v18 = vld [vmem:[%s9467_s26 + $0x124] ss:$28 sps:$4 sm:$0xff]   ;;  %p8986_p10 = pnand %p8985_p1, %p9225_p3 }
 0x40a   : > { %v9463_v3 = vld.sshfl [vmem:[#allocation2] sm:$0x11 pattern:$0x75316420]  ;;  %v8674_v14 = vld [vmem:[%s9467_s26 + $0x150] ss:$28 sps:$4 sm:$0xff]   ;;  %6306 = vmatprep.subr.bf16.mxu0 %v8670_v11  ;;  %6347 = vmatprep.subr.bf16.mxu1 %v8672_v13 }
 0x40b   : > { %v5711_v20 = vcombine.high %v9463_v3, %v9463_v3  ;;  %v8680_v19 = vld [vmem:[%s9467_s26 + $0x118] ss:$28 sps:$4 sm:$0xff]   ;;  %v8681_v37 = vld [vmem:[%s9467_s26 + $0x120] ss:$28 sps:$4 sm:$0xff]   ;;  %v8684_v23 = vld [vmem:[%s9467_s26 + $0xec] ss:$28 sps:$4 sm:$0xff]   ;;  %p8987_p0 = pneg %p8986_p10 }
 0x40c   : > { %v8682_v22 = vld [vmem:[%s9467_s26 + $0xe4] ss:$28 sps:$4 sm:$0xff]   ;;  %v8688_v27 = vld [vmem:[%s9467_s26 + $0xac] ss:$28 sps:$4 sm:$0xff]   ;;  %v8690_v28 = vld [vmem:[%s9467_s26 + $0xb4] ss:$28 sps:$4 sm:$0xff]  }
 0x40d   : > { %v9483_v16 = vrot.slane %v5711_v20, %v9477_v36  ;;  %6307 = vmatpush1.bf16.msra.mxu0 %v8674_v14  ;;  %6348 = vmatpush1.bf16.msra.mxu1 %v8675_v15  ;;  %v8686_v42 = vld [vmem:[%s9467_s26 + $0xe0] ss:$28 sps:$4 sm:$0xff]   ;;  %v8687_v26 = vld [vmem:[%s9467_s26 + $0xe8] ss:$28 sps:$4 sm:$0xff]   ;;  %v8693_v30 = vld [vmem:[%s9467_s26 + $0xb0] ss:$28 sps:$4 sm:$0xff]   ;;  %v9548_v15 = vrot.slane %v9463_v3, %v9477_v36 }
 0x40e   : > { %6308 = vmatprep.subr.bf16.mxu0 %v8676_v40  ;;  %6349 = vmatprep.subr.bf16.mxu1 %v8678_v18  ;;  %v8692_v29 = vld [vmem:[%s9467_s26 + $0xa8] ss:$28 sps:$4 sm:$0xff]   ;;  %v8694_v24 = vld [vmem:[%s9467_s26 + $0x74] ss:$28 sps:$4 sm:$0xff]   ;;  %v8696_v56 = vld [vmem:[%s9467_s26 + $0x7c] ss:$28 sps:$4 sm:$0xff]  }
 0x40f   : > { %6336 = vmatprep.mubr.bf16.mxu0 %v9483_v16  ;;  %6377 = vmatprep.mubr.bf16.mxu1 %v9483_v16  ;;  %v8698_v31 = vld [vmem:[%s9467_s26 + $0x70] ss:$28 sps:$4 sm:$0xff]   ;;  %v8699_v32 = vld [vmem:[%s9467_s26 + $0x78] ss:$28 sps:$4 sm:$0xff]   ;;  %v8702_v35 = vld [vmem:[%s9467_s26 + $0x44] ss:$28 sps:$4 sm:$0xff]  }
 0x410   : > { %v8700_v33 = vld [vmem:[%s9467_s26 + $0x3c] ss:$28 sps:$4 sm:$0xff]   ;;  %v8706_v41 = vld [vmem:[%s9467_s26 + $0x4] ss:$28 sps:$4 sm:$0xff]   ;;  %v8708_v44 = vld [vmem:[%s9467_s26 + $0xc] ss:$28 sps:$4 sm:$0xff]  }
 0x411   : > { %6309 = vmatpush1.bf16.msra.mxu0 %v8680_v19  ;;  %6350 = vmatpush1.bf16.msra.mxu1 %v8681_v37  ;;  %v8704_v52 = vld [vmem:[%s9467_s26 + $0x38] ss:$28 sps:$4 sm:$0xff]   ;;  %v8705_v38 = vld [vmem:[%s9467_s26 + $0x40] ss:$28 sps:$4 sm:$0xff]   ;;  %v8711_v1 = vld [vmem:[%s9467_s26 + $0x8] ss:$28 sps:$4 sm:$0xff]  }
 0x412   : > { %6310 = vmatprep.subr.bf16.mxu0 %v8682_v22  ;;  %6351 = vmatprep.subr.bf16.mxu1 %v8684_v23  ;;  %v8710_v53 = vld [vmem:[%s9467_s26] ss:$28 sps:$4 sm:$0xff]   ;;  %v8712_v45 = vld [vmem:[%s9467_s26 + $0x34c] ss:$28 sps:$4 sm:$0xff]   ;;  %v8714_v46 = vld [vmem:[%s9467_s26 + $0x354] ss:$28 sps:$4 sm:$0xff]  }
 0x413   : > { %v8716_v47 = vld [vmem:[%s9467_s26 + $0x348] ss:$28 sps:$4 sm:$0xff]   ;;  %v8717_v4 = vld [vmem:[%s9467_s26 + $0x350] ss:$28 sps:$4 sm:$0xff]   ;;  %v8720_v50 = vld [vmem:[%s9467_s26 + $0x31c] ss:$28 sps:$4 sm:$0xff]  }
 0x414   : > { %v8718_v49 = vld [vmem:[%s9467_s26 + $0x314] ss:$28 sps:$4 sm:$0xff]   ;;  %v8724_v54 = vld [vmem:[%s9467_s26 + $0x2dc] ss:$28 sps:$4 sm:$0xff]   ;;  %v8726_v55 = vld [vmem:[%s9467_s26 + $0x2e4] ss:$28 sps:$4 sm:$0xff]  }
 0x415   : > { %6311 = vmatpush1.bf16.msra.mxu0 %v8686_v42  ;;  %6352 = vmatpush1.bf16.msra.mxu1 %v8687_v26  ;;  %v8722_v51 = vld [vmem:[%s9467_s26 + $0x310] ss:$28 sps:$4 sm:$0xff]   ;;  %v8723_v25 = vld [vmem:[%s9467_s26 + $0x318] ss:$28 sps:$4 sm:$0xff]   ;;  %v8729_v58 = vld [vmem:[%s9467_s26 + $0x2e0] ss:$28 sps:$4 sm:$0xff]  }
 0x416   : > { %6312 = vmatprep.subr.bf16.mxu0 %v8688_v27  ;;  %6353 = vmatprep.subr.bf16.mxu1 %v8690_v28  ;;  %v8728_v57 = vld [vmem:[%s9467_s26 + $0x2d8] ss:$28 sps:$4 sm:$0xff]   ;;  %v8730_v34 = vld [vmem:[%s9467_s26 + $0x2a4] ss:$28 sps:$4 sm:$0xff]   ;;  %v8732_v0 = vld [vmem:[%s9467_s26 + $0x2ac] ss:$28 sps:$4 sm:$0xff]  }
 0x417   : > { %v8734_v59 = vld [vmem:[%s9467_s26 + $0x2a0] ss:$28 sps:$4 sm:$0xff]   ;;  %v8735_v21 = vld [vmem:[%s9467_s26 + $0x2a8] ss:$28 sps:$4 sm:$0xff]   ;;  %v8738_v39 = vld [vmem:[%s9467_s26 + $0x274] ss:$28 sps:$4 sm:$0xff]  }
 0x418   : > { %v8736_v60 = vld [vmem:[%s9467_s26 + $0x26c] ss:$28 sps:$4 sm:$0xff]   ;;  %v8742_v62 = vld [vmem:[%s9467_s26 + $0x234] ss:$28 sps:$4 sm:$0xff]   ;;  %v8744_v63 = vld [vmem:[%s9467_s26 + $0x23c] ss:$28 sps:$4 sm:$0xff]  }
 0x419   : > { %6313 = vmatpush1.bf16.msra.mxu0 %v8692_v29  ;;  %6354 = vmatpush1.bf16.msra.mxu1 %v8693_v30  ;;  %v8740_v9 = vld [vmem:[%s9467_s26 + $0x268] ss:$28 sps:$4 sm:$0xff]   ;;  %v8741_v61 = vld [vmem:[%s9467_s26 + $0x270] ss:$28 sps:$4 sm:$0xff]   ;;  %v8747_v2 = vld [vmem:[%s9467_s26 + $0x238] ss:$28 sps:$4 sm:$0xff]  }
 0x41a   : > { %6314 = vmatprep.subr.bf16.mxu0 %v8694_v24  ;;  %6355 = vmatprep.subr.bf16.mxu1 %v8696_v56  ;;  %v8746_v12 = vld [vmem:[%s9467_s26 + $0x230] ss:$28 sps:$4 sm:$0xff]   ;;  %v8748_v5 = vld [vmem:[%s9467_s26 + $0x1fc] ss:$28 sps:$4 sm:$0xff]   ;;  %v8750_v6 = vld [vmem:[%s9467_s26 + $0x204] ss:$28 sps:$4 sm:$0xff]  }
 0x41b   : > { %v8752_v43 = vld [vmem:[%s9467_s26 + $0x1f8] ss:$28 sps:$4 sm:$0xff]   ;;  %v8753_v7 = vld [vmem:[%s9467_s26 + $0x200] ss:$28 sps:$4 sm:$0xff]   ;;  %v8756_v8 = vld [vmem:[%s9467_s26 + $0x1cc] ss:$28 sps:$4 sm:$0xff]  }
 0x41c   : > { %v8754_v20 = vld [vmem:[%s9467_s26 + $0x1c4] ss:$28 sps:$4 sm:$0xff]   ;;  %v8762_v11 = vld [vmem:[%s9467_s26 + $0x19c] ss:$28 sps:$4 sm:$0xff]   ;;  %v8768_v3 = vld [vmem:[%s9467_s26 + $0x12c] ss:$28 sps:$4 sm:$0xff]  }
 0x41d   : > { %6315 = vmatpush1.bf16.msra.mxu0 %v8698_v31  ;;  %6356 = vmatpush1.bf16.msra.mxu1 %v8699_v32  ;;  %v8758_v10 = vld [vmem:[%s9467_s26 + $0x1c0] ss:$28 sps:$4 sm:$0xff]   ;;  %v8759_v48 = vld [vmem:[%s9467_s26 + $0x1c8] ss:$28 sps:$4 sm:$0xff]   ;;  %v8760_v14 = vld [vmem:[%s9467_s26 + $0x198] ss:$28 sps:$4 sm:$0xff]  }
 0x41e   : > { %6316 = vmatprep.subr.bf16.mxu0 %v8700_v33  ;;  %6357 = vmatprep.subr.bf16.mxu1 %v8702_v35  ;;  %v8781_v13 = vld [vmem:[%s9467_s26 + $0x360] ss:$28 sps:$4 sm:$0xff]   ;;  %v8786_v19 = vld [vmem:[%s9467_s26 + $0x328] ss:$28 sps:$4 sm:$0xff]   ;;  %v8791_v22 = vld [vmem:[%s9467_s26 + $0x2f0] ss:$28 sps:$4 sm:$0xff]  }
 0x41f   : > { %v8765_v40 = vld [vmem:[%s9467_s26 + $0x164] ss:$28 sps:$4 sm:$0xff]   ;;  %v8771_v42 = vld [vmem:[%s9467_s26 + $0xf4] ss:$28 sps:$4 sm:$0xff]   ;;  %v8774_v29 = vld [vmem:[%s9467_s26 + $0xbc] ss:$28 sps:$4 sm:$0xff]  }
 0x420   : > { %v8782_v18 = vld [vmem:[%s9467_s26 + $0x1a0] ss:$28 sps:$4 sm:$0xff]   ;;  %v8787_v36 = vld [vmem:[%s9467_s26 + $0x168] ss:$28 sps:$4 sm:$0xff]   ;;  %v8792_v26 = vld [vmem:[%s9467_s26 + $0x130] ss:$28 sps:$4 sm:$0xff]  }
 0x421   : > { %6317 = vmatpush1.bf16.msra.mxu0 %v8704_v52  ;;  %6358 = vmatpush1.bf16.msra.mxu1 %v8705_v38  ;;  %v8763_v37 = vld [vmem:[%s9467_s26 + $0x160] ss:$28 sps:$4 sm:$0xff]   ;;  %v8766_v23 = vld [vmem:[%s9467_s26 + $0x128] ss:$28 sps:$4 sm:$0xff]   ;;  %v8796_v27 = vld [vmem:[%s9467_s26 + $0x2b8] ss:$28 sps:$4 sm:$0xff]  }
 0x422   : > { %6318 = vmatprep.subr.bf16.mxu0 %v8706_v41  ;;  %6359 = vmatprep.subr.bf16.mxu1 %v8708_v44  ;;  %v8769_v28 = vld [vmem:[%s9467_s26 + $0xf0] ss:$28 sps:$4 sm:$0xff]   ;;  %v8801_v30 = vld [vmem:[%s9467_s26 + $0x280] ss:$28 sps:$4 sm:$0xff]   ;;  %v8772_v24 = vld [vmem:[%s9467_s26 + $0xb8] ss:$28 sps:$4 sm:$0xff]  }
 0x423   : > { %v8802_v56 = vld [vmem:[%s9467_s26 + $0xc0] ss:$28 sps:$4 sm:$0xff]   ;;  %v8806_v32 = vld [vmem:[%s9467_s26 + $0x248] ss:$28 sps:$4 sm:$0xff]   ;;  %v8811_v38 = vld [vmem:[%s9467_s26 + $0x210] ss:$28 sps:$4 sm:$0xff]  }
 0x424   : > { %v8777_v31 = vld [vmem:[%s9467_s26 + $0x84] ss:$28 sps:$4 sm:$0xff]   ;;  %v8780_v52 = vld [vmem:[%s9467_s26 + $0x4c] ss:$28 sps:$4 sm:$0xff]   ;;  %s9091_s29 = smov [#allocation12]  }
 0x425   : > { %6319 = vmatpush1.bf16.msra.mxu0 %v8710_v53  ;;  %6360 = vmatpush1.bf16.msra.mxu1 %v8711_v1  ;;  %v8775_v33 = vld [vmem:[%s9467_s26 + $0x80] ss:$28 sps:$4 sm:$0xff]   ;;  %v8807_v35 = vld [vmem:[%s9467_s26 + $0x88] ss:$28 sps:$4 sm:$0xff]   ;;  %v8812_v44 = vld [vmem:[%s9467_s26 + $0x50] ss:$28 sps:$4 sm:$0xff]  }
 0x426   : > { %6320 = vmatprep.subr.bf16.mxu0 %v8712_v45  ;;  %6361 = vmatprep.subr.bf16.mxu1 %v8714_v46  ;;  %v8778_v41 = vld [vmem:[%s9467_s26 + $0x48] ss:$28 sps:$4 sm:$0xff]   ;;  %v8785_v53 = vld [vmem:[%s9467_s26 + $0x14] ss:$28 sps:$4 sm:$0xff]   ;;  %s8988_s0 = sshll.u32 %s9091_s29, 4  ;;  %s8989_s0 = int_to_ptr.vmem [resolvable:$false] %s8988_s0 }
 0x427   : > { %v8816_v1 = vld [vmem:[%s9467_s26 + $0x1d8] ss:$28 sps:$4 sm:$0xff]   ;;  %v8783_v45 = vld [vmem:[%s9467_s26 + $0x10] ss:$28 sps:$4 sm:$0xff]   ;;  %s8990_s21 = scalar_lea.vmem %s8989_s0, 448  ;;  %p8991_p2 = scmp.lt.s32.totalorder %s6571_s12, %s8989_s0 }
 0x428   : > { %v8817_v46 = vld [vmem:[%s9467_s26 + $0x18] ss:$28 sps:$4 sm:$0xff]   ;;  %p8992_p4 = scmp.lt.s32.totalorder %s8990_s21, %s8984_s16 }
 0x429   : > { %6321 = vmatpush2.bf16.msra.mxu0 %v8716_v47  ;;  %6362 = vmatpush2.bf16.msra.mxu1 %v8717_v4  ;;  %v8790_v47 = vld [vmem:[%s9467_s26 + $0x35c] ss:$28 sps:$4 sm:$0xff]  }
 0x42a   : > { %6322 = vmatprep.subr.bf16.mxu0 %v8718_v49  ;;  %6363 = vmatprep.subr.bf16.mxu1 %v8720_v50  ;;  %v8788_v4 = vld [vmem:[%s9467_s26 + $0x358] ss:$28 sps:$4 sm:$0xff]   ;;  %v8795_v49 = vld [vmem:[%s9467_s26 + $0x324] ss:$28 sps:$4 sm:$0xff]   ;;  %p8993_p5 = por %p8992_p4, %p8991_p2 }
 0x42b   : > { %v8793_v50 = vld [vmem:[%s9467_s26 + $0x320] ss:$28 sps:$4 sm:$0xff]  }
 0x42c   : > { %p8994_p7 = pnand %p8993_p5, %p8987_p0 }
 0x42d   : > { %6323 = vmatpush2.bf16.msra.mxu0 %v8722_v51  ;;  %6364 = vmatpush2.bf16.msra.mxu1 %v8723_v25  ;;  %v8800_v51 = vld [vmem:[%s9467_s26 + $0x2ec] ss:$28 sps:$4 sm:$0xff]  }
 0x42e   : > { %6324 = vmatprep.subr.bf16.mxu0 %v8724_v54  ;;  %6365 = vmatprep.subr.bf16.mxu1 %v8726_v55  ;;  %v8798_v25 = vld [vmem:[%s9467_s26 + $0x2e8] ss:$28 sps:$4 sm:$0xff]   ;;  %v8805_v54 = vld [vmem:[%s9467_s26 + $0x2b4] ss:$28 sps:$4 sm:$0xff]  }
 0x42f   : > { %v8803_v55 = vld [vmem:[%s9467_s26 + $0x2b0] ss:$28 sps:$4 sm:$0xff]  }
 0x431   : > { %6325 = vmatpush2.bf16.msra.mxu0 %v8728_v57  ;;  %6366 = vmatpush2.bf16.msra.mxu1 %v8729_v58  ;;  %v8810_v57 = vld [vmem:[%s9467_s26 + $0x27c] ss:$28 sps:$4 sm:$0xff]  }
 0x432   : > { %6326 = vmatprep.subr.bf16.mxu0 %v8730_v34  ;;  %6367 = vmatprep.subr.bf16.mxu1 %v8732_v0  ;;  %v8808_v58 = vld [vmem:[%s9467_s26 + $0x278] ss:$28 sps:$4 sm:$0xff]   ;;  %v8815_v34 = vld [vmem:[%s9467_s26 + $0x244] ss:$28 sps:$4 sm:$0xff]  }
 0x433   : > { %v8813_v0 = vld [vmem:[%s9467_s26 + $0x240] ss:$28 sps:$4 sm:$0xff]  }
 0x435   : > { %6327 = vmatpush2.bf16.msra.mxu0 %v8734_v59  ;;  %6368 = vmatpush2.bf16.msra.mxu1 %v8735_v21  ;;  %v8820_v59 = vld [vmem:[%s9467_s26 + $0x20c] ss:$28 sps:$4 sm:$0xff]  }
 0x436   : > { %6328 = vmatprep.subr.bf16.mxu0 %v8736_v60  ;;  %6369 = vmatprep.subr.bf16.mxu1 %v8738_v39  ;;  %v8818_v21 = vld [vmem:[%s9467_s26 + $0x208] ss:$28 sps:$4 sm:$0xff]   ;;  %v8823_v60 = vld [vmem:[%s9467_s26 + $0x1d4] ss:$28 sps:$4 sm:$0xff]  }
 0x437   : > { %v8821_v39 = vld [vmem:[%s9467_s26 + $0x1d0] ss:$28 sps:$4 sm:$0xff]  }
 0x439   : > { %6329 = vmatpush2.bf16.msra.mxu0 %v8740_v9  ;;  %6370 = vmatpush2.bf16.msra.mxu1 %v8741_v61  ;;  %v5670_v9 = vsub.s32 0, %v9465_v17  ;;  %v5678_v61 = vsub.s32 2, %v9465_v17 }
 0x43a   : > { %6330 = vmatprep.subr.bf16.mxu0 %v8742_v62  ;;  %6371 = vmatprep.subr.bf16.mxu1 %v8744_v63  ;;  %v9604_v62 = vld [vmem:[%s9268_s30] sm:$0xff]  ;;  %v5674_v63 = vsub.s32 1, %v9465_v17 }
 0x43d   : > { %6331 = vmatpush2.bf16.msra.mxu0 %v8746_v12  ;;  %6372 = vmatpush2.bf16.msra.mxu1 %v8747_v2  ;;  %v5682_v12 = vsub.s32 3, %v9465_v17  ;;  %v5671_v2 = vrot.slane %v9604_v62, %v5670_v9 }
 0x43e   : > { %6332 = vmatprep.subr.bf16.mxu0 %v8748_v5  ;;  %6373 = vmatprep.subr.bf16.mxu1 %v8750_v6  ;;  %v5679_v5 = vrot.slane %v9604_v62, %v5678_v61  ;;  %v5675_v6 = vrot.slane %v9604_v62, %v5674_v63 }
 0x441   : > { %6333 = vmatpush2.bf16.msra.mxu0 %v8752_v43  ;;  %6374 = vmatpush2.bf16.msra.mxu1 %v8753_v7  ;;  %v5683_v43 = vrot.slane %v9604_v62, %v5682_v12 }
 0x442   : > { %6334 = vmatprep.subr.bf16.mxu0 %v8754_v20  ;;  %6375 = vmatprep.subr.bf16.mxu1 %v8756_v8 }
 0x445   : > { %6335 = vmatpush2.bf16.msra.mxu0 %v8758_v10  ;;  %6376 = vmatpush2.bf16.msra.mxu1 %v8759_v48 }
 0x446   : > { %6386 = vmatprep.subr.bf16.mxu0 %v8762_v11  ;;  %7510 = vmatprep.subr.bf16.mxu1 %v8781_v13 }
 0x448   : > { %6337 = vmatmul.mubr.bf16.vlgmr.msra.gmra.mxu0 %v9548_v15  ;;  %6378 = vmatmul.mubr.bf16.vlgmr.msra.gmra.mxu1 %v9548_v15 }
 0x449   : > { %6387 = vmatpush1.bf16.msra.mxu0 %v8760_v14  ;;  %7511 = vmatpush3.bf16.msra.mxu1 %v8782_v18 }
 0x44a   : > { %6388 = vmatprep.subr.bf16.mxu0 %v8765_v40  ;;  %7512 = vmatprep.subr.bf16.mxu1 %v8786_v19 }
 0x44b   : > { %6459 = vmatprep.mubr.bf16.mxu1 %v9483_v16  ;;  %6418 = vmatprep.mubr.bf16.mxu0 %v9483_v16  ;;  %v8797_v16 = vld [vmem:[%s9467_s26 + $0xf8] ss:$28 sps:$4 sm:$0xff]  }
 0x44d   : > { %6389 = vmatpush1.bf16.msra.mxu0 %v8763_v37  ;;  %7513 = vmatpush3.bf16.msra.mxu1 %v8787_v36 }
 0x44e   : > { %6390 = vmatprep.subr.bf16.mxu0 %v8768_v3  ;;  %7514 = vmatprep.subr.bf16.mxu1 %v8791_v22 }
 0x451   : > { %6391 = vmatpush1.bf16.msra.mxu0 %v8766_v23  ;;  %7515 = vmatpush3.bf16.msra.mxu1 %v8792_v26 }
 0x452   : > { %6392 = vmatprep.subr.bf16.mxu0 %v8771_v42  ;;  %7516 = vmatprep.subr.bf16.mxu1 %v8796_v27 }
 0x455   : > { %6393 = vmatpush1.bf16.msra.mxu0 %v8769_v28  ;;  %7517 = vmatpush3.bf16.msra.mxu1 %v8797_v16 }
 0x456   : > { %6394 = vmatprep.subr.bf16.mxu0 %v8774_v29  ;;  %7518 = vmatprep.subr.bf16.mxu1 %v8801_v30 }
 0x459   : > { %6395 = vmatpush1.bf16.msra.mxu0 %v8772_v24  ;;  %7519 = vmatpush3.bf16.msra.mxu1 %v8802_v56  ;;  %v9090_v24 = vmov 1983009808  }
 0x45a   : > { %6396 = vmatprep.subr.bf16.mxu0 %v8777_v31  ;;  %7520 = vmatprep.subr.bf16.mxu1 %v8806_v32  ;;  %v6519_v56 = vunpack.c.l.s4 %v9090_v24 }
 0x45c   : > { %v6520_v31 = vunpack.c.0.s8 %v6519_v56 }
 0x45d   : > { %6397 = vmatpush1.bf16.msra.mxu0 %v8775_v33  ;;  %7521 = vmatpush3.bf16.msra.mxu1 %v8807_v35 }
 0x45e   : > { %6398 = vmatprep.subr.bf16.mxu0 %v8780_v52  ;;  %7522 = vmatprep.subr.bf16.mxu1 %v8811_v38  ;;  %v6523_v38 = vsub.s32 %v6520_v31, %v9465_v17 }
 0x461   : > { %6399 = vmatpush1.bf16.msra.mxu0 %v8778_v41  ;;  %7523 = vmatpush3.bf16.msra.mxu1 %v8812_v44 }
 0x462   : > { %6400 = vmatprep.subr.bf16.mxu0 %v8785_v53  ;;  %7524 = vmatprep.subr.bf16.mxu1 %v8816_v1 }
 0x465   : > { %6401 = vmatpush1.bf16.msra.mxu0 %v8783_v45  ;;  %7525 = vmatpush3.bf16.msra.mxu1 %v8817_v46 }
 0x466   : > { %6402 = vmatprep.subr.bf16.mxu0 %v8790_v47 }
 0x468   : > { %6460 = vmatmul.mubr.bf16.vlgmr.msra.gmra.mxu1 %v9548_v15 }
 0x469   : > { %6403 = vmatpush2.bf16.msra.mxu0 %v8788_v4 }
 0x46a   : > { %6404 = vmatprep.subr.bf16.mxu0 %v8795_v49 }
 0x46d   : > { %6405 = vmatpush2.bf16.msra.mxu0 %v8793_v50  ;;  %v5694_v50 = vsub.s32 6, %v9465_v17 }
 0x46e   : > { %6406 = vmatprep.subr.bf16.mxu0 %v8800_v51 }
 0x46f   : > { %v5695_v51 = vrot.slane %v9604_v62, %v5694_v50 }
 0x471   : > { %6407 = vmatpush2.bf16.msra.mxu0 %v8798_v25 }
 0x472   : > { %6408 = vmatprep.subr.bf16.mxu0 %v8805_v54 }
 0x475   : > { %6409 = vmatpush2.bf16.msra.mxu0 %v8803_v55  ;;  %v5686_v55 = vsub.s32 4, %v9465_v17 }
 0x476   : > { %6410 = vmatprep.subr.bf16.mxu0 %v8810_v57  ;;  %v5690_v57 = vsub.s32 5, %v9465_v17 }
 0x479   : > { %6411 = vmatpush2.bf16.msra.mxu0 %v8808_v58 }
 0x47a   : > { %6412 = vmatprep.subr.bf16.mxu0 %v8815_v34  ;;  %v5687_v34 = vrot.slane %v9604_v62, %v5686_v55 }
 0x47d   : > { %6413 = vmatpush2.bf16.msra.mxu0 %v8813_v0  ;;  %v5691_v0 = vrot.slane %v9604_v62, %v5690_v57 }
 0x47e   : > { %6414 = vmatprep.subr.bf16.mxu0 %v8820_v59 }
 0x481   : > { %6415 = vmatpush2.bf16.msra.mxu0 %v8818_v21 }
 0x482   : > { %6416 = vmatprep.subr.bf16.mxu0 %v8823_v60 }
 0x485   : > { %6417 = vmatpush2.bf16.msra.mxu0 %v8821_v39 }
 0x488   : > { %6419 = vmatmul.mubr.bf16.vlgmr.msra.gmra.mxu0 %v9548_v15 }
 0x508   : > { %v6338_v7 = vpop.f32.mrf.mxu0  ;;  %v6379_v20 = vpop.f32.mrf.mxu1 }
 0x509   : > { %v6339_v8 = vadd.f32 %v6338_v7, %v5671_v2  ;;  %v6380_v10 = vadd.f32 %v6379_v20, %v5679_v5 }
 0x50a   : > { %v6340_v48 = vpop.f32.mrf.mxu0  ;;  %v6381_v11 = vpop.f32.mrf.mxu1 }
 0x50b   : > { %v7497_v13 = vmul.f32 -1.442695, %v6339_v8  ;;  %v7499_v14 = vmul.f32 -1.442695, %v6380_v10  ;;  %v6341_v15 = vadd.f32 %v6340_v48, %v5675_v6  ;;  %v6382_v40 = vadd.f32 %v6381_v11, %v5683_v43 }
 0x50c   : > { %v6342_v18 = vpop.f32.mrf.mxu0  ;;  %v6383_v19 = vpop.f32.mrf.mxu1 }
 0x50d   : > { %8824 = vpow2.f32 %v7497_v13  ;;  %v7498_v37 = vmul.f32 -1.442695, %v6341_v15  ;;  %v7500_v3 = vmul.f32 -1.442695, %v6382_v40 }
 0x50e   : > { %8826 = vpow2.f32 %v7499_v14  ;;  %v6343_v36 = vpop.f32.mrf.mxu0  ;;  %v6384_v22 = vpop.f32.mrf.mxu1 }
 0x50f   : > { %8828 = vpow2.f32 %v7498_v37 }
 0x510   : > { %8830 = vpow2.f32 %v7500_v3 }
 0x51a   : > { %v8825_v23 = vpop.eup %8824 }
 0x51b   : > { %v8827_v42 = vpop.eup %8826  ;;  %v6488_v26 = vadd.f32 1.0, %v8825_v23 }
 0x51c   : > { %v8829_v27 = vpop.eup %8828  ;;  %v6490_v28 = vadd.f32 1.0, %v8827_v42 }
 0x51d   : > { %v8831_v29 = vpop.eup %8830  ;;  %8832 = vrcp.f32 %v6488_v26  ;;  %v6489_v16 = vadd.f32 1.0, %v8829_v27 }
 0x51e   : > { %8834 = vrcp.f32 %v6490_v28  ;;  %v6491_v30 = vadd.f32 1.0, %v8831_v29 }
 0x51f   : > { %8836 = vrcp.f32 %v6489_v16 }
 0x520   : > { %8838 = vrcp.f32 %v6491_v30 }
 0x528   : > { %v7526_v32 = vpop.f32.mrf.mxu1 }
 0x52a   : > { %v8833_v33 = vpop.eup %8832  ;;  %v7527_v35 = vpop.f32.mrf.mxu1 }
 0x52b   : > { %v8835_v52 = vpop.eup %8834  ;;  %v7528_v25 = vadd.f32 %v7527_v35, %v7526_v32 }
 0x52c   : > { %v8837_v41 = vpop.eup %8836  ;;  %v7529_v44 = vpop.f32.mrf.mxu1 }
 0x52d   : > { %v8839_v53 = vpop.eup %8838  ;;  %v6516_v1 = vcombine.low %v8833_v33, %v8837_v41  ;;  %v6462_v54 = vadd.f32 %v7528_v25, %v5695_v51 }
 0x52e   : > { %v7530_v45 = vpop.f32.mrf.mxu1  ;;  %v6517_v46 = vcombine.low %v8835_v52, %v8839_v53 }
 0x52f   : > { %v6524_v47 = vrot.slane %v6516_v1, %v6523_v38  ;;  %v7503_v58 = vmul.f32 -1.442695, %v6462_v54 }
 0x530   : > { %v6531_v4 = vrot.slane %v6517_v46, %v6523_v38 }
 0x531   : > { %8840 = vpow2.f32 %v7503_v58 }
 0x532   : > { %v6532_v49 = vcombine.low %v6524_v47, %v6531_v4 }
 0x534   : > { %6551 = vst [vmem:[%s9275_s9] sm:$0xff] %v6532_v49 }
 0x53e   : > { %v8841_v2 = vpop.eup %8840 }
 0x53f   : > { %v6494_v17 = vadd.f32 1.0, %v8841_v2 }
 0x548   : > { %v6420_v59 = vpop.f32.mrf.mxu0 }
 0x549   : > { %v6421_v21 = vadd.f32 %v6420_v59, %v5687_v34 }
 0x54a   : > { %v6422_v60 = vpop.f32.mrf.mxu0 }
 0x54b   : > { %v7501_v39 = vmul.f32 -1.442695, %v6421_v21  ;;  %v6423_v9 = vadd.f32 %v6422_v60, %v5691_v0 }
 0x54c   : > { %v6424_v61 = vpop.f32.mrf.mxu0 }
 0x54d   : > { %8842 = vpow2.f32 %v7501_v39  ;;  %v7502_v63 = vmul.f32 -1.442695, %v6423_v9 }
 0x54e   : > { %v6425_v12 = vpop.f32.mrf.mxu0 }
 0x54f   : > { %8844 = vpow2.f32 %v7502_v63 }
 0x550   : > { %8846 = vrcp.f32 %v6494_v17 }
 0x55a   : > { %v8843_v5 = vpop.eup %8842 }
 0x55b   : > { %v6492_v6 = vadd.f32 1.0, %v8843_v5 }
 0x55c   : > { %v8845_v43 = vpop.eup %8844 }
 0x55d   : > { %v6493_v62 = vadd.f32 1.0, %v8845_v43  ;;  %8848 = vrcp.f32 %v6492_v6  ;;  %v8847_v7 = vpop.eup %8846 }
 0x55e   : > { %v6547_v11 = vrot.slane %v8847_v7, %v6523_v38 }
 0x55f   : > { %8850 = vrcp.f32 %v6493_v62 }
 0x56a   : > { %v8849_v20 = vpop.eup %8848 }
 0x56c   : > { %v8851_v8 = vpop.eup %8850 }
 0x56d   : > { %v6533_v10 = vcombine.low %v8849_v20, %v8851_v8 }
 0x56f   : > { %v6540_v48 = vrot.slane %v6533_v10, %v6523_v38 }
 0x571   : > { %v6548_v13 = vcombine.low %v6540_v48, %v6547_v11 }
 0x573   : > { %6552 = vst [vmem:[%s9275_s9 + $0x8] sm:$0x3f] %v6548_v13 }
 0x574   : > { %8997 = shalt.err (!%p8994_p7)
}
 0x575   : > { %s8998_s28 = scalar_lea.hbm %s6568_s14, 224  ;;  %s9002_s30 = scalar_lea.hbm %s9666_s5, 1344 }
 0x576   : > { %p8999_p6 = scmp.ne.s32.totalorder %s6568_s14, %s8998_s28  ;;  %p9003_p9 = scmp.lt.s32.totalorder %s6568_s14, %s9666_s5 }
 0x577   : > { %p9004_p12 = scmp.lt.s32.totalorder %s9002_s30, %s8998_s28 }
 0x578   : > { %p9000_p8 = pnand %p8999_p6, %p9225_p3 }
 0x579   : > { %p9005_p13 = por %p9004_p12, %p9003_p9 }
 0x57a   : > { %p9001_p11 = pneg %p9000_p8 }
 0x57c   : > { %p9006_p1 = pnand %p9005_p13, %p9001_p11 }
 0x57e   : > { %9009 = shalt.err (!%p9006_p1)
}
 0x57f   : > { %7553 = dma.vmem_to_hbm [thread:$0]  (%p9225_p3), %s6571_s12, 224, %s6568_s14, %s6554_s8  }
 0x580 PF: > { %p7585_p10 = scmp.ge.s32.totalorder %s9076_s23, 2  ;;  %s6582_s24 = sand.u32 1, %s9056_s18  }
 0x581   : > { %p9688_p0 = scmp.ne.s32.totalorder %s9673_s27, 0  ;;  %s6583_s26 = scalar_lea.sflag [#allocation5], %s6582_s24 }
 0x583   : > { %p7573_p2 = pnand %p7585_p10, %p9688_p0 }
 0x585   : > { %p7574_p4 = pneg %p7573_p2 }
 0x587   : > { %9051 = dma.done.wait (%p7574_p4), %s6583_s26, 224  }
 0x588   : > { %9053 = vsyncadd (%p7574_p4), %s6583_s26, 4294967072  ;;  %s21_s23 = sadd.s32 1, %s9076_s23   ;;  %s9689_s18 = smov %s9060_s19 }
 0x589   : > { %p18_p5 = scmp.ge.s32.totalorder %s21_s23, 8   ;;  %s9690_s19 = smov %s9064_s20 }
 0x58a   : > { %s9691_s20 = smov %s9236_s6  ;;  %s9692_s21 = smov %s9072_s22 }
 0x58b   : > { %s9693_s22 = smov %s9695_s15  ;;  %20 = sbr.rel (!%p18_p5) target bundleno = 10 (0xa), region = 106 }
 0x590   :  { %6588 = vsyncpa [#allocation4], 1 }
 0x591   :  { %6590 = vsyncpa [#allocation4 + $0x1], 1 }
 0x592   :  { %6591 = vsyncpa [#allocation7], 1 }
 0x593   :  { %6592 = vsyncpa [#allocation10], 1 }
 0x594   :  { %6593 = vsyncpa [#allocation5], 1 }
 0x595   :  { %6595 = vsyncpa [#allocation5 + $0x1], 1 }

</bundles_post_ra>
